<compile_context>
chip_gen: v7x
topology: tpu7x:2x2x1
jax: 0.10.0
libtpu: 0.0.40
codegen_flags: <defaults>
</compile_context>

<pallas_src>
import math

import jax
import jax.numpy as jnp
from jax import lax
from jax.experimental import pallas as pl
from jax.experimental.pallas import tpu as pltpu


# ----------------------------- configuration --------------------------------
IMAGE_SIZE = (16, 16)
PATCH_SIZE = 4
NUM_CHANNELS = 4
HIDDEN = 32
NUM_HEADS = 4
HEAD_DIM = HIDDEN // NUM_HEADS
INTERMEDIATE = 64
NUM_CLASSES = 10
LAYER_NORM_EPS = 1e-12
NUM_PATCHES = (IMAGE_SIZE[0] // PATCH_SIZE) * (IMAGE_SIZE[1] // PATCH_SIZE)
SEQ = NUM_PATCHES + 1
PATCH_DIM = NUM_CHANNELS * PATCH_SIZE * PATCH_SIZE
BATCH = 2
# hidden_act: GELU(approximate='tanh')


# ------------------------------- helpers -------------------------------------
def _layernorm(x, gamma, beta, eps):
    mu = jnp.mean(x, axis=-1, keepdims=True)
    var = jnp.mean(jnp.square(x - mu), axis=-1, keepdims=True)
    return (x - mu) * lax.rsqrt(var + eps) * gamma + beta


def _gelu_tanh(x):
    c = math.sqrt(2.0 / math.pi)
    return 0.5 * x * (1.0 + jnp.tanh(c * (x + 0.044715 * x * x * x)))


# ------------------------------ fused Pallas kernel ---------------------------
def vit_fused_kernel(patches_ref, pw_ref, pb_ref, cls_ref, pos_ref,
                     wqkv_ref, bqkv_ref, wo_ref, bo_ref,
                     ln1g_ref, ln1b_ref, ln2g_ref, ln2b_ref,
                     wi_ref, bi_ref, wo2_ref, bo2_ref,
                     lnfg_ref, lnfb_ref, poolw_ref, poolb_ref,
                     clsw_ref, clsb_ref,
                     seq_ref, pool_ref, prob_ref,
                     x_scr, ctx_scr):
    eps = LAYER_NORM_EPS
    f32 = jnp.float32
    nb = patches_ref.shape[0] // NUM_PATCHES      # static batch size

    # ---- patch embedding (conv-as-matmul) + CLS + position embeddings ----
    # Direct slice-stores into the (B*SEQ, D) activation scratch (no concat).
    proj = jnp.dot(patches_ref[...], pw_ref[...],
                   preferred_element_type=f32) + pb_ref[...]       # (B*N, D)
    pos = pos_ref[...]                                             # (SEQ, D)
    cls_row = cls_ref[...] + pos[0:1, :]                           # (1, D)
    for b in range(nb):
        r0 = b * SEQ
        x_scr[r0:r0 + 1, :] = cls_row
        x_scr[r0 + 1:r0 + SEQ, :] = (
            proj[b * NUM_PATCHES:(b + 1) * NUM_PATCHES, :] + pos[1:, :])

    x2d = x_scr[...]                                               # (B*SEQ, D)

    # ---- encoder layer: layernorm_before + fused-QKV self-attention ------
    xn = _layernorm(x2d, ln1g_ref[...], ln1b_ref[...], eps)
    qkv = jnp.dot(xn, wqkv_ref[...], preferred_element_type=f32) + bqkv_ref[...]
    q = qkv[:, 0 * HIDDEN:1 * HIDDEN]
    k = qkv[:, 1 * HIDDEN:2 * HIDDEN]
    v = qkv[:, 2 * HIDDEN:3 * HIDDEN]

    inv_sqrt_d = 1.0 / math.sqrt(HEAD_DIM)
    for b in range(nb):                                            # static unroll
        r0 = b * SEQ
        q_b = q[r0:r0 + SEQ, :]
        k_b = k[r0:r0 + SEQ, :]
        v_b = v[r0:r0 + SEQ, :]
        for h in range(NUM_HEADS):                                 # static unroll
            c0 = h * HEAD_DIM
            qh = q_b[:, c0:c0 + HEAD_DIM]
            kh = k_b[:, c0:c0 + HEAD_DIM]
            vh = v_b[:, c0:c0 + HEAD_DIM]
            # contract last axes of both operands (no explicit kh.T)
            scores = lax.dot_general(qh, kh, (((1,), (1,)), ((), ())),
                                     preferred_element_type=f32) * inv_sqrt_d
            probs = jax.nn.softmax(scores, axis=-1)
            ctx_scr[r0:r0 + SEQ, c0:c0 + HEAD_DIM] = jnp.dot(
                probs, vh, preferred_element_type=f32)

    ctx = ctx_scr[...]
    attn_out = jnp.dot(ctx, wo_ref[...], preferred_element_type=f32) + bo_ref[...]
    h1 = attn_out + x2d                                            # residual 1

    # ---- layernorm_after + MLP -------------------------------------------
    h1n = _layernorm(h1, ln2g_ref[...], ln2b_ref[...], eps)
    inter = _gelu_tanh(jnp.dot(h1n, wi_ref[...],
                               preferred_element_type=f32) + bi_ref[...])
    mlp_out = jnp.dot(inter, wo2_ref[...],
                      preferred_element_type=f32) + bo2_ref[...]
    h2 = mlp_out + h1                                              # residual 2

    # ---- final layernorm, pooler (stacked CLS rows), classifier + softmax -
    y = _layernorm(h2, lnfg_ref[...], lnfb_ref[...], eps)
    seq_ref[...] = y

    cls_rows = jnp.concatenate(
        [y[b * SEQ:b * SEQ + 1, :] for b in range(nb)], axis=0)    # (B, D)
    pooled = jnp.tanh(jnp.dot(cls_rows, poolw_ref[...],
                              preferred_element_type=f32) + poolb_ref[...])
    pool_ref[...] = pooled

    logits = jnp.dot(pooled, clsw_ref[...],
                     preferred_element_type=f32) + clsb_ref[...]
    prob_ref[...] = jax.nn.softmax(logits, axis=-1)


# ------------------------------ wrapper ---------------------------------------
def vit_forward_pallas(image, params):
    B = image.shape[0]
    P = PATCH_SIZE
    # NCHW image -> (B*num_patches, C*P*P) patch matrix, inner order (c, kh, kw)
    patches = image.reshape(B, NUM_CHANNELS, IMAGE_SIZE[0] // P, P,
                            IMAGE_SIZE[1] // P, P)
    patches = patches.transpose(0, 2, 4, 1, 3, 5).reshape(
        B * NUM_PATCHES, PATCH_DIM)

    # fuse Q|K|V weights/biases at trace time
    wqkv = jnp.concatenate([params["wq"], params["wk"], params["wv"]], axis=1)
    bqkv = jnp.concatenate([params["bq"], params["bk"], params["bv"]], axis=1)

    seq2d, pooled, probs = pl.pallas_call(
        vit_fused_kernel,
        out_shape=(jax.ShapeDtypeStruct((B * SEQ, HIDDEN), jnp.float32),
                   jax.ShapeDtypeStruct((B, HIDDEN), jnp.float32),
                   jax.ShapeDtypeStruct((B, NUM_CLASSES), jnp.float32)),
        scratch_shapes=[pltpu.VMEM((B * SEQ, HIDDEN), jnp.float32),   # x
                        pltpu.VMEM((B * SEQ, HIDDEN), jnp.float32)],  # ctx
    )(patches, params["proj_w"], params["proj_b"], params["cls"], params["pos"],
      wqkv, bqkv, params["wo"], params["bo"],
      params["ln1_g"], params["ln1_b"], params["ln2_g"], params["ln2_b"],
      params["wi"], params["bi"], params["wo2"], params["bo2"],
      params["lnf_g"], params["lnf_b"], params["pool_w"], params["pool_b"],
      params["cls_w"], params["cls_b"])

    return seq2d.reshape(B, SEQ, HIDDEN), pooled, probs


# --------------------------- pure-JAX reference -------------------------------
def vit_forward_ref(image, p):
    B = image.shape[0]
    P = PATCH_SIZE
    patches = image.reshape(B, NUM_CHANNELS, IMAGE_SIZE[0] // P, P,
                            IMAGE_SIZE[1] // P, P)
    patches = patches.transpose(0, 2, 4, 1, 3, 5).reshape(B, NUM_PATCHES, PATCH_DIM)
    proj = patches @ p["proj_w"] + p["proj_b"]
    cls = jnp.broadcast_to(p["cls"][None], (B, 1, HIDDEN))
    x = jnp.concatenate([cls, proj], axis=1) + p["pos"][None]

    def ln(v, g, b):
        mu = v.mean(-1, keepdims=True)
        var = ((v - mu) ** 2).mean(-1, keepdims=True)
        return (v - mu) / jnp.sqrt(var + LAYER_NORM_EPS) * g + b

    xn = ln(x, p["ln1_g"], p["ln1_b"])
    q = xn @ p["wq"] + p["bq"]
    k = xn @ p["wk"] + p["bk"]
    v = xn @ p["wv"] + p["bv"]

    def split(t):
        return t.reshape(B, SEQ, NUM_HEADS, HEAD_DIM).transpose(0, 2, 1, 3)

    qh, kh, vh = split(q), split(k), split(v)
    scores = qh @ kh.transpose(0, 1, 3, 2) / math.sqrt(HEAD_DIM)
    probs = jax.nn.softmax(scores, axis=-1)
    ctx = (probs @ vh).transpose(0, 2, 1, 3).reshape(B, SEQ, HIDDEN)
    attn_out = ctx @ p["wo"] + p["bo"]
    h1 = attn_out + x
    h1n = ln(h1, p["ln2_g"], p["ln2_b"])
    inter = _gelu_tanh(h1n @ p["wi"] + p["bi"])
    enc = inter @ p["wo2"] + p["bo2"] + h1
    seq_out = ln(enc, p["lnf_g"], p["lnf_b"])
    pooled = jnp.tanh(seq_out[:, 0] @ p["pool_w"] + p["pool_b"])
    logits = pooled @ p["cls_w"] + p["cls_b"]
    return seq_out, pooled, jax.nn.softmax(logits, axis=-1)


# -------------------------------- params --------------------------------------
def init_params(key):
    ks = jax.random.split(key, 24)

    def n(k, shape, scale=0.02):
        return (scale * jax.random.normal(k, shape)).astype(jnp.float32)

    params = {
        # patch projection: torch Conv2d weight (D, C, P, P) flattened & transposed
        "proj_w": n(ks[0], (PATCH_DIM, HIDDEN)),
        "proj_b": n(ks[1], (1, HIDDEN)),
        "cls":    n(ks[2], (1, HIDDEN), 1.0),
        "pos":    n(ks[3], (SEQ, HIDDEN), 1.0),
        # attention (nn.Linear weights pre-transposed to (in, out))
        "wq": n(ks[4], (HIDDEN, HIDDEN)),  "bq": n(ks[5], (1, HIDDEN)),
        "wk": n(ks[6], (HIDDEN, HIDDEN)),  "bk": n(ks[7], (1, HIDDEN)),
        "wv": n(ks[8], (HIDDEN, HIDDEN)),  "bv": n(ks[9], (1, HIDDEN)),
        "wo": n(ks[10], (HIDDEN, HIDDEN)), "bo": n(ks[11], (1, HIDDEN)),
        "ln1_g": jnp.ones((1, HIDDEN), jnp.float32),
        "ln1_b": jnp.zeros((1, HIDDEN), jnp.float32),
        # MLP
        "wi":  n(ks[12], (HIDDEN, INTERMEDIATE)), "bi":  n(ks[13], (1, INTERMEDIATE)),
        "wo2": n(ks[14], (INTERMEDIATE, HIDDEN)), "bo2": n(ks[15], (1, HIDDEN)),
        "ln2_g": jnp.ones((1, HIDDEN), jnp.float32),
        "ln2_b": jnp.zeros((1, HIDDEN), jnp.float32),
        # final layernorm + pooler
        "lnf_g": jnp.ones((1, HIDDEN), jnp.float32),
        "lnf_b": jnp.zeros((1, HIDDEN), jnp.float32),
        "pool_w": n(ks[16], (HIDDEN, HIDDEN)),
        "pool_b": n(ks[17], (1, HIDDEN)),
        # classification head + softmax
        "cls_w": n(ks[18], (HIDDEN, NUM_CLASSES)),
        "cls_b": n(ks[19], (1, NUM_CLASSES)),
    }
    return params


# --------------------------------- main ----------------------------------------
if __name__ == "__main__":
    key = jax.random.PRNGKey(0)
    k_img, k_par = jax.random.split(key)
    image = jax.random.normal(
        k_img, (BATCH, NUM_CHANNELS, IMAGE_SIZE[0], IMAGE_SIZE[1]), jnp.float32)
    params = init_params(k_par)

    seq_out, pooled, probs = jax.jit(vit_forward_pallas)(image, params)
    seq_out = jax.block_until_ready(seq_out)
    pooled = jax.block_until_ready(pooled)
    probs = jax.block_until_ready(probs)

    seq_r, pool_r, prob_r = vit_forward_ref(image, params)
    assert seq_out.shape == (BATCH, SEQ, HIDDEN)
    assert pooled.shape == (BATCH, HIDDEN)
    assert probs.shape == (BATCH, NUM_CLASSES)
    assert jnp.allclose(seq_out, seq_r, atol=1e-4, rtol=1e-4)
    assert jnp.allclose(pooled, pool_r, atol=1e-4, rtol=1e-4)
    assert jnp.allclose(probs, prob_r, atol=1e-4, rtol=1e-4)

    # TODO(synk): dropout layers are eval-mode identity (probs fixed to 0.0).
    # TODO(synk): the spec hard-codes classifier = nn.Linear(512, num_classes);
    #   with this small hidden_size=32 config it is implemented as
    #   Linear(HIDDEN, NUM_CLASSES) (the 512 only matches when hidden_size=512).
    print("KERNEL_OK")
</pallas_src>

<mosaic_0001>
module attributes {stable_mosaic.version = 11 : i64} {
  func.func @vit_fused_kernel(%arg0: memref<32x64xf32, #tpu.memory_space<vmem>>, %arg1: memref<64x32xf32, #tpu.memory_space<vmem>>, %arg2: memref<1x32xf32, #tpu.memory_space<vmem>>, %arg3: memref<1x32xf32, #tpu.memory_space<vmem>>, %arg4: memref<17x32xf32, #tpu.memory_space<vmem>>, %arg5: memref<32x96xf32, #tpu.memory_space<vmem>>, %arg6: memref<1x96xf32, #tpu.memory_space<vmem>>, %arg7: memref<32x32xf32, #tpu.memory_space<vmem>>, %arg8: memref<1x32xf32, #tpu.memory_space<vmem>>, %arg9: memref<1x32xf32, #tpu.memory_space<vmem>>, %arg10: memref<1x32xf32, #tpu.memory_space<vmem>>, %arg11: memref<1x32xf32, #tpu.memory_space<vmem>>, %arg12: memref<1x32xf32, #tpu.memory_space<vmem>>, %arg13: memref<32x64xf32, #tpu.memory_space<vmem>>, %arg14: memref<1x64xf32, #tpu.memory_space<vmem>>, %arg15: memref<64x32xf32, #tpu.memory_space<vmem>>, %arg16: memref<1x32xf32, #tpu.memory_space<vmem>>, %arg17: memref<1x32xf32, #tpu.memory_space<vmem>>, %arg18: memref<1x32xf32, #tpu.memory_space<vmem>>, %arg19: memref<32x32xf32, #tpu.memory_space<vmem>>, %arg20: memref<1x32xf32, #tpu.memory_space<vmem>>, %arg21: memref<32x10xf32, #tpu.memory_space<vmem>>, %arg22: memref<1x10xf32, #tpu.memory_space<vmem>>, %arg23: memref<34x32xf32, #tpu.memory_space<vmem>>, %arg24: memref<2x32xf32, #tpu.memory_space<vmem>>, %arg25: memref<2x10xf32, #tpu.memory_space<vmem>>, %arg26: memref<34x32xf32, #tpu.memory_space<vmem>>, %arg27: memref<34x32xf32, #tpu.memory_space<vmem>>) attributes {dimension_semantics = [], scalar_prefetch = 0 : i64, scratch_operands = 2 : i64, tpu.core_type = #tpu.core_type<tc>} {
    %c0 = arith.constant 0 : index
    %c0_0 = arith.constant 0 : index
    %0 = vector.load %arg0[%c0, %c0_0] : memref<32x64xf32, #tpu.memory_space<vmem>>, vector<32x64xf32>
    %c0_1 = arith.constant 0 : index
    %c0_2 = arith.constant 0 : index
    %1 = vector.load %arg1[%c0_1, %c0_2] : memref<64x32xf32, #tpu.memory_space<vmem>>, vector<64x32xf32>
    %cst = arith.constant dense<0.000000e+00> : vector<32x32xf32>
    %2 = tpu.matmul %0, %1, %cst {dimension_numbers = #tpu.dot_dimension_numbers<[1], [0], [0], [1], [0, 0, 1, 1], [], []>} : vector<32x64xf32>, vector<64x32xf32>, vector<32x32xf32> -> vector<32x32xf32>
    %c0_3 = arith.constant 0 : index
    %c0_4 = arith.constant 0 : index
    %3 = vector.load %arg2[%c0_3, %c0_4] : memref<1x32xf32, #tpu.memory_space<vmem>>, vector<1x32xf32>
    %4 = vector.broadcast %3 : vector<1x32xf32> to vector<32x32xf32>
    %5 = arith.addf %2, %4 : vector<32x32xf32>
    %c0_5 = arith.constant 0 : index
    %c0_6 = arith.constant 0 : index
    %6 = vector.load %arg4[%c0_5, %c0_6] : memref<17x32xf32, #tpu.memory_space<vmem>>, vector<17x32xf32>
    %c0_7 = arith.constant 0 : index
    %c0_8 = arith.constant 0 : index
    %7 = vector.load %arg3[%c0_7, %c0_8] : memref<1x32xf32, #tpu.memory_space<vmem>>, vector<1x32xf32>
    %8 = vector.extract_strided_slice %6 {offsets = [0, 0], sizes = [1, 32], strides = [1, 1]} : vector<17x32xf32> to vector<1x32xf32>
    %9 = arith.addf %7, %8 : vector<1x32xf32>
    %c0_9 = arith.constant 0 : index
    %c0_10 = arith.constant 0 : index
    %10 = vector.load %arg26[%c0_9, %c0_10] : memref<34x32xf32, #tpu.memory_space<vmem>>, vector<1x32xf32>
    tpu.vector_store %arg26[%c0_9, %c0_10], %9 {strides = array<i32>} : memref<34x32xf32, #tpu.memory_space<vmem>>, vector<1x32xf32>,
    %11 = vector.extract_strided_slice %5 {offsets = [0, 0], sizes = [16, 32], strides = [1, 1]} : vector<32x32xf32> to vector<16x32xf32>
    %12 = vector.extract_strided_slice %6 {offsets = [1, 0], sizes = [16, 32], strides = [1, 1]} : vector<17x32xf32> to vector<16x32xf32>
    %13 = arith.addf %11, %12 : vector<16x32xf32>
    %c1 = arith.constant 1 : index
    %c0_11 = arith.constant 0 : index
    %14 = vector.load %arg26[%c1, %c0_11] : memref<34x32xf32, #tpu.memory_space<vmem>>, vector<16x32xf32>
    tpu.vector_store %arg26[%c1, %c0_11], %13 {strides = array<i32>} : memref<34x32xf32, #tpu.memory_space<vmem>>, vector<16x32xf32>,
    %c17 = arith.constant 17 : index
    %c0_12 = arith.constant 0 : index
    %15 = vector.load %arg26[%c17, %c0_12] : memref<34x32xf32, #tpu.memory_space<vmem>>, vector<1x32xf32>
    tpu.vector_store %arg26[%c17, %c0_12], %9 {strides = array<i32>} : memref<34x32xf32, #tpu.memory_space<vmem>>, vector<1x32xf32>,
    %16 = vector.extract_strided_slice %5 {offsets = [16, 0], sizes = [16, 32], strides = [1, 1]} : vector<32x32xf32> to vector<16x32xf32>
    %17 = vector.extract_strided_slice %6 {offsets = [1, 0], sizes = [16, 32], strides = [1, 1]} : vector<17x32xf32> to vector<16x32xf32>
    %18 = arith.addf %16, %17 : vector<16x32xf32>
    %c18 = arith.constant 18 : index
    %c0_13 = arith.constant 0 : index
    %19 = vector.load %arg26[%c18, %c0_13] : memref<34x32xf32, #tpu.memory_space<vmem>>, vector<16x32xf32>
    tpu.vector_store %arg26[%c18, %c0_13], %18 {strides = array<i32>} : memref<34x32xf32, #tpu.memory_space<vmem>>, vector<16x32xf32>,
    %c0_14 = arith.constant 0 : index
    %c0_15 = arith.constant 0 : index
    %20 = vector.load %arg26[%c0_14, %c0_15] : memref<34x32xf32, #tpu.memory_space<vmem>>, vector<34x32xf32>
    %c0_16 = arith.constant 0 : index
    %c0_17 = arith.constant 0 : index
    %21 = vector.load %arg9[%c0_16, %c0_17] : memref<1x32xf32, #tpu.memory_space<vmem>>, vector<1x32xf32>
    %c0_18 = arith.constant 0 : index
    %c0_19 = arith.constant 0 : index
    %22 = vector.load %arg10[%c0_18, %c0_19] : memref<1x32xf32, #tpu.memory_space<vmem>>, vector<1x32xf32>
    %cst_20 = arith.constant dense<0.000000e+00> : vector<34xf32>
    %23 = vector.multi_reduction <add>, %20, %cst_20 [1] : vector<34x32xf32> to vector<34xf32>
    %24 = vector.shape_cast %23 : vector<34xf32> to vector<34x1xf32>
    %cst_21 = arith.constant 3.200000e+01 : f32
    %25 = vector.broadcast %cst_21 : f32 to vector<34x1xf32>
    %26 = arith.divf %24, %25 : vector<34x1xf32>
    %27 = vector.broadcast %26 : vector<34x1xf32> to vector<34x32xf32>
    %28 = arith.subf %20, %27 : vector<34x32xf32>
    %29 = arith.mulf %28, %28 : vector<34x32xf32>
    %cst_22 = arith.constant dense<0.000000e+00> : vector<34xf32>
    %30 = vector.multi_reduction <add>, %29, %cst_22 [1] : vector<34x32xf32> to vector<34xf32>
    %31 = vector.shape_cast %30 : vector<34xf32> to vector<34x1xf32>
    %cst_23 = arith.constant 3.200000e+01 : f32
    %32 = vector.broadcast %cst_23 : f32 to vector<34x1xf32>
    %33 = arith.divf %31, %32 : vector<34x1xf32>
    %34 = vector.broadcast %26 : vector<34x1xf32> to vector<34x32xf32>
    %35 = arith.subf %20, %34 : vector<34x32xf32>
    %cst_24 = arith.constant 9.99999996E-13 : f32
    %36 = vector.broadcast %cst_24 : f32 to vector<34x1xf32>
    %37 = arith.addf %33, %36 : vector<34x1xf32>
    %38 = math.rsqrt %37 : vector<34x1xf32>
    %39 = vector.broadcast %38 : vector<34x1xf32> to vector<34x32xf32>
    %40 = arith.mulf %35, %39 : vector<34x32xf32>
    %41 = vector.broadcast %21 : vector<1x32xf32> to vector<34x32xf32>
    %42 = arith.mulf %40, %41 : vector<34x32xf32>
    %43 = vector.broadcast %22 : vector<1x32xf32> to vector<34x32xf32>
    %44 = arith.addf %42, %43 : vector<34x32xf32>
    %c0_25 = arith.constant 0 : index
    %c0_26 = arith.constant 0 : index
    %45 = vector.load %arg5[%c0_25, %c0_26] : memref<32x96xf32, #tpu.memory_space<vmem>>, vector<32x96xf32>
    %cst_27 = arith.constant dense<0.000000e+00> : vector<34x96xf32>
    %46 = tpu.matmul %44, %45, %cst_27 {dimension_numbers = #tpu.dot_dimension_numbers<[1], [0], [0], [1], [0, 0, 1, 1], [], []>} : vector<34x32xf32>, vector<32x96xf32>, vector<34x96xf32> -> vector<34x96xf32>
    %c0_28 = arith.constant 0 : index
    %c0_29 = arith.constant 0 : index
    %47 = vector.load %arg6[%c0_28, %c0_29] : memref<1x96xf32, #tpu.memory_space<vmem>>, vector<1x96xf32>
    %48 = vector.broadcast %47 : vector<1x96xf32> to vector<34x96xf32>
    %49 = arith.addf %46, %48 : vector<34x96xf32>
    %50 = vector.extract_strided_slice %49 {offsets = [0, 0], sizes = [34, 32], strides = [1, 1]} : vector<34x96xf32> to vector<34x32xf32>
    %51 = vector.extract_strided_slice %49 {offsets = [0, 32], sizes = [34, 32], strides = [1, 1]} : vector<34x96xf32> to vector<34x32xf32>
    %52 = vector.extract_strided_slice %49 {offsets = [0, 64], sizes = [34, 32], strides = [1, 1]} : vector<34x96xf32> to vector<34x32xf32>
    %53 = vector.extract_strided_slice %50 {offsets = [0, 0], sizes = [17, 32], strides = [1, 1]} : vector<34x32xf32> to vector<17x32xf32>
    %54 = vector.extract_strided_slice %51 {offsets = [0, 0], sizes = [17, 32], strides = [1, 1]} : vector<34x32xf32> to vector<17x32xf32>
    %55 = vector.extract_strided_slice %52 {offsets = [0, 0], sizes = [17, 32], strides = [1, 1]} : vector<34x32xf32> to vector<17x32xf32>
    %56 = vector.extract_strided_slice %53 {offsets = [0, 0], sizes = [17, 8], strides = [1, 1]} : vector<17x32xf32> to vector<17x8xf32>
    %57 = vector.extract_strided_slice %54 {offsets = [0, 0], sizes = [17, 8], strides = [1, 1]} : vector<17x32xf32> to vector<17x8xf32>
    %58 = vector.extract_strided_slice %55 {offsets = [0, 0], sizes = [17, 8], strides = [1, 1]} : vector<17x32xf32> to vector<17x8xf32>
    %cst_30 = arith.constant dense<0.000000e+00> : vector<17x17xf32>
    %59 = tpu.matmul %56, %57, %cst_30 {dimension_numbers = #tpu.dot_dimension_numbers<[1], [1], [0], [0], [0, 0, 1, 0], [], []>} : vector<17x8xf32>, vector<17x8xf32>, vector<17x17xf32> -> vector<17x17xf32>
    %cst_31 = arith.constant 0.353553385 : f32
    %60 = vector.broadcast %cst_31 : f32 to vector<17x17xf32>
    %61 = arith.mulf %59, %60 : vector<17x17xf32>
    %cst_32 = arith.constant dense<0xFF800000> : vector<17xf32>
    %62 = vector.multi_reduction <maximumf>, %61, %cst_32 [1] : vector<17x17xf32> to vector<17xf32>
    %cst_33 = arith.constant 0xFF800000 : f32
    %63 = vector.broadcast %cst_33 : f32 to vector<17xf32>
    %64 = arith.maximumf %63, %62 : vector<17xf32>
    %65 = vector.shape_cast %64 : vector<17xf32> to vector<17x1xf32>
    %66 = vector.broadcast %65 : vector<17x1xf32> to vector<17x17xf32>
    %67 = arith.subf %61, %66 : vector<17x17xf32>
    %68 = math.exp %67 : vector<17x17xf32>
    %cst_34 = arith.constant dense<0.000000e+00> : vector<17xf32>
    %69 = vector.multi_reduction <add>, %68, %cst_34 [1] : vector<17x17xf32> to vector<17xf32>
    %70 = vector.shape_cast %69 : vector<17xf32> to vector<17x1xf32>
    %71 = vector.broadcast %70 : vector<17x1xf32> to vector<17x17xf32>
    %72 = arith.divf %68, %71 : vector<17x17xf32>
    %cst_35 = arith.constant dense<0.000000e+00> : vector<17x8xf32>
    %73 = tpu.matmul %72, %58, %cst_35 {dimension_numbers = #tpu.dot_dimension_numbers<[1], [0], [0], [1], [0, 0, 1, 1], [], []>} : vector<17x17xf32>, vector<17x8xf32>, vector<17x8xf32> -> vector<17x8xf32>
    %c0_36 = arith.constant 0 : index
    %c0_37 = arith.constant 0 : index
    %74 = vector.load %arg27[%c0_36, %c0_37] : memref<34x32xf32, #tpu.memory_space<vmem>>, vector<17x8xf32>
    tpu.vector_store %arg27[%c0_36, %c0_37], %73 {strides = array<i32>} : memref<34x32xf32, #tpu.memory_space<vmem>>, vector<17x8xf32>,
    %75 = vector.extract_strided_slice %53 {offsets = [0, 8], sizes = [17, 8], strides = [1, 1]} : vector<17x32xf32> to vector<17x8xf32>
    %76 = vector.extract_strided_slice %54 {offsets = [0, 8], sizes = [17, 8], strides = [1, 1]} : vector<17x32xf32> to vector<17x8xf32>
    %77 = vector.extract_strided_slice %55 {offsets = [0, 8], sizes = [17, 8], strides = [1, 1]} : vector<17x32xf32> to vector<17x8xf32>
    %cst_38 = arith.constant dense<0.000000e+00> : vector<17x17xf32>
    %78 = tpu.matmul %75, %76, %cst_38 {dimension_numbers = #tpu.dot_dimension_numbers<[1], [1], [0], [0], [0, 0, 1, 0], [], []>} : vector<17x8xf32>, vector<17x8xf32>, vector<17x17xf32> -> vector<17x17xf32>
    %cst_39 = arith.constant 0.353553385 : f32
    %79 = vector.broadcast %cst_39 : f32 to vector<17x17xf32>
    %80 = arith.mulf %78, %79 : vector<17x17xf32>
    %cst_40 = arith.constant dense<0xFF800000> : vector<17xf32>
    %81 = vector.multi_reduction <maximumf>, %80, %cst_40 [1] : vector<17x17xf32> to vector<17xf32>
    %cst_41 = arith.constant 0xFF800000 : f32
    %82 = vector.broadcast %cst_41 : f32 to vector<17xf32>
    %83 = arith.maximumf %82, %81 : vector<17xf32>
    %84 = vector.shape_cast %83 : vector<17xf32> to vector<17x1xf32>
    %85 = vector.broadcast %84 : vector<17x1xf32> to vector<17x17xf32>
    %86 = arith.subf %80, %85 : vector<17x17xf32>
    %87 = math.exp %86 : vector<17x17xf32>
    %cst_42 = arith.constant dense<0.000000e+00> : vector<17xf32>
    %88 = vector.multi_reduction <add>, %87, %cst_42 [1] : vector<17x17xf32> to vector<17xf32>
    %89 = vector.shape_cast %88 : vector<17xf32> to vector<17x1xf32>
    %90 = vector.broadcast %89 : vector<17x1xf32> to vector<17x17xf32>
    %91 = arith.divf %87, %90 : vector<17x17xf32>
    %cst_43 = arith.constant dense<0.000000e+00> : vector<17x8xf32>
    %92 = tpu.matmul %91, %77, %cst_43 {dimension_numbers = #tpu.dot_dimension_numbers<[1], [0], [0], [1], [0, 0, 1, 1], [], []>} : vector<17x17xf32>, vector<17x8xf32>, vector<17x8xf32> -> vector<17x8xf32>
    %c0_44 = arith.constant 0 : index
    %c8 = arith.constant 8 : index
    %93 = vector.load %arg27[%c0_44, %c8] : memref<34x32xf32, #tpu.memory_space<vmem>>, vector<17x8xf32>
    tpu.vector_store %arg27[%c0_44, %c8], %92 {strides = array<i32>} : memref<34x32xf32, #tpu.memory_space<vmem>>, vector<17x8xf32>,
    %94 = vector.extract_strided_slice %53 {offsets = [0, 16], sizes = [17, 8], strides = [1, 1]} : vector<17x32xf32> to vector<17x8xf32>
    %95 = vector.extract_strided_slice %54 {offsets = [0, 16], sizes = [17, 8], strides = [1, 1]} : vector<17x32xf32> to vector<17x8xf32>
    %96 = vector.extract_strided_slice %55 {offsets = [0, 16], sizes = [17, 8], strides = [1, 1]} : vector<17x32xf32> to vector<17x8xf32>
    %cst_45 = arith.constant dense<0.000000e+00> : vector<17x17xf32>
    %97 = tpu.matmul %94, %95, %cst_45 {dimension_numbers = #tpu.dot_dimension_numbers<[1], [1], [0], [0], [0, 0, 1, 0], [], []>} : vector<17x8xf32>, vector<17x8xf32>, vector<17x17xf32> -> vector<17x17xf32>
    %cst_46 = arith.constant 0.353553385 : f32
    %98 = vector.broadcast %cst_46 : f32 to vector<17x17xf32>
    %99 = arith.mulf %97, %98 : vector<17x17xf32>
    %cst_47 = arith.constant dense<0xFF800000> : vector<17xf32>
    %100 = vector.multi_reduction <maximumf>, %99, %cst_47 [1] : vector<17x17xf32> to vector<17xf32>
    %cst_48 = arith.constant 0xFF800000 : f32
    %101 = vector.broadcast %cst_48 : f32 to vector<17xf32>
    %102 = arith.maximumf %101, %100 : vector<17xf32>
    %103 = vector.shape_cast %102 : vector<17xf32> to vector<17x1xf32>
    %104 = vector.broadcast %103 : vector<17x1xf32> to vector<17x17xf32>
    %105 = arith.subf %99, %104 : vector<17x17xf32>
    %106 = math.exp %105 : vector<17x17xf32>
    %cst_49 = arith.constant dense<0.000000e+00> : vector<17xf32>
    %107 = vector.multi_reduction <add>, %106, %cst_49 [1] : vector<17x17xf32> to vector<17xf32>
    %108 = vector.shape_cast %107 : vector<17xf32> to vector<17x1xf32>
    %109 = vector.broadcast %108 : vector<17x1xf32> to vector<17x17xf32>
    %110 = arith.divf %106, %109 : vector<17x17xf32>
    %cst_50 = arith.constant dense<0.000000e+00> : vector<17x8xf32>
    %111 = tpu.matmul %110, %96, %cst_50 {dimension_numbers = #tpu.dot_dimension_numbers<[1], [0], [0], [1], [0, 0, 1, 1], [], []>} : vector<17x17xf32>, vector<17x8xf32>, vector<17x8xf32> -> vector<17x8xf32>
    %c0_51 = arith.constant 0 : index
    %c16 = arith.constant 16 : index
    %112 = vector.load %arg27[%c0_51, %c16] : memref<34x32xf32, #tpu.memory_space<vmem>>, vector<17x8xf32>
    tpu.vector_store %arg27[%c0_51, %c16], %111 {strides = array<i32>} : memref<34x32xf32, #tpu.memory_space<vmem>>, vector<17x8xf32>,
    %113 = vector.extract_strided_slice %53 {offsets = [0, 24], sizes = [17, 8], strides = [1, 1]} : vector<17x32xf32> to vector<17x8xf32>
    %114 = vector.extract_strided_slice %54 {offsets = [0, 24], sizes = [17, 8], strides = [1, 1]} : vector<17x32xf32> to vector<17x8xf32>
    %115 = vector.extract_strided_slice %55 {offsets = [0, 24], sizes = [17, 8], strides = [1, 1]} : vector<17x32xf32> to vector<17x8xf32>
    %cst_52 = arith.constant dense<0.000000e+00> : vector<17x17xf32>
    %116 = tpu.matmul %113, %114, %cst_52 {dimension_numbers = #tpu.dot_dimension_numbers<[1], [1], [0], [0], [0, 0, 1, 0], [], []>} : vector<17x8xf32>, vector<17x8xf32>, vector<17x17xf32> -> vector<17x17xf32>
    %cst_53 = arith.constant 0.353553385 : f32
    %117 = vector.broadcast %cst_53 : f32 to vector<17x17xf32>
    %118 = arith.mulf %116, %117 : vector<17x17xf32>
    %cst_54 = arith.constant dense<0xFF800000> : vector<17xf32>
    %119 = vector.multi_reduction <maximumf>, %118, %cst_54 [1] : vector<17x17xf32> to vector<17xf32>
    %cst_55 = arith.constant 0xFF800000 : f32
    %120 = vector.broadcast %cst_55 : f32 to vector<17xf32>
    %121 = arith.maximumf %120, %119 : vector<17xf32>
    %122 = vector.shape_cast %121 : vector<17xf32> to vector<17x1xf32>
    %123 = vector.broadcast %122 : vector<17x1xf32> to vector<17x17xf32>
    %124 = arith.subf %118, %123 : vector<17x17xf32>
    %125 = math.exp %124 : vector<17x17xf32>
    %cst_56 = arith.constant dense<0.000000e+00> : vector<17xf32>
    %126 = vector.multi_reduction <add>, %125, %cst_56 [1] : vector<17x17xf32> to vector<17xf32>
    %127 = vector.shape_cast %126 : vector<17xf32> to vector<17x1xf32>
    %128 = vector.broadcast %127 : vector<17x1xf32> to vector<17x17xf32>
    %129 = arith.divf %125, %128 : vector<17x17xf32>
    %cst_57 = arith.constant dense<0.000000e+00> : vector<17x8xf32>
    %130 = tpu.matmul %129, %115, %cst_57 {dimension_numbers = #tpu.dot_dimension_numbers<[1], [0], [0], [1], [0, 0, 1, 1], [], []>} : vector<17x17xf32>, vector<17x8xf32>, vector<17x8xf32> -> vector<17x8xf32>
    %c0_58 = arith.constant 0 : index
    %c24 = arith.constant 24 : index
    %131 = vector.load %arg27[%c0_58, %c24] : memref<34x32xf32, #tpu.memory_space<vmem>>, vector<17x8xf32>
    tpu.vector_store %arg27[%c0_58, %c24], %130 {strides = array<i32>} : memref<34x32xf32, #tpu.memory_space<vmem>>, vector<17x8xf32>,
    %132 = vector.extract_strided_slice %50 {offsets = [17, 0], sizes = [17, 32], strides = [1, 1]} : vector<34x32xf32> to vector<17x32xf32>
    %133 = vector.extract_strided_slice %51 {offsets = [17, 0], sizes = [17, 32], strides = [1, 1]} : vector<34x32xf32> to vector<17x32xf32>
    %134 = vector.extract_strided_slice %52 {offsets = [17, 0], sizes = [17, 32], strides = [1, 1]} : vector<34x32xf32> to vector<17x32xf32>
    %135 = vector.extract_strided_slice %132 {offsets = [0, 0], sizes = [17, 8], strides = [1, 1]} : vector<17x32xf32> to vector<17x8xf32>
    %136 = vector.extract_strided_slice %133 {offsets = [0, 0], sizes = [17, 8], strides = [1, 1]} : vector<17x32xf32> to vector<17x8xf32>
    %137 = vector.extract_strided_slice %134 {offsets = [0, 0], sizes = [17, 8], strides = [1, 1]} : vector<17x32xf32> to vector<17x8xf32>
    %cst_59 = arith.constant dense<0.000000e+00> : vector<17x17xf32>
    %138 = tpu.matmul %135, %136, %cst_59 {dimension_numbers = #tpu.dot_dimension_numbers<[1], [1], [0], [0], [0, 0, 1, 0], [], []>} : vector<17x8xf32>, vector<17x8xf32>, vector<17x17xf32> -> vector<17x17xf32>
    %cst_60 = arith.constant 0.353553385 : f32
    %139 = vector.broadcast %cst_60 : f32 to vector<17x17xf32>
    %140 = arith.mulf %138, %139 : vector<17x17xf32>
    %cst_61 = arith.constant dense<0xFF800000> : vector<17xf32>
    %141 = vector.multi_reduction <maximumf>, %140, %cst_61 [1] : vector<17x17xf32> to vector<17xf32>
    %cst_62 = arith.constant 0xFF800000 : f32
    %142 = vector.broadcast %cst_62 : f32 to vector<17xf32>
    %143 = arith.maximumf %142, %141 : vector<17xf32>
    %144 = vector.shape_cast %143 : vector<17xf32> to vector<17x1xf32>
    %145 = vector.broadcast %144 : vector<17x1xf32> to vector<17x17xf32>
    %146 = arith.subf %140, %145 : vector<17x17xf32>
    %147 = math.exp %146 : vector<17x17xf32>
    %cst_63 = arith.constant dense<0.000000e+00> : vector<17xf32>
    %148 = vector.multi_reduction <add>, %147, %cst_63 [1] : vector<17x17xf32> to vector<17xf32>
    %149 = vector.shape_cast %148 : vector<17xf32> to vector<17x1xf32>
    %150 = vector.broadcast %149 : vector<17x1xf32> to vector<17x17xf32>
    %151 = arith.divf %147, %150 : vector<17x17xf32>
    %cst_64 = arith.constant dense<0.000000e+00> : vector<17x8xf32>
    %152 = tpu.matmul %151, %137, %cst_64 {dimension_numbers = #tpu.dot_dimension_numbers<[1], [0], [0], [1], [0, 0, 1, 1], [], []>} : vector<17x17xf32>, vector<17x8xf32>, vector<17x8xf32> -> vector<17x8xf32>
    %c17_65 = arith.constant 17 : index
    %c0_66 = arith.constant 0 : index
    %153 = vector.load %arg27[%c17_65, %c0_66] : memref<34x32xf32, #tpu.memory_space<vmem>>, vector<17x8xf32>
    tpu.vector_store %arg27[%c17_65, %c0_66], %152 {strides = array<i32>} : memref<34x32xf32, #tpu.memory_space<vmem>>, vector<17x8xf32>,
    %154 = vector.extract_strided_slice %132 {offsets = [0, 8], sizes = [17, 8], strides = [1, 1]} : vector<17x32xf32> to vector<17x8xf32>
    %155 = vector.extract_strided_slice %133 {offsets = [0, 8], sizes = [17, 8], strides = [1, 1]} : vector<17x32xf32> to vector<17x8xf32>
    %156 = vector.extract_strided_slice %134 {offsets = [0, 8], sizes = [17, 8], strides = [1, 1]} : vector<17x32xf32> to vector<17x8xf32>
    %cst_67 = arith.constant dense<0.000000e+00> : vector<17x17xf32>
    %157 = tpu.matmul %154, %155, %cst_67 {dimension_numbers = #tpu.dot_dimension_numbers<[1], [1], [0], [0], [0, 0, 1, 0], [], []>} : vector<17x8xf32>, vector<17x8xf32>, vector<17x17xf32> -> vector<17x17xf32>
    %cst_68 = arith.constant 0.353553385 : f32
    %158 = vector.broadcast %cst_68 : f32 to vector<17x17xf32>
    %159 = arith.mulf %157, %158 : vector<17x17xf32>
    %cst_69 = arith.constant dense<0xFF800000> : vector<17xf32>
    %160 = vector.multi_reduction <maximumf>, %159, %cst_69 [1] : vector<17x17xf32> to vector<17xf32>
    %cst_70 = arith.constant 0xFF800000 : f32
    %161 = vector.broadcast %cst_70 : f32 to vector<17xf32>
    %162 = arith.maximumf %161, %160 : vector<17xf32>
    %163 = vector.shape_cast %162 : vector<17xf32> to vector<17x1xf32>
    %164 = vector.broadcast %163 : vector<17x1xf32> to vector<17x17xf32>
    %165 = arith.subf %159, %164 : vector<17x17xf32>
    %166 = math.exp %165 : vector<17x17xf32>
    %cst_71 = arith.constant dense<0.000000e+00> : vector<17xf32>
    %167 = vector.multi_reduction <add>, %166, %cst_71 [1] : vector<17x17xf32> to vector<17xf32>
    %168 = vector.shape_cast %167 : vector<17xf32> to vector<17x1xf32>
    %169 = vector.broadcast %168 : vector<17x1xf32> to vector<17x17xf32>
    %170 = arith.divf %166, %169 : vector<17x17xf32>
    %cst_72 = arith.constant dense<0.000000e+00> : vector<17x8xf32>
    %171 = tpu.matmul %170, %156, %cst_72 {dimension_numbers = #tpu.dot_dimension_numbers<[1], [0], [0], [1], [0, 0, 1, 1], [], []>} : vector<17x17xf32>, vector<17x8xf32>, vector<17x8xf32> -> vector<17x8xf32>
    %c17_73 = arith.constant 17 : index
    %c8_74 = arith.constant 8 : index
    %172 = vector.load %arg27[%c17_73, %c8_74] : memref<34x32xf32, #tpu.memory_space<vmem>>, vector<17x8xf32>
    tpu.vector_store %arg27[%c17_73, %c8_74], %171 {strides = array<i32>} : memref<34x32xf32, #tpu.memory_space<vmem>>, vector<17x8xf32>,
    %173 = vector.extract_strided_slice %132 {offsets = [0, 16], sizes = [17, 8], strides = [1, 1]} : vector<17x32xf32> to vector<17x8xf32>
    %174 = vector.extract_strided_slice %133 {offsets = [0, 16], sizes = [17, 8], strides = [1, 1]} : vector<17x32xf32> to vector<17x8xf32>
    %175 = vector.extract_strided_slice %134 {offsets = [0, 16], sizes = [17, 8], strides = [1, 1]} : vector<17x32xf32> to vector<17x8xf32>
    %cst_75 = arith.constant dense<0.000000e+00> : vector<17x17xf32>
    %176 = tpu.matmul %173, %174, %cst_75 {dimension_numbers = #tpu.dot_dimension_numbers<[1], [1], [0], [0], [0, 0, 1, 0], [], []>} : vector<17x8xf32>, vector<17x8xf32>, vector<17x17xf32> -> vector<17x17xf32>
    %cst_76 = arith.constant 0.353553385 : f32
    %177 = vector.broadcast %cst_76 : f32 to vector<17x17xf32>
    %178 = arith.mulf %176, %177 : vector<17x17xf32>
    %cst_77 = arith.constant dense<0xFF800000> : vector<17xf32>
    %179 = vector.multi_reduction <maximumf>, %178, %cst_77 [1] : vector<17x17xf32> to vector<17xf32>
    %cst_78 = arith.constant 0xFF800000 : f32
    %180 = vector.broadcast %cst_78 : f32 to vector<17xf32>
    %181 = arith.maximumf %180, %179 : vector<17xf32>
    %182 = vector.shape_cast %181 : vector<17xf32> to vector<17x1xf32>
    %183 = vector.broadcast %182 : vector<17x1xf32> to vector<17x17xf32>
    %184 = arith.subf %178, %183 : vector<17x17xf32>
    %185 = math.exp %184 : vector<17x17xf32>
    %cst_79 = arith.constant dense<0.000000e+00> : vector<17xf32>
    %186 = vector.multi_reduction <add>, %185, %cst_79 [1] : vector<17x17xf32> to vector<17xf32>
    %187 = vector.shape_cast %186 : vector<17xf32> to vector<17x1xf32>
    %188 = vector.broadcast %187 : vector<17x1xf32> to vector<17x17xf32>
    %189 = arith.divf %185, %188 : vector<17x17xf32>
    %cst_80 = arith.constant dense<0.000000e+00> : vector<17x8xf32>
    %190 = tpu.matmul %189, %175, %cst_80 {dimension_numbers = #tpu.dot_dimension_numbers<[1], [0], [0], [1], [0, 0, 1, 1], [], []>} : vector<17x17xf32>, vector<17x8xf32>, vector<17x8xf32> -> vector<17x8xf32>
    %c17_81 = arith.constant 17 : index
    %c16_82 = arith.constant 16 : index
    %191 = vector.load %arg27[%c17_81, %c16_82] : memref<34x32xf32, #tpu.memory_space<vmem>>, vector<17x8xf32>
    tpu.vector_store %arg27[%c17_81, %c16_82], %190 {strides = array<i32>} : memref<34x32xf32, #tpu.memory_space<vmem>>, vector<17x8xf32>,
    %192 = vector.extract_strided_slice %132 {offsets = [0, 24], sizes = [17, 8], strides = [1, 1]} : vector<17x32xf32> to vector<17x8xf32>
    %193 = vector.extract_strided_slice %133 {offsets = [0, 24], sizes = [17, 8], strides = [1, 1]} : vector<17x32xf32> to vector<17x8xf32>
    %194 = vector.extract_strided_slice %134 {offsets = [0, 24], sizes = [17, 8], strides = [1, 1]} : vector<17x32xf32> to vector<17x8xf32>
    %cst_83 = arith.constant dense<0.000000e+00> : vector<17x17xf32>
    %195 = tpu.matmul %192, %193, %cst_83 {dimension_numbers = #tpu.dot_dimension_numbers<[1], [1], [0], [0], [0, 0, 1, 0], [], []>} : vector<17x8xf32>, vector<17x8xf32>, vector<17x17xf32> -> vector<17x17xf32>
    %cst_84 = arith.constant 0.353553385 : f32
    %196 = vector.broadcast %cst_84 : f32 to vector<17x17xf32>
    %197 = arith.mulf %195, %196 : vector<17x17xf32>
    %cst_85 = arith.constant dense<0xFF800000> : vector<17xf32>
    %198 = vector.multi_reduction <maximumf>, %197, %cst_85 [1] : vector<17x17xf32> to vector<17xf32>
    %cst_86 = arith.constant 0xFF800000 : f32
    %199 = vector.broadcast %cst_86 : f32 to vector<17xf32>
    %200 = arith.maximumf %199, %198 : vector<17xf32>
    %201 = vector.shape_cast %200 : vector<17xf32> to vector<17x1xf32>
    %202 = vector.broadcast %201 : vector<17x1xf32> to vector<17x17xf32>
    %203 = arith.subf %197, %202 : vector<17x17xf32>
    %204 = math.exp %203 : vector<17x17xf32>
    %cst_87 = arith.constant dense<0.000000e+00> : vector<17xf32>
    %205 = vector.multi_reduction <add>, %204, %cst_87 [1] : vector<17x17xf32> to vector<17xf32>
    %206 = vector.shape_cast %205 : vector<17xf32> to vector<17x1xf32>
    %207 = vector.broadcast %206 : vector<17x1xf32> to vector<17x17xf32>
    %208 = arith.divf %204, %207 : vector<17x17xf32>
    %cst_88 = arith.constant dense<0.000000e+00> : vector<17x8xf32>
    %209 = tpu.matmul %208, %194, %cst_88 {dimension_numbers = #tpu.dot_dimension_numbers<[1], [0], [0], [1], [0, 0, 1, 1], [], []>} : vector<17x17xf32>, vector<17x8xf32>, vector<17x8xf32> -> vector<17x8xf32>
    %c17_89 = arith.constant 17 : index
    %c24_90 = arith.constant 24 : index
    %210 = vector.load %arg27[%c17_89, %c24_90] : memref<34x32xf32, #tpu.memory_space<vmem>>, vector<17x8xf32>
    tpu.vector_store %arg27[%c17_89, %c24_90], %209 {strides = array<i32>} : memref<34x32xf32, #tpu.memory_space<vmem>>, vector<17x8xf32>,
    %c0_91 = arith.constant 0 : index
    %c0_92 = arith.constant 0 : index
    %211 = vector.load %arg27[%c0_91, %c0_92] : memref<34x32xf32, #tpu.memory_space<vmem>>, vector<34x32xf32>
    %c0_93 = arith.constant 0 : index
    %c0_94 = arith.constant 0 : index
    %212 = vector.load %arg7[%c0_93, %c0_94] : memref<32x32xf32, #tpu.memory_space<vmem>>, vector<32x32xf32>
    %cst_95 = arith.constant dense<0.000000e+00> : vector<34x32xf32>
    %213 = tpu.matmul %211, %212, %cst_95 {dimension_numbers = #tpu.dot_dimension_numbers<[1], [0], [0], [1], [0, 0, 1, 1], [], []>} : vector<34x32xf32>, vector<32x32xf32>, vector<34x32xf32> -> vector<34x32xf32>
    %c0_96 = arith.constant 0 : index
    %c0_97 = arith.constant 0 : index
    %214 = vector.load %arg8[%c0_96, %c0_97] : memref<1x32xf32, #tpu.memory_space<vmem>>, vector<1x32xf32>
    %215 = vector.broadcast %214 : vector<1x32xf32> to vector<34x32xf32>
    %216 = arith.addf %213, %215 : vector<34x32xf32>
    %217 = arith.addf %216, %20 : vector<34x32xf32>
    %c0_98 = arith.constant 0 : index
    %c0_99 = arith.constant 0 : index
    %218 = vector.load %arg11[%c0_98, %c0_99] : memref<1x32xf32, #tpu.memory_space<vmem>>, vector<1x32xf32>
    %c0_100 = arith.constant 0 : index
    %c0_101 = arith.constant 0 : index
    %219 = vector.load %arg12[%c0_100, %c0_101] : memref<1x32xf32, #tpu.memory_space<vmem>>, vector<1x32xf32>
    %cst_102 = arith.constant dense<0.000000e+00> : vector<34xf32>
    %220 = vector.multi_reduction <add>, %217, %cst_102 [1] : vector<34x32xf32> to vector<34xf32>
    %221 = vector.shape_cast %220 : vector<34xf32> to vector<34x1xf32>
    %cst_103 = arith.constant 3.200000e+01 : f32
    %222 = vector.broadcast %cst_103 : f32 to vector<34x1xf32>
    %223 = arith.divf %221, %222 : vector<34x1xf32>
    %224 = vector.broadcast %223 : vector<34x1xf32> to vector<34x32xf32>
    %225 = arith.subf %217, %224 : vector<34x32xf32>
    %226 = arith.mulf %225, %225 : vector<34x32xf32>
    %cst_104 = arith.constant dense<0.000000e+00> : vector<34xf32>
    %227 = vector.multi_reduction <add>, %226, %cst_104 [1] : vector<34x32xf32> to vector<34xf32>
    %228 = vector.shape_cast %227 : vector<34xf32> to vector<34x1xf32>
    %cst_105 = arith.constant 3.200000e+01 : f32
    %229 = vector.broadcast %cst_105 : f32 to vector<34x1xf32>
    %230 = arith.divf %228, %229 : vector<34x1xf32>
    %231 = vector.broadcast %223 : vector<34x1xf32> to vector<34x32xf32>
    %232 = arith.subf %217, %231 : vector<34x32xf32>
    %cst_106 = arith.constant 9.99999996E-13 : f32
    %233 = vector.broadcast %cst_106 : f32 to vector<34x1xf32>
    %234 = arith.addf %230, %233 : vector<34x1xf32>
    %235 = math.rsqrt %234 : vector<34x1xf32>
    %236 = vector.broadcast %235 : vector<34x1xf32> to vector<34x32xf32>
    %237 = arith.mulf %232, %236 : vector<34x32xf32>
    %238 = vector.broadcast %218 : vector<1x32xf32> to vector<34x32xf32>
    %239 = arith.mulf %237, %238 : vector<34x32xf32>
    %240 = vector.broadcast %219 : vector<1x32xf32> to vector<34x32xf32>
    %241 = arith.addf %239, %240 : vector<34x32xf32>
    %c0_107 = arith.constant 0 : index
    %c0_108 = arith.constant 0 : index
    %242 = vector.load %arg13[%c0_107, %c0_108] : memref<32x64xf32, #tpu.memory_space<vmem>>, vector<32x64xf32>
    %cst_109 = arith.constant dense<0.000000e+00> : vector<34x64xf32>
    %243 = tpu.matmul %241, %242, %cst_109 {dimension_numbers = #tpu.dot_dimension_numbers<[1], [0], [0], [1], [0, 0, 1, 1], [], []>} : vector<34x32xf32>, vector<32x64xf32>, vector<34x64xf32> -> vector<34x64xf32>
    %c0_110 = arith.constant 0 : index
    %c0_111 = arith.constant 0 : index
    %244 = vector.load %arg14[%c0_110, %c0_111] : memref<1x64xf32, #tpu.memory_space<vmem>>, vector<1x64xf32>
    %245 = vector.broadcast %244 : vector<1x64xf32> to vector<34x64xf32>
    %246 = arith.addf %243, %245 : vector<34x64xf32>
    %cst_112 = arith.constant 5.000000e-01 : f32
    %247 = vector.broadcast %cst_112 : f32 to vector<34x64xf32>
    %248 = arith.mulf %247, %246 : vector<34x64xf32>
    %cst_113 = arith.constant 4.471500e-02 : f32
    %249 = vector.broadcast %cst_113 : f32 to vector<34x64xf32>
    %250 = arith.mulf %249, %246 : vector<34x64xf32>
    %251 = arith.mulf %250, %246 : vector<34x64xf32>
    %252 = arith.mulf %251, %246 : vector<34x64xf32>
    %253 = arith.addf %246, %252 : vector<34x64xf32>
    %cst_114 = arith.constant 0.797884583 : f32
    %254 = vector.broadcast %cst_114 : f32 to vector<34x64xf32>
    %255 = arith.mulf %254, %253 : vector<34x64xf32>
    %256 = math.tanh %255 : vector<34x64xf32>
    %cst_115 = arith.constant 1.000000e+00 : f32
    %257 = vector.broadcast %cst_115 : f32 to vector<34x64xf32>
    %258 = arith.addf %257, %256 : vector<34x64xf32>
    %259 = arith.mulf %248, %258 : vector<34x64xf32>
    %c0_116 = arith.constant 0 : index
    %c0_117 = arith.constant 0 : index
    %260 = vector.load %arg15[%c0_116, %c0_117] : memref<64x32xf32, #tpu.memory_space<vmem>>, vector<64x32xf32>
    %cst_118 = arith.constant dense<0.000000e+00> : vector<34x32xf32>
    %261 = tpu.matmul %259, %260, %cst_118 {dimension_numbers = #tpu.dot_dimension_numbers<[1], [0], [0], [1], [0, 0, 1, 1], [], []>} : vector<34x64xf32>, vector<64x32xf32>, vector<34x32xf32> -> vector<34x32xf32>
    %c0_119 = arith.constant 0 : index
    %c0_120 = arith.constant 0 : index
    %262 = vector.load %arg16[%c0_119, %c0_120] : memref<1x32xf32, #tpu.memory_space<vmem>>, vector<1x32xf32>
    %263 = vector.broadcast %262 : vector<1x32xf32> to vector<34x32xf32>
    %264 = arith.addf %261, %263 : vector<34x32xf32>
    %265 = arith.addf %264, %217 : vector<34x32xf32>
    %c0_121 = arith.constant 0 : index
    %c0_122 = arith.constant 0 : index
    %266 = vector.load %arg17[%c0_121, %c0_122] : memref<1x32xf32, #tpu.memory_space<vmem>>, vector<1x32xf32>
    %c0_123 = arith.constant 0 : index
    %c0_124 = arith.constant 0 : index
    %267 = vector.load %arg18[%c0_123, %c0_124] : memref<1x32xf32, #tpu.memory_space<vmem>>, vector<1x32xf32>
    %cst_125 = arith.constant dense<0.000000e+00> : vector<34xf32>
    %268 = vector.multi_reduction <add>, %265, %cst_125 [1] : vector<34x32xf32> to vector<34xf32>
    %269 = vector.shape_cast %268 : vector<34xf32> to vector<34x1xf32>
    %cst_126 = arith.constant 3.200000e+01 : f32
    %270 = vector.broadcast %cst_126 : f32 to vector<34x1xf32>
    %271 = arith.divf %269, %270 : vector<34x1xf32>
    %272 = vector.broadcast %271 : vector<34x1xf32> to vector<34x32xf32>
    %273 = arith.subf %265, %272 : vector<34x32xf32>
    %274 = arith.mulf %273, %273 : vector<34x32xf32>
    %cst_127 = arith.constant dense<0.000000e+00> : vector<34xf32>
    %275 = vector.multi_reduction <add>, %274, %cst_127 [1] : vector<34x32xf32> to vector<34xf32>
    %276 = vector.shape_cast %275 : vector<34xf32> to vector<34x1xf32>
    %cst_128 = arith.constant 3.200000e+01 : f32
    %277 = vector.broadcast %cst_128 : f32 to vector<34x1xf32>
    %278 = arith.divf %276, %277 : vector<34x1xf32>
    %279 = vector.broadcast %271 : vector<34x1xf32> to vector<34x32xf32>
    %280 = arith.subf %265, %279 : vector<34x32xf32>
    %cst_129 = arith.constant 9.99999996E-13 : f32
    %281 = vector.broadcast %cst_129 : f32 to vector<34x1xf32>
    %282 = arith.addf %278, %281 : vector<34x1xf32>
    %283 = math.rsqrt %282 : vector<34x1xf32>
    %284 = vector.broadcast %283 : vector<34x1xf32> to vector<34x32xf32>
    %285 = arith.mulf %280, %284 : vector<34x32xf32>
    %286 = vector.broadcast %266 : vector<1x32xf32> to vector<34x32xf32>
    %287 = arith.mulf %285, %286 : vector<34x32xf32>
    %288 = vector.broadcast %267 : vector<1x32xf32> to vector<34x32xf32>
    %289 = arith.addf %287, %288 : vector<34x32xf32>
    %c0_130 = arith.constant 0 : index
    %c0_131 = arith.constant 0 : index
    %290 = vector.load %arg23[%c0_130, %c0_131] : memref<34x32xf32, #tpu.memory_space<vmem>>, vector<34x32xf32>
    tpu.vector_store %arg23[%c0_130, %c0_131], %289 {strides = array<i32>} : memref<34x32xf32, #tpu.memory_space<vmem>>, vector<34x32xf32>,
    %291 = vector.extract_strided_slice %289 {offsets = [0, 0], sizes = [1, 32], strides = [1, 1]} : vector<34x32xf32> to vector<1x32xf32>
    %292 = vector.extract_strided_slice %289 {offsets = [17, 0], sizes = [1, 32], strides = [1, 1]} : vector<34x32xf32> to vector<1x32xf32>
    %293 = tpu.concatenate %291, %292 in 0 : vector<1x32xf32>, vector<1x32xf32> -> vector<2x32xf32>
    %c0_132 = arith.constant 0 : index
    %c0_133 = arith.constant 0 : index
    %294 = vector.load %arg19[%c0_132, %c0_133] : memref<32x32xf32, #tpu.memory_space<vmem>>, vector<32x32xf32>
    %cst_134 = arith.constant dense<0.000000e+00> : vector<2x32xf32>
    %295 = tpu.matmul %293, %294, %cst_134 {dimension_numbers = #tpu.dot_dimension_numbers<[1], [0], [0], [1], [0, 0, 1, 1], [], []>} : vector<2x32xf32>, vector<32x32xf32>, vector<2x32xf32> -> vector<2x32xf32>
    %c0_135 = arith.constant 0 : index
    %c0_136 = arith.constant 0 : index
    %296 = vector.load %arg20[%c0_135, %c0_136] : memref<1x32xf32, #tpu.memory_space<vmem>>, vector<1x32xf32>
    %297 = vector.broadcast %296 : vector<1x32xf32> to vector<2x32xf32>
    %298 = arith.addf %295, %297 : vector<2x32xf32>
    %299 = math.tanh %298 : vector<2x32xf32>
    %c0_137 = arith.constant 0 : index
    %c0_138 = arith.constant 0 : index
    %300 = vector.load %arg24[%c0_137, %c0_138] : memref<2x32xf32, #tpu.memory_space<vmem>>, vector<2x32xf32>
    tpu.vector_store %arg24[%c0_137, %c0_138], %299 {strides = array<i32>} : memref<2x32xf32, #tpu.memory_space<vmem>>, vector<2x32xf32>,
    %c0_139 = arith.constant 0 : index
    %c0_140 = arith.constant 0 : index
    %301 = vector.load %arg21[%c0_139, %c0_140] : memref<32x10xf32, #tpu.memory_space<vmem>>, vector<32x10xf32>
    %cst_141 = arith.constant dense<0.000000e+00> : vector<2x10xf32>
    %302 = tpu.matmul %299, %301, %cst_141 {dimension_numbers = #tpu.dot_dimension_numbers<[1], [0], [0], [1], [0, 0, 1, 1], [], []>} : vector<2x32xf32>, vector<32x10xf32>, vector<2x10xf32> -> vector<2x10xf32>
    %c0_142 = arith.constant 0 : index
    %c0_143 = arith.constant 0 : index
    %303 = vector.load %arg22[%c0_142, %c0_143] : memref<1x10xf32, #tpu.memory_space<vmem>>, vector<1x10xf32>
    %304 = vector.broadcast %303 : vector<1x10xf32> to vector<2x10xf32>
    %305 = arith.addf %302, %304 : vector<2x10xf32>
    %cst_144 = arith.constant dense<0xFF800000> : vector<2xf32>
    %306 = vector.multi_reduction <maximumf>, %305, %cst_144 [1] : vector<2x10xf32> to vector<2xf32>
    %cst_145 = arith.constant 0xFF800000 : f32
    %307 = vector.broadcast %cst_145 : f32 to vector<2xf32>
    %308 = arith.maximumf %307, %306 : vector<2xf32>
    %309 = vector.shape_cast %308 : vector<2xf32> to vector<2x1xf32>
    %310 = vector.broadcast %309 : vector<2x1xf32> to vector<2x10xf32>
    %311 = arith.subf %305, %310 : vector<2x10xf32>
    %312 = math.exp %311 : vector<2x10xf32>
    %cst_146 = arith.constant dense<0.000000e+00> : vector<2xf32>
    %313 = vector.multi_reduction <add>, %312, %cst_146 [1] : vector<2x10xf32> to vector<2xf32>
    %314 = vector.shape_cast %313 : vector<2xf32> to vector<2x1xf32>
    %315 = vector.broadcast %314 : vector<2x1xf32> to vector<2x10xf32>
    %316 = arith.divf %312, %315 : vector<2x10xf32>
    %c0_147 = arith.constant 0 : index
    %c0_148 = arith.constant 0 : index
    %317 = vector.load %arg25[%c0_147, %c0_148] : memref<2x10xf32, #tpu.memory_space<vmem>>, vector<2x10xf32>
    tpu.vector_store %arg25[%c0_147, %c0_148], %316 {strides = array<i32>} : memref<2x10xf32, #tpu.memory_space<vmem>>, vector<2x10xf32>,
    return
  }
}

</mosaic_0001>

<bundles_post_ra>
// kernel: vit_forward_pallas.1
= control target key start
LH: loop header
LB: loop body
LE: loop exit
PB: predicated region body
PF: predicated region fallthrough
CT: control target
= control target key end

     0   :  { %s5588_s0 = inlined_call_operand.vmem [shape: f32[32,64], index: 0, kind: input, shape index: {}]   ;;  %s5589_s1 = inlined_call_operand.vmem [shape: f32[64,32], index: 1, kind: input, shape index: {}]   ;;  %s5590_s2 = inlined_call_operand.vmem [shape: f32[1,32], index: 2, kind: input, shape index: {}]   ;;  %s5591_s3 = inlined_call_operand.vmem [shape: f32[1,32], index: 3, kind: input, shape index: {}]   ;;  %s5592_s4 = inlined_call_operand.vmem [shape: f32[17,32], index: 4, kind: input, shape index: {}]   ;;  %s5593_s5 = inlined_call_operand.vmem [shape: f32[32,96], index: 5, kind: input, shape index: {}]   ;;  %s5594_s6 = inlined_call_operand.vmem [shape: f32[1,96], index: 6, kind: input, shape index: {}]   ;;  %s5595_s7 = inlined_call_operand.vmem [shape: f32[32,32], index: 7, kind: input, shape index: {}]   ;;  %s5596_s8 = inlined_call_operand.vmem [shape: f32[1,32], index: 8, kind: input, shape index: {}]   ;;  %s5597_s9 = inlined_call_operand.vmem [shape: f32[1,32], index: 9, kind: input, shape index: {}]   ;;  %s5598_s10 = inlined_call_operand.vmem [shape: f32[1,32], index: 10, kind: input, shape index: {}]   ;;  %s5599_s11 = inlined_call_operand.vmem [shape: f32[1,32], index: 11, kind: input, shape index: {}]   ;;  %s5600_s12 = inlined_call_operand.vmem [shape: f32[1,32], index: 12, kind: input, shape index: {}]   ;;  %s5601_s13 = inlined_call_operand.vmem [shape: f32[32,64], index: 13, kind: input, shape index: {}]   ;;  %s5602_s14 = inlined_call_operand.vmem [shape: f32[1,64], index: 14, kind: input, shape index: {}]   ;;  %s5603_s15 = inlined_call_operand.vmem [shape: f32[64,32], index: 15, kind: input, shape index: {}]   ;;  %s5604_s16 = inlined_call_operand.vmem [shape: f32[1,32], index: 16, kind: input, shape index: {}]   ;;  %s5605_s17 = inlined_call_operand.vmem [shape: f32[1,32], index: 17, kind: input, shape index: {}]   ;;  %s5606_s18 = inlined_call_operand.vmem [shape: f32[1,32], index: 18, kind: input, shape index: {}]   ;;  %s5607_s19 = inlined_call_operand.vmem [shape: f32[32,32], index: 19, kind: input, shape index: {}]   ;;  %s5608_s20 = inlined_call_operand.vmem [shape: f32[1,32], index: 20, kind: input, shape index: {}]   ;;  %s5609_s21 = inlined_call_operand.vmem [shape: f32[32,10], index: 21, kind: input, shape index: {}]   ;;  %s5610_s22 = inlined_call_operand.vmem [shape: f32[1,10], index: 22, kind: input, shape index: {}]   ;;  %s5611_s23 = inlined_call_operand.vmem [shape: f32[34,32], index: 23, kind: output, shape index: {0}]   ;;  %s5612_s24 = inlined_call_operand.hbm [shape: f32[2,32], index: 24, kind: output, shape index: {1}]   ;;  %s5613_s25 = inlined_call_operand.hbm [shape: f32[2,10], index: 25, kind: output, shape index: {2}]  }
   0x1   :  { %5619 = sst [smem:[#allocation10_spill]] %s5588_s0 }
   0x2   :  { %5620 = sst [smem:[#allocation11_spill]] %s5589_s1 }
   0x3   :  { %5621 = sst [smem:[#allocation12_spill]] %s5590_s2 }
   0x4   :  { %5622 = sst [smem:[#allocation13_spill]] %s5591_s3 }
   0x5   :  { %5623 = sst [smem:[#allocation14_spill]] %s5592_s4 }
   0x6   :  { %5624 = sst [smem:[#allocation15_spill]] %s5593_s5 }
   0x7   :  { %5625 = sst [smem:[#allocation16_spill]] %s5594_s6 }
   0x8   :  { %5626 = sst [smem:[#allocation17_spill]] %s5595_s7 }
   0x9   :  { %5627 = sst [smem:[#allocation18_spill]] %s5596_s8 }
   0xa   :  { %5628 = sst [smem:[#allocation19_spill]] %s5597_s9 }
   0xb   :  { %31 = vsyncpa [#allocation5], 0  ;;  %s5629_s6 = sld [smem:[#allocation11_spill]]  ;;  %vm98_vm0 = vcmask 523264   ;;  %s5630_s29 = sld [smem:[#allocation10_spill]] }
  0x11   :  { %v83_v0 = vld [vmem:[%s5629_s6] sm:$0xff]  ;;  %v84_v1 = vld [vmem:[%s5629_s6 + $0x8] sm:$0xff]  ;;  %v85_v2 = vld [vmem:[%s5629_s6 + $0x10] sm:$0xff] }
  0x12   :  { %v3925_v3 = vpack.c.bf16 %v84_v1, %v83_v0  ;;  %v86_v4 = vld [vmem:[%s5629_s6 + $0x18] sm:$0xff]  ;;  %v87_v6 = vld [vmem:[%s5629_s6 + $0x20] sm:$0xff]  ;;  %v88_v7 = vld [vmem:[%s5629_s6 + $0x28] sm:$0xff] }
  0x13   :  { %v3929_v5 = vpack.c.bf16 %v86_v4, %v85_v2  ;;  %v79_v8 = vld [vmem:[%s5630_s29] sm:$0xff] }
  0x14   :  { %3926 = vmatprep.subr.bf16.mxu0 %v3925_v3  ;;  %3557 = vmatprep.mubr.msk.f32.mxu0 %vm98_vm0, %v79_v8 }
  0x15   :  { %3928 = vmatpush3.bf16.msra.mxu0 %v3925_v3 }
  0x16   :  { %32 = vsyncpa [#allocation7], 0  ;;  %3930 = vmatprep.subr.bf16.mxu0 %v3929_v5  ;;  %v3933_v9 = vpack.c.bf16 %v88_v7, %v87_v6  ;;  %v89_v10 = vld [vmem:[%s5629_s6 + $0x30] sm:$0xff]  ;;  %v90_v11 = vld [vmem:[%s5629_s6 + $0x38] sm:$0xff]  ;;  %s5631_s5 = sld [smem:[#allocation14_spill]]  ;;  %s5632_s30 = sld [smem:[#allocation13_spill]] }
  0x17   :  { %v3937_v12 = vpack.c.bf16 %v90_v11, %v89_v10  ;;  %v80_v13 = vld [vmem:[%s5630_s29 + $0x8] sm:$0xff]  ;;  %v81_v14 = vld [vmem:[%s5630_s29 + $0x10] sm:$0xff]  ;;  %v82_v15 = vld [vmem:[%s5630_s29 + $0x18] sm:$0xff]  ;;  %vm201_vm1 = vcmask 253952   ;;  %vm206_vm2 = vcmask 1046528   ;;  %s5633_s27 = sld [smem:[#allocation12_spill]] }
  0x18   :  { %vm216_vm3 = vcmask 261120   ;;  %vm243_vm4 = vcmask 254976   ;;  %s5634_s28 = sld [smem:[#allocation15_spill]]  ;;  %vm4338_vm5 = vmmov 0   ;;  %s5635_s29 = sld [smem:[#allocation19_spill]]  ;;  %vm445_vm6 = vcmask 64512  }
  0x19   :  { %3932 = vmatpush3.bf16.msra.mxu0 %v3929_v5  ;;  %s5636_s4 = sld [smem:[#allocation16_spill]]  ;;  %s4340_s6 = smov 96   ;;  %vm4728_vm7 = vmpackc.low %vm445_vm6, %vm445_vm6  ;;  %vm593_vm8 = vcmask 1040384   ;;  %vm541_vm9 = vcmask 138240   ;;  %vm548_vm10 = vcmask 131072   ;;  %vm678_vm11 = vcmask 57344  }
  0x1a   :  { %3934 = vmatprep.subr.bf16.mxu0 %v3933_v9  ;;  %s4342_s9 = smov 88   ;;  %s4344_s0 = smov 112   ;;  %vm931_vm12 = vcmask 130112   ;;  %vm934_vm13 = vcmask 122944   ;;  %vm1187_vm14 = vcmask 195712   ;;  %vm1190_vm15 = vcmask 188544  }
  0x1b   :  { %s4345_s2 = smov 72   ;;  %s4347_s7 = smov 64  }
  0x1c   :  { %v196_v16 = vld [vmem:[%s5631_s5] sm:$0xff]  ;;  %v197_v19 = vld [vmem:[%s5631_s5 + $0x8] sm:$0xff]  ;;  %v198_v20 = vld [vmem:[%s5631_s5 + $0x10] sm:$0x1]  ;;  %s4343_s5 = smov 120   ;;  %s4348_s3 = smov 56  }
  0x1d   :  { %3936 = vmatpush3.bf16.msra.mxu0 %v3933_v9  ;;  %v199_v17 = vld [vmem:[%s5632_s30] sm:$0x1]  ;;  %v208_v21 = vrot.slane %v197_v19, 1  ;;  %v210_v22 = vrot.slane %v198_v20, 1  ;;  %v207_v23 = vrot.slane %v196_v16, 1  ;;  %s4346_s30 = smov 104  }
  0x1e   :  { %3938 = vmatprep.subr.bf16.mxu0 %v3937_v12  ;;  %v200_v18 = vadd.f32 %v199_v17, %v196_v16  ;;  %v3264_v24 = vld [vmem:[%s5633_s27] ss:$0 sm:$0xff]  ;;  %v321_v11 = vld [vmem:[%s5634_s28 + $0x8] sm:$0xff]  ;;  %v4339_v16 = vmov 0.0   ;;  %s4349_s26 = smov 48   ;;  %s4351_s1 = smov 8  }
  0x1f   :  { %v211_v26 = vsel %vm206_vm2, %v208_v21, %v210_v22  ;;  %v209_v29 = vsel %vm206_vm2, %v207_v23, %v208_v21  ;;  %v320_v10 = vld [vmem:[%s5634_s28] sm:$0xff]  ;;  %3571 = vmatprep.mubr.msk.f32.mxu1 %vm4338_vm5, %v4339_v16  ;;  %s5639_s27 = sld [smem:[#allocation17_spill]] }
  0x20   :  { %202 = vst.msk [vmem:[#allocation2] sm:$0x1] %vm201_vm1, %v200_v18  ;;  %219 = vst.msk [vmem:[#allocation2 + $0x11] sm:$0x1] %vm201_vm1, %v200_v18  ;;  %vm1443_vm1 = vcmask 261312  }
  0x21   :  { %3940 = vmatpush3.bf16.msra.mxu0 %v3937_v12  ;;  %v3942_v12 = vpack.c.bf16 %v321_v11, %v320_v10 }
  0x24   :  { %3558 = vmatmul.mubr.msk.f32.vlgmr.msra.gmra.mrb[0].mxu0 %vm98_vm0, %v80_v13  ;;  %v322_v13 = vld [vmem:[%s5634_s28 + $0x10] sm:$0xff] }
  0x25   :  { %3560 = vmatprep.mubr.msk.f32.mxu0 %vm98_vm0, %v81_v14  ;;  %v323_v14 = vld [vmem:[%s5634_s28 + $0x18] sm:$0xff]  ;;  %s4341_s28 = smov 80  }
  0x26   :  { %v3945_v17 = vpack.c.bf16 %v323_v14, %v322_v13 }
  0x28   :  { %3561 = vmatmul.mubr.msk.f32.gmra.mrb[2].mxu0 %vm98_vm0, %v82_v15  ;;  %v4337_v15 = vmov 0.0|0.0  }
  0x29   :  { %3941 = vmatprep.subr.bf16.mxu1 %v4337_v15  ;;  %3947 = vmatprep.subr.bf16.mxu0 %v4337_v15 }
  0x2a   :  { %3943 = vmatpush3.bf16.msra.mxu1 %v3942_v12  ;;  %3592 = vmatprep.mubr.msk.f32.mxu0 %vm4338_vm5, %v4339_v16 }
  0x2b   :  { %3944 = vmatprep.subr.bf16.mxu1 %v4337_v15 }
  0x2e   :  { %3946 = vmatpush3.bf16.msra.mxu1 %v3945_v17 }
  0x2f   :  { %3951 = vmatprep.subr.bf16.mxu1 %v4337_v15 }
  0xf7   :  { %v3559_v25 = vpop.f32.mrb[0].mxu0 }
  0xf8   :  { %v183_v27 = vadd.f32 %v3559_v25, %v3264_v24  ;;  %v177_v28 = vpop.f32.mrb[1].mxu0 }
  0xf9   :  { %v178_v30 = vadd.f32 %v3264_v24, %v177_v28 }
  0xfa   :  { %v215_v31 = vadd.f32 %v211_v26, %v183_v27 }
  0xfb   :  { %v214_v32 = vadd.f32 %v209_v29, %v178_v30  ;;  %v3562_v33 = vpop.f32.mrb[2].mxu0 }
  0xfc   :  { %218 = vst.msk [vmem:[#allocation2 + $0x9] sm:$0xff] %vm216_vm3, %v215_v31  ;;  %v193_v34 = vadd.f32 %v3562_v33, %v3264_v24  ;;  %v187_v35 = vpop.f32.mrb[3].mxu0 }
  0xfd   :  { %217 = vst.msk [vmem:[#allocation2 + $0x1] sm:$0xff] %vm216_vm3, %v214_v32  ;;  %v188_v36 = vadd.f32 %v3264_v24, %v187_v35 }
  0xfe   :  { %v221_v37 = vadd.f32 %v211_v26, %v193_v34  ;;  %v3269_v34 = vld [vmem:[%s5635_s29] ss:$0 sm:$0xff]  ;;  %s4350_s29 = smov 40  }
  0xff   :  { %v220_v38 = vadd.f32 %v209_v29, %v188_v36  ;;  %v3270_v36 = vld [vmem:[%s5598_s10] ss:$0 sm:$0xff] }
 0x100   :  { %223 = vst.msk [vmem:[#allocation2 + $0x1a] sm:$0xff] %vm216_vm3, %v221_v37 }
 0x101   :  { %222 = vst.msk [vmem:[#allocation2 + $0x12] sm:$0xff] %vm216_vm3, %v220_v38 }
 0x104   :  { %v224_v39 = vld [vmem:[#allocation2] sm:$0xff]  ;;  %v225_v41 = vld [vmem:[#allocation2 + $0x8] sm:$0xff] }
 0x105   :  { %v231_v40 = vsel %vm216_vm3, %v224_v39, 0.0  ;;  %v234_v46 = vsel %vm216_vm3, %v225_v41, 0.0 }
 0x106   :  { %232 = vadd.xlane.f32.xlu0 %v231_v40 }
 0x107   :  { %v228_v44 = vld [vmem:[#allocation2 + $0x20] sm:$0x3] }
 0x108   :  { %v226_v42 = vld [vmem:[#allocation2 + $0x10] sm:$0xff]  ;;  %v227_v43 = vld [vmem:[#allocation2 + $0x18] sm:$0xff]  ;;  %v244_v48 = vsel %vm243_vm4, %v228_v44, 0.0 }
 0x109   :  { %v237_v45 = vsel %vm216_vm3, %v226_v42, 0.0  ;;  %v240_v47 = vsel %vm216_vm3, %v227_v43, 0.0 }
 0x10a   :  { %238 = vadd.xlane.f32.xlu1 %v237_v45  ;;  %235 = vadd.xlane.f32.xlu0 %v234_v46 }
 0x10e   :  { %241 = vadd.xlane.f32.xlu1 %v240_v47  ;;  %245 = vadd.xlane.f32.xlu0 %v244_v48 }
 0x193   :  { %v233_v49 = vpop.xlane.xlu0 %232 }
 0x194   :  { %v248_v50 = vmul.f32 0.03125, %v233_v49 }
 0x196   :  { %v4552_v51 = vsub.f32 %v224_v39, %v248_v50 }
 0x197   :  { %v239_v52 = vpop.xlane.xlu1 %238  ;;  %v236_v53 = vpop.xlane.xlu0 %235 }
 0x198   :  { %v250_v54 = vmul.f32 0.03125, %v239_v52  ;;  %v249_v55 = vmul.f32 0.03125, %v236_v53  ;;  %v258_v56 = vmul.f32 %v4552_v51, %v4552_v51 }
 0x19a   :  { %v4556_v57 = vsub.f32 %v226_v42, %v250_v54  ;;  %v4558_v58 = vsub.f32 %v225_v41, %v249_v55  ;;  %v263_v59 = vsel %vm216_vm3, %v258_v56, 0.0 }
 0x19b   :  { %v242_v60 = vpop.xlane.xlu1 %241  ;;  %264 = vadd.xlane.f32.xlu1 %v263_v59  ;;  %v246_v61 = vpop.xlane.xlu0 %245 }
 0x19c   :  { %v251_v62 = vmul.f32 0.03125, %v242_v60  ;;  %v252_v63 = vmul.f32 0.03125, %v246_v61  ;;  %v260_v0 = vmul.f32 %v4556_v57, %v4556_v57  ;;  %v259_v1 = vmul.f32 %v4558_v58, %v4558_v58 }
 0x19e   :  { %v4565_v2 = vsub.f32 %v227_v43, %v251_v62  ;;  %v4567_v3 = vsub.f32 %v228_v44, %v252_v63  ;;  %v269_v4 = vsel %vm216_vm3, %v260_v0, 0.0  ;;  %v266_v5 = vsel %vm216_vm3, %v259_v1, 0.0 }
 0x19f   :  { %270 = vadd.xlane.f32.xlu1 %v269_v4  ;;  %267 = vadd.xlane.f32.xlu0 %v266_v5 }
 0x1a0   :  { %v261_v6 = vmul.f32 %v4565_v2, %v4565_v2  ;;  %v262_v7 = vmul.f32 %v4567_v3, %v4567_v3 }
 0x1a2   :  { %v272_v8 = vsel %vm216_vm3, %v261_v6, 0.0  ;;  %v275_v9 = vsel %vm243_vm4, %v262_v7, 0.0 }
 0x1a3   :  { %273 = vadd.xlane.f32.xlu0 %v272_v8  ;;  %276 = vadd.xlane.f32.xlu1 %v275_v9 }
 0x228   :  { %v265_v18 = vpop.xlane.xlu1 %264 }
 0x229   :  { %v278_v19 = vmul.f32 0.03125, %v265_v18 }
 0x22b   :  { %v283_v20 = vadd.f32 1e-12, %v278_v19 }
 0x22c   :  { %v271_v21 = vpop.xlane.xlu1 %270  ;;  %v268_v22 = vpop.xlane.xlu0 %267 }
 0x22d   :  { %4142 = vrsqrt.f32 %v283_v20  ;;  %v280_v23 = vmul.f32 0.03125, %v271_v21  ;;  %v279_v24 = vmul.f32 0.03125, %v268_v22 }
 0x22f   :  { %v285_v25 = vadd.f32 1e-12, %v280_v23  ;;  %v284_v26 = vadd.f32 1e-12, %v279_v24 }
 0x230   :  { %v277_v27 = vpop.xlane.xlu1 %276  ;;  %v274_v28 = vpop.xlane.xlu0 %273 }
 0x231   :  { %4144 = vrsqrt.f32 %v285_v25  ;;  %v282_v29 = vmul.f32 0.03125, %v277_v27  ;;  %v281_v30 = vmul.f32 0.03125, %v274_v28 }
 0x232   :  { %4146 = vrsqrt.f32 %v284_v26 }
 0x233   :  { %v286_v31 = vadd.f32 1e-12, %v281_v30  ;;  %v287_v32 = vadd.f32 1e-12, %v282_v29 }
 0x235   :  { %4148 = vrsqrt.f32 %v286_v31 }
 0x236   :  { %4150 = vrsqrt.f32 %v287_v32 }
 0x237   :  { %v4143_v33 = vpop.eup %4142 }
 0x238   :  { %v293_v35 = vmul.f32 %v4143_v33, %v4552_v51 }
 0x23a   :  { %v304_v37 = vmul.f32 %v3269_v34, %v293_v35 }
 0x23b   :  { %v4145_v38 = vpop.eup %4144 }
 0x23c   :  { %v4147_v39 = vpop.eup %4146  ;;  %v315_v40 = vadd.f32 %v3270_v36, %v304_v37  ;;  %v295_v42 = vmul.f32 %v4145_v38, %v4556_v57  ;;  %v3271_v57 = vld [vmem:[%s5636_s4] ss:$0 sm:$0xff] }
 0x23d   :  { %v294_v41 = vmul.f32 %v4147_v39, %v4558_v58 }
 0x23e   :  { %3572 = vmatmul.mubr.msk.f32.vlgmr.msra.gmra.mrb[0].mxu1 %vm216_vm3, %v315_v40  ;;  %v306_v46 = vmul.f32 %v3269_v34, %v295_v42 }
 0x23f   :  { %3574 = vmatprep.mubr.msk.f32.mxu1 %vm4338_vm5, %v4339_v16  ;;  %v305_v43 = vmul.f32 %v3269_v34, %v294_v41  ;;  %v4149_v44 = vpop.eup %4148 }
 0x240   :  { %v296_v47 = vmul.f32 %v4149_v44, %v4565_v2  ;;  %v4151_v48 = vpop.eup %4150  ;;  %v317_v49 = vadd.f32 %v3270_v36, %v306_v46 }
 0x241   :  { %v316_v45 = vadd.f32 %v3270_v36, %v305_v43  ;;  %v297_v51 = vmul.f32 %v4151_v48, %v4567_v3 }
 0x242   :  { %v307_v50 = vmul.f32 %v3269_v34, %v296_v47 }
 0x243   :  { %3575 = vmatmul.mubr.msk.f32.gmra.mrb[2].mxu1 %vm216_vm3, %v316_v45  ;;  %v308_v53 = vmul.f32 %v3269_v34, %v297_v51 }
 0x244   :  { %3577 = vmatprep.mubr.msk.f32.mxu1 %vm4338_vm5, %v4339_v16  ;;  %v318_v52 = vadd.f32 %v3270_v36, %v307_v50 }
 0x245   :  { %v319_v54 = vadd.f32 %v3270_v36, %v308_v53 }
 0x247   :  { %3578 = vmatmul.mubr.msk.f32.gmra.mrb[4].mxu1 %vm216_vm3, %v317_v49 }
 0x248   :  { %3580 = vmatprep.mubr.msk.f32.mxu1 %vm4338_vm5, %v4339_v16 }
 0x24b   :  { %3581 = vmatmul.mubr.msk.f32.gmra.mrb[6].mxu1 %vm216_vm3, %v318_v52 }
 0x24c   :  { %3583 = vmatprep.mubr.msk.f32.mxu1 %vm4338_vm5, %v4339_v16 }
 0x24f   :  { %3584 = vmatmul.mubr.msk.f32.gmra.mrb[8].mxu1 %vm216_vm3, %v319_v54 }
 0x250   :  { %3607 = vmatprep.mubr.msk.f32.mxu1 %vm4338_vm5, %v4339_v16 }
 0x311   :  { %v412_v55 = vpop.f32.mrb[0].mxu1 }
 0x312   :  { %v3573_v56 = vpop.f32.mrb[1].mxu1  ;;  %v4626_v59 = vadd.f32 %v3271_v57, %v412_v55 }
 0x316   :  { %v417_v58 = vpop.f32.mrb[2].mxu1 }
 0x317   :  { %v4628_v60 = vadd.f32 %v3271_v57, %v417_v58  ;;  %v3576_v61 = vpop.f32.mrb[3].mxu1 }
 0x319   :  { %v4632_v62 = vpack.i.bf16 %v4628_v60, %v4626_v59 }
 0x31a   :  { %v422_v63 = vpop.f32.mrb[4].mxu1 }
 0x31b   :  { %v4634_v0 = vadd.f32 %v3271_v57, %v422_v63  ;;  %4063 = vrot.lane.b32.xlu0 %v4632_v62, %s4340_s6  ;;  %v3579_v1 = vpop.f32.mrb[5].mxu1 }
 0x31d   :  { %443 = vrot.lane.b32.xlu1 %v4634_v0, %s4340_s6  ;;  %v1450_v10 = vrot.slane %v4634_v0, 1 }
 0x31e   :  { %v427_v2 = vpop.f32.mrb[6].mxu1 }
 0x31f   :  { %4073 = vrot.lane.b32.xlu0 %v4632_v62, %s4341_s28  ;;  %v3582_v3 = vpop.f32.mrb[7].mxu1  ;;  %v428_v7 = vadd.f32 %v3271_v57, %v427_v2 }
 0x321   :  { %4068 = vrot.lane.b32.xlu1 %v4632_v62, %s4342_s9  ;;  %v1451_v9 = vrot.slane %v428_v7, 1 }
 0x322   :  { %v432_v4 = vpop.f32.mrb[8].mxu1 }
 0x323   :  { %682 = vrot.lane.b32.xlu0 %v4628_v60, %s4343_s5  ;;  %v3585_v5 = vpop.f32.mrb[9].mxu1  ;;  %v433_v6 = vadd.f32 %v3271_v57, %v432_v4  ;;  %v4666_v12 = vsel %vm206_vm2, %v1450_v10, %v1451_v9 }
 0x325   :  { %690 = vrot.lane.b32.xlu1 %v4634_v0, %s4342_s9  ;;  %v4652_v8 = vrot.slane %v433_v6, 1 }
 0x327   :  { %946 = vrot.lane.b32.xlu0 %v4634_v0, %s4341_s28  ;;  %v4661_v11 = vsel %vm206_vm2, %v1451_v9, %v4652_v8  ;;  %vm1446_vm2 = vcmask 254144  }
 0x328   :  { %v4671_v13 = vpack.i.bf16 %v4661_v11, %v4666_v12 }
 0x329   :  { %680 = vrot.lane.b32.xlu1 %v4626_v59, %s4343_s5 }
 0x32b   :  { %936 = vrot.lane.b32.xlu0 %v4626_v59, %s4344_s0 }
 0x32d   :  { %684 = vrot.lane.b32.xlu1 %v4634_v0, %s4343_s5 }
 0x32f   :  { %940 = vrot.lane.b32.xlu0 %v4634_v0, %s4344_s0 }
 0x331   :  { %4078 = vrot.lane.b32.xlu1 %v4632_v62, %s4345_s2 }
 0x333   :  { %4083 = vrot.lane.b32.xlu0 %v4671_v13, %s4340_s6 }
 0x335   :  { %938 = vrot.lane.b32.xlu1 %v4628_v60, %s4344_s0 }
 0x337   :  { %1194 = vrot.lane.b32.xlu0 %v4628_v60, %s4346_s30 }
 0x339   :  { %1202 = vrot.lane.b32.xlu1 %v4634_v0, %s4345_s2 }
 0x33b   :  { %1459 = vrot.lane.b32.xlu0 %v4652_v8, %s4340_s6 }
 0x33d   :  { %1192 = vrot.lane.b32.xlu1 %v4626_v59, %s4346_s30 }
 0x33f   :  { %1701 = vrot.lane.b32.xlu0 %v4652_v8, %s4342_s9 }
 0x341   :  { %1196 = vrot.lane.b32.xlu1 %v4634_v0, %s4346_s30 }
 0x343   :  { %1691 = vrot.lane.b32.xlu0 %v4666_v12, %s4343_s5 }
 0x345   :  { %4088 = vrot.lane.b32.xlu1 %v4671_v13, %s4342_s9 }
 0x347   :  { %1695 = vrot.lane.b32.xlu0 %v4652_v8, %s4343_s5 }
 0x349   :  { %4093 = vrot.lane.b32.xlu1 %v4671_v13, %s4341_s28 }
 0x34b   :  { %1945 = vrot.lane.b32.xlu0 %v4666_v12, %s4344_s0 }
 0x34d   :  { %1693 = vrot.lane.b32.xlu1 %v4661_v11, %s4343_s5 }
 0x34f   :  { %4098 = vrot.lane.b32.xlu0 %v4671_v13, %s4345_s2 }
 0x351   :  { %1955 = vrot.lane.b32.xlu1 %v4652_v8, %s4341_s28  ;;  %s4352_s28 = smov 16  }
 0x353   :  { %2209 = vrot.lane.b32.xlu0 %v4652_v8, %s4345_s2 }
 0x355   :  { %1947 = vrot.lane.b32.xlu1 %v4661_v11, %s4344_s0 }
 0x357   :  { %580 = vrot.lane.b32.xlu0 %v4634_v0, %s4347_s7 }
 0x359   :  { %1949 = vrot.lane.b32.xlu1 %v4652_v8, %s4344_s0 }
 0x35b   :  { %4108 = vrot.lane.b32.xlu0 %v4632_v62, %s4348_s3 }
 0x35d   :  { %2199 = vrot.lane.b32.xlu1 %v4666_v12, %s4346_s30 }
 0x35f   :  { %4113 = vrot.lane.b32.xlu0 %v4632_v62, %s4349_s26 }
 0x361   :  { %4103 = vrot.lane.b32.xlu1 %v4632_v62, %s4347_s7 }
 0x363   :  { %1336 = vrot.lane.b32.xlu0 %v4634_v0, %s4350_s29 }
 0x365   :  { %824 = vrot.lane.b32.xlu1 %v4634_v0, %s4348_s3 }
 0x369   :  { %1080 = vrot.lane.b32.xlu1 %v4634_v0, %s4349_s26 }
 0x36d   :  { %4118 = vrot.lane.b32.xlu1 %v4632_v62, %s4350_s29 }
 0x38d   :  { %v4064_v14 = vpop.permute.xlu0 %4063 }
 0x38e   :  { %v4066_v17 = vunpack.i.h.bf16 %v4064_v14  ;;  %v4065_v18 = vunpack.i.l.bf16 %v4064_v14 }
 0x38f   :  { %v444_v19 = vpop.permute.xlu1 %443 }
 0x390   :  { %v3948_v21 = vpack.c.bf16 %v4066_v17, %v4065_v18 }
 0x391   :  { %v4074_v22 = vpop.permute.xlu0 %4073 }
 0x392   :  { %3950 = vmatpush3.bf16.xpose.msk.msra.mxu0 %vm4728_vm7, %v3948_v21  ;;  %v4076_v35 = vunpack.i.h.bf16 %v4074_v22  ;;  %v4075_v36 = vunpack.i.l.bf16 %v4074_v22 }
 0x393   :  { %v4069_v23 = vpop.permute.xlu1 %4068  ;;  %3590 = vmatprep.subr.mxu0 %v4339_v16 }
 0x394   :  { %v4071_v26 = vunpack.i.h.bf16 %v4069_v23  ;;  %v4070_v27 = vunpack.i.l.bf16 %v4069_v23  ;;  %v3962_v39 = vpack.c.bf16 %v4076_v35, %v4075_v36 }
 0x395   :  { %v683_v24 = vpop.permute.xlu0 %682 }
 0x396   :  { %v3955_v30 = vpack.c.bf16 %v4071_v26, %v4070_v27 }
 0x397   :  { %v691_v25 = vpop.permute.xlu1 %690 }
 0x399   :  { %v947_v28 = vpop.permute.xlu0 %946 }
 0x39a   :  { %3591 = vmatpush3.xpose.msk.msra.mxu0 %vm445_vm6, %v444_v19 }
 0x39b   :  { %v681_v29 = vpop.permute.xlu1 %680  ;;  %3954 = vmatprep.subr.bf16.mxu0 %v4337_v15 }
 0x39d   :  { %v937_v31 = vpop.permute.xlu0 %936  ;;  %3593 = vmatmul.mubr.msk.f32.vlgmr.msra.gmra.mrb[4].mxu0 %vm445_vm6, %v4626_v59 }
 0x39e   :  { %3957 = vmatpush3.bf16.xpose.msk.msra.mxu0 %vm4728_vm7, %v3955_v30  ;;  %3595 = vmatprep.mubr.msk.f32.mxu0 %vm4338_vm5, %v4339_v16 }
 0x39f   :  { %v685_v32 = vpop.permute.xlu1 %684  ;;  %3620 = vmatprep.subr.mxu0 %v4339_v16 }
 0x3a1   :  { %v941_v33 = vpop.permute.xlu0 %940  ;;  %3596 = vmatmul.mubr.msk.f32.gmra.mrb[6].mxu0 %vm445_vm6, %v4628_v60 }
 0x3a2   :  { %3598 = vmatprep.mubr.msk.f32.mxu0 %vm4338_vm5, %v4339_v16 }
 0x3a3   :  { %v4079_v34 = vpop.permute.xlu1 %4078 }
 0x3a4   :  { %v4081_v43 = vunpack.i.h.bf16 %v4079_v34  ;;  %v4080_v44 = vunpack.i.l.bf16 %v4079_v34 }
 0x3a5   :  { %v4084_v37 = vpop.permute.xlu0 %4083  ;;  %3599 = vmatmul.mubr.msk.f32.gmra.mrb[8].mxu0 %vm445_vm6, %v4634_v0 }
 0x3a6   :  { %3621 = vmatpush3.xpose.msk.msra.mxu0 %vm445_vm6, %v691_v25  ;;  %3622 = vmatprep.mubr.msk.f32.mxu0 %vm4338_vm5, %v4339_v16  ;;  %v3969_v47 = vpack.c.bf16 %v4081_v43, %v4080_v44  ;;  %v4086_v51 = vunpack.i.h.bf16 %v4084_v37  ;;  %v4085_v52 = vunpack.i.l.bf16 %v4084_v37 }
 0x3a7   :  { %v939_v38 = vpop.permute.xlu1 %938  ;;  %3961 = vmatprep.subr.bf16.mxu0 %v4337_v15 }
 0x3a8   :  { %v3976_v55 = vpack.c.bf16 %v4086_v51, %v4085_v52 }
 0x3a9   :  { %3623 = vmatmul.mubr.msk.f32.vlgmr.msra.gmra.mrb[10].mxu0 %vm445_vm6, %v681_v29  ;;  %v1195_v40 = vpop.permute.xlu0 %1194 }
 0x3aa   :  { %3964 = vmatpush3.bf16.xpose.msk.msra.mxu0 %vm4728_vm7, %v3962_v39  ;;  %3625 = vmatprep.mubr.msk.f32.mxu0 %vm4338_vm5, %v4339_v16 }
 0x3ab   :  { %v1203_v41 = vpop.permute.xlu1 %1202  ;;  %3650 = vmatprep.subr.mxu0 %v4339_v16 }
 0x3ad   :  { %3626 = vmatmul.mubr.msk.f32.gmra.mrb[12].mxu0 %vm445_vm6, %v683_v24  ;;  %v1460_v45 = vpop.permute.xlu0 %1459 }
 0x3ae   :  { %3628 = vmatprep.mubr.msk.f32.mxu0 %vm4338_vm5, %v4339_v16 }
 0x3af   :  { %v1193_v42 = vpop.permute.xlu1 %1192 }
 0x3b1   :  { %3629 = vmatmul.mubr.msk.f32.gmra.mrb[14].mxu0 %vm445_vm6, %v685_v32  ;;  %v1702_v48 = vpop.permute.xlu0 %1701 }
 0x3b2   :  { %3651 = vmatpush3.xpose.msk.msra.mxu0 %vm445_vm6, %v947_v28  ;;  %3652 = vmatprep.mubr.msk.f32.mxu0 %vm4338_vm5, %v4339_v16 }
 0x3b3   :  { %v1197_v46 = vpop.permute.xlu1 %1196  ;;  %3968 = vmatprep.subr.bf16.mxu0 %v4337_v15 }
 0x3b5   :  { %3653 = vmatmul.mubr.msk.f32.vlgmr.msra.gmra.mrb[16].mxu0 %vm445_vm6, %v937_v31  ;;  %v1692_v53 = vpop.permute.xlu0 %1691 }
 0x3b6   :  { %3971 = vmatpush3.bf16.xpose.msk.msra.mxu0 %vm4728_vm7, %v3969_v47  ;;  %3655 = vmatprep.mubr.msk.f32.mxu0 %vm4338_vm5, %v4339_v16 }
 0x3b7   :  { %v4089_v49 = vpop.permute.xlu1 %4088  ;;  %3680 = vmatprep.subr.mxu0 %v4339_v16 }
 0x3b8   :  { %v4091_v59 = vunpack.i.h.bf16 %v4089_v49  ;;  %v4090_v60 = vunpack.i.l.bf16 %v4089_v49 }
 0x3b9   :  { %3656 = vmatmul.mubr.msk.f32.gmra.mrb[18].mxu0 %vm445_vm6, %v939_v38  ;;  %v1696_v56 = vpop.permute.xlu0 %1695 }
 0x3ba   :  { %3658 = vmatprep.mubr.msk.f32.mxu0 %vm4338_vm5, %v4339_v16  ;;  %v3983_v63 = vpack.c.bf16 %v4091_v59, %v4090_v60 }
 0x3bb   :  { %v4094_v50 = vpop.permute.xlu1 %4093 }
 0x3bc   :  { %v4096_v3 = vunpack.i.h.bf16 %v4094_v50  ;;  %v4095_v4 = vunpack.i.l.bf16 %v4094_v50 }
 0x3bd   :  { %3659 = vmatmul.mubr.msk.f32.gmra.mrb[20].mxu0 %vm445_vm6, %v941_v33  ;;  %v1946_v61 = vpop.permute.xlu0 %1945 }
 0x3be   :  { %3681 = vmatpush3.xpose.msk.msra.mxu0 %vm445_vm6, %v1203_v41  ;;  %3682 = vmatprep.mubr.msk.f32.mxu0 %vm4338_vm5, %v4339_v16  ;;  %v3990_v10 = vpack.c.bf16 %v4096_v3, %v4095_v4 }
 0x3bf   :  { %v1694_v54 = vpop.permute.xlu1 %1693  ;;  %3975 = vmatprep.subr.bf16.mxu0 %v4337_v15 }
 0x3c1   :  { %3683 = vmatmul.mubr.msk.f32.vlgmr.msra.gmra.mrb[22].mxu0 %vm445_vm6, %v1193_v42  ;;  %v4099_v0 = vpop.permute.xlu0 %4098 }
 0x3c2   :  { %3978 = vmatpush3.bf16.xpose.msk.msra.mxu0 %vm4728_vm7, %v3976_v55  ;;  %3685 = vmatprep.mubr.msk.f32.mxu0 %vm4338_vm5, %v4339_v16  ;;  %v4101_v14 = vunpack.i.h.bf16 %v4099_v0  ;;  %v4100_v17 = vunpack.i.l.bf16 %v4099_v0 }
 0x3c3   :  { %v1956_v57 = vpop.permute.xlu1 %1955  ;;  %3710 = vmatprep.subr.mxu0 %v4339_v16 }
 0x3c4   :  { %v4832_v18 = vpack.c.bf16 %v4101_v14, %v4100_v17 }
 0x3c5   :  { %3686 = vmatmul.mubr.msk.f32.gmra.mrb[24].mxu0 %vm445_vm6, %v1195_v40  ;;  %v4807_v7 = vpop.permute.xlu0 %2209 }
 0x3c6   :  { %3688 = vmatprep.mubr.msk.f32.mxu0 %vm4338_vm5, %v4339_v16 }
 0x3c7   :  { %v1948_v58 = vpop.permute.xlu1 %1947 }
 0x3c9   :  { %3689 = vmatmul.mubr.msk.f32.gmra.mrb[26].mxu0 %vm445_vm6, %v1197_v46 }
 0x3ca   :  { %3711 = vmatpush3.xpose.msk.msra.mxu0 %vm445_vm6, %v1460_v45  ;;  %3712 = vmatprep.mubr.msk.f32.mxu0 %vm4338_vm5, %v4339_v16 }
 0x3cb   :  { %v1950_v62 = vpop.permute.xlu1 %1949  ;;  %3982 = vmatprep.subr.bf16.mxu0 %v4337_v15 }
 0x3cd   :  { %3713 = vmatmul.mubr.msk.f32.vlgmr.msra.gmra.mrb[28].mxu0 %vm445_vm6, %v4666_v12  ;;  %v581_v12 = vpop.permute.xlu0 %580 }
 0x3ce   :  { %3985 = vmatpush3.bf16.xpose.msk.msra.mxu0 %vm4728_vm7, %v3983_v63  ;;  %3715 = vmatprep.mubr.msk.f32.mxu0 %vm4338_vm5, %v4339_v16 }
 0x3cf   :  { %v2200_v1 = vpop.permute.xlu1 %2199  ;;  %3740 = vmatprep.subr.mxu0 %v4339_v16 }
 0x3d1   :  { %3716 = vmatmul.mubr.msk.f32.gmra.mrb[30].mxu0 %vm445_vm6, %v4661_v11 }
 0x3d2   :  { %3718 = vmatprep.mubr.msk.f32.mxu0 %vm4338_vm5, %v4339_v16 }
 0x3d3   :  { %v4104_v2 = vpop.permute.xlu1 %4103 }
 0x3d4   :  { %v4106_v5 = vunpack.i.h.bf16 %v4104_v2  ;;  %v4105_v6 = vunpack.i.l.bf16 %v4104_v2 }
 0x3d5   :  { %3719 = vmatmul.mubr.msk.f32.gmra.mrb[32].mxu0 %vm445_vm6, %v4652_v8 }
 0x3d6   :  { %v3952_v9 = vpack.c.bf16 %v4106_v5, %v4105_v6  ;;  %3741 = vmatpush3.xpose.msk.msra.mxu0 %vm445_vm6, %v1702_v48  ;;  %3742 = vmatprep.mubr.msk.f32.mxu0 %vm4338_vm5, %v4339_v16 }
 0x3d7   :  { %3989 = vmatprep.subr.bf16.mxu0 %v4337_v15 }
 0x3d8   :  { %3953 = vmatpush3.bf16.msra.mxu1 %v3952_v9 }
 0x3d9   :  { %3743 = vmatmul.mubr.msk.f32.vlgmr.msra.gmra.mrb[34].mxu0 %vm445_vm6, %v1692_v53  ;;  %3605 = vmatprep.subr.mxu1 %v4339_v16 }
 0x3da   :  { %3992 = vmatpush3.bf16.xpose.msk.msra.mxu0 %vm4728_vm7, %v3990_v10  ;;  %3745 = vmatprep.mubr.msk.f32.mxu0 %vm4338_vm5, %v4339_v16 }
 0x3db   :  { %3770 = vmatprep.subr.mxu0 %v4339_v16 }
 0x3dc   :  { %3606 = vmatpush3.msk.msra.mxu1 %vm593_vm8, %v581_v12 }
 0x3dd   :  { %3746 = vmatmul.mubr.msk.f32.gmra.mrb[36].mxu0 %vm445_vm6, %v1694_v54  ;;  %3958 = vmatprep.subr.bf16.mxu1 %v4337_v15 }
 0x3de   :  { %3748 = vmatprep.mubr.msk.f32.mxu0 %vm4338_vm5, %v4339_v16 }
 0x3e1   :  { %3749 = vmatmul.mubr.msk.f32.gmra.mrb[38].mxu0 %vm445_vm6, %v1696_v56 }
 0x3e2   :  { %3771 = vmatpush3.xpose.msk.msra.mxu0 %vm445_vm6, %v1956_v57  ;;  %3772 = vmatprep.mubr.msk.f32.mxu0 %vm4338_vm5, %v4339_v16 }
 0x3e3   :  { %3996 = vmatprep.subr.bf16.mxu0 %v4337_v15 }
 0x3e5   :  { %3773 = vmatmul.mubr.msk.f32.vlgmr.msra.gmra.mrb[40].mxu0 %vm445_vm6, %v1946_v61 }
 0x3e6   :  { %3999 = vmatpush3.bf16.xpose.msk.msra.mxu0 %vm4728_vm7, %v4832_v18  ;;  %3775 = vmatprep.mubr.msk.f32.mxu0 %vm4338_vm5, %v4339_v16 }
 0x3e7   :  { %3800 = vmatprep.subr.mxu0 %v4339_v16 }
 0x3e9   :  { %3776 = vmatmul.mubr.msk.f32.gmra.mrb[42].mxu0 %vm445_vm6, %v1948_v58 }
 0x3ea   :  { %3778 = vmatprep.mubr.msk.f32.mxu0 %vm4338_vm5, %v4339_v16 }
 0x3ed   :  { %3779 = vmatmul.mubr.msk.f32.gmra.mrb[44].mxu0 %vm445_vm6, %v1950_v62 }
 0x3ee   :  { %3801 = vmatpush3.xpose.msk.msra.mxu0 %vm445_vm6, %v4807_v7  ;;  %3802 = vmatprep.mubr.msk.f32.mxu0 %vm4338_vm5, %v4339_v16 }
 0x3ef   :  { %4003 = vmatprep.subr.bf16.mxu0 %v4337_v15 }
 0x3f1   :  { %3803 = vmatmul.mubr.msk.f32.vlgmr.msra.gmra.mrb[46].mxu0 %vm445_vm6, %v2200_v1 }
 0x3f2   :  { %3805 = vmatprep.mubr.msk.f32.mxu0 %vm4338_vm5, %v4339_v16 }
 0x470   :  { %v524_v19 = vpop.f32.mrb[4].mxu0 }
 0x471   :  { %v4853_v21 = vmul.f32 0.35355338, %v524_v19  ;;  %v3594_v22 = vpop.f32.mrb[5].mxu0 }
 0x473   :  { %v542_v23 = vsel %vm541_vm9, %v4853_v21, -inf }
 0x474   :  { %543 = vmax.xlane.f32.xlu0 %v542_v23  ;;  %v529_v24 = vpop.f32.mrb[6].mxu0 }
 0x475   :  { %v4857_v25 = vmul.f32 0.35355338, %v529_v24  ;;  %v3597_v26 = vpop.f32.mrb[7].mxu0 }
 0x477   :  { %v545_v27 = vsel %vm541_vm9, %v4857_v25, -inf }
 0x478   :  { %546 = vmax.xlane.f32.xlu1 %v545_v27  ;;  %v534_v28 = vpop.f32.mrb[8].mxu0 }
 0x479   :  { %v4861_v29 = vmul.f32 0.35355338, %v534_v28  ;;  %v3600_v30 = vpop.f32.mrb[9].mxu0 }
 0x47b   :  { %v549_v31 = vsel %vm548_vm10, %v4861_v29, -inf }
 0x47c   :  { %550 = vmax.xlane.f32.xlu0 %v549_v31  ;;  %v770_v32 = vpop.f32.mrb[10].mxu0 }
 0x47d   :  { %v4865_v33 = vmul.f32 0.35355338, %v770_v32  ;;  %v3624_v34 = vpop.f32.mrb[11].mxu0 }
 0x47f   :  { %v787_v35 = vsel %vm541_vm9, %v4865_v33, -inf }
 0x480   :  { %788 = vmax.xlane.f32.xlu0 %v787_v35  ;;  %v775_v36 = vpop.f32.mrb[12].mxu0 }
 0x481   :  { %v4869_v37 = vmul.f32 0.35355338, %v775_v36  ;;  %v3627_v38 = vpop.f32.mrb[13].mxu0 }
 0x483   :  { %v790_v39 = vsel %vm541_vm9, %v4869_v37, -inf }
 0x484   :  { %791 = vmax.xlane.f32.xlu0 %v790_v39  ;;  %v780_v40 = vpop.f32.mrb[14].mxu0 }
 0x485   :  { %v4873_v41 = vmul.f32 0.35355338, %v780_v40  ;;  %v3630_v42 = vpop.f32.mrb[15].mxu0 }
 0x487   :  { %v793_v43 = vsel %vm548_vm10, %v4873_v41, -inf }
 0x488   :  { %794 = vmax.xlane.f32.xlu1 %v793_v43  ;;  %v1026_v44 = vpop.f32.mrb[16].mxu0 }
 0x489   :  { %v4877_v45 = vmul.f32 0.35355338, %v1026_v44  ;;  %v3654_v46 = vpop.f32.mrb[17].mxu0 }
 0x48b   :  { %v1043_v47 = vsel %vm541_vm9, %v4877_v45, -inf }
 0x48c   :  { %1044 = vmax.xlane.f32.xlu0 %v1043_v47  ;;  %v1031_v48 = vpop.f32.mrb[18].mxu0 }
 0x48d   :  { %v4881_v49 = vmul.f32 0.35355338, %v1031_v48  ;;  %v3657_v50 = vpop.f32.mrb[19].mxu0 }
 0x48f   :  { %v1046_v51 = vsel %vm541_vm9, %v4881_v49, -inf }
 0x490   :  { %1047 = vmax.xlane.f32.xlu1 %v1046_v51  ;;  %v1036_v52 = vpop.f32.mrb[20].mxu0 }
 0x491   :  { %v4885_v53 = vmul.f32 0.35355338, %v1036_v52  ;;  %v3660_v54 = vpop.f32.mrb[21].mxu0 }
 0x493   :  { %v1049_v55 = vsel %vm548_vm10, %v4885_v53, -inf }
 0x494   :  { %1050 = vmax.xlane.f32.xlu0 %v1049_v55  ;;  %v1282_v56 = vpop.f32.mrb[22].mxu0 }
 0x495   :  { %v4889_v57 = vmul.f32 0.35355338, %v1282_v56  ;;  %v3684_v58 = vpop.f32.mrb[23].mxu0 }
 0x497   :  { %v1299_v59 = vsel %vm541_vm9, %v4889_v57, -inf }
 0x498   :  { %1300 = vmax.xlane.f32.xlu1 %v1299_v59  ;;  %v1287_v60 = vpop.f32.mrb[24].mxu0 }
 0x499   :  { %v3687_v61 = vpop.f32.mrb[25].mxu0  ;;  %v4897_v28 = vmul.f32 0.35355338, %v1287_v60 }
 0x49b   :  { %v1302_v35 = vsel %vm541_vm9, %v4897_v28, -inf }
 0x49c   :  { %v1292_v62 = vpop.f32.mrb[26].mxu0 }
 0x49d   :  { %v3690_v63 = vpop.f32.mrb[27].mxu0  ;;  %v4899_v32 = vmul.f32 0.35355338, %v1292_v62  ;;  %v4945_v62 = vpop.permute.xlu0 %4108 }
 0x49e   :  { %v4947_v63 = vpop.permute.xlu1 %824 }
 0x49f   :  { %v1305_v39 = vsel %vm548_vm10, %v4899_v32, -inf }
 0x4a0   :  { %v1539_v0 = vpop.f32.mrb[28].mxu0 }
 0x4a1   :  { %v3714_v1 = vpop.f32.mrb[29].mxu0  ;;  %v4901_v34 = vmul.f32 0.35355338, %v1539_v0  ;;  %v4949_v0 = vpop.permute.xlu0 %4113 }
 0x4a2   :  { %v4951_v1 = vpop.permute.xlu1 %1080 }
 0x4a3   :  { %v1556_v40 = vsel %vm541_vm9, %v4901_v34, -inf }
 0x4a4   :  { %v1544_v2 = vpop.f32.mrb[30].mxu0 }
 0x4a5   :  { %v3717_v3 = vpop.f32.mrb[31].mxu0  ;;  %v4905_v36 = vmul.f32 0.35355338, %v1544_v2  ;;  %v4953_v2 = vpop.permute.xlu0 %1336 }
 0x4a6   :  { %v4955_v3 = vpop.permute.xlu1 %4118 }
 0x4a7   :  { %v1559_v44 = vsel %vm541_vm9, %v4905_v36, -inf }
 0x4a8   :  { %v1549_v4 = vpop.f32.mrb[32].mxu0 }
 0x4a9   :  { %4123 = vrot.lane.b32.xlu1 %v4671_v13, %s4347_s7  ;;  %v3720_v5 = vpop.f32.mrb[33].mxu0  ;;  %v4907_v38 = vmul.f32 0.35355338, %v1549_v4 }
 0x4aa   :  { %1593 = vrot.lane.b32.xlu0 %v4652_v8, %s4347_s7 }
 0x4ab   :  { %v1562_v46 = vsel %vm548_vm10, %v4907_v38, -inf }
 0x4ac   :  { %v1781_v6 = vpop.f32.mrb[34].mxu0 }
 0x4ad   :  { %v3744_v9 = vpop.f32.mrb[35].mxu0  ;;  %v4913_v42 = vmul.f32 0.35355338, %v1781_v6 }
 0x4af   :  { %v1798_v50 = vsel %vm541_vm9, %v4913_v42, -inf }
 0x4b0   :  { %v1786_v10 = vpop.f32.mrb[36].mxu0 }
 0x4b1   :  { %v3747_v12 = vpop.f32.mrb[37].mxu0  ;;  %v4915_v43 = vmul.f32 0.35355338, %v1786_v10 }
 0x4b3   :  { %v1801_v51 = vsel %vm541_vm9, %v4915_v43, -inf }
 0x4b4   :  { %v1791_v14 = vpop.f32.mrb[38].mxu0 }
 0x4b5   :  { %v3750_v17 = vpop.f32.mrb[39].mxu0  ;;  %v4921_v47 = vmul.f32 0.35355338, %v1791_v14 }
 0x4b7   :  { %v1804_v55 = vsel %vm548_vm10, %v4921_v47, -inf }
 0x4b8   :  { %v2035_v19 = vpop.f32.mrb[40].mxu0 }
 0x4b9   :  { %v3774_v22 = vpop.f32.mrb[41].mxu0  ;;  %v4923_v48 = vmul.f32 0.35355338, %v2035_v19 }
 0x4bb   :  { %v2052_v56 = vsel %vm541_vm9, %v4923_v48, -inf }
 0x4bc   :  { %v2040_v23 = vpop.f32.mrb[42].mxu0 }
 0x4bd   :  { %v3777_v24 = vpop.f32.mrb[43].mxu0  ;;  %v4929_v52 = vmul.f32 0.35355338, %v2040_v23 }
 0x4bf   :  { %v2055_v59 = vsel %vm541_vm9, %v4929_v52, -inf }
 0x4c0   :  { %v2045_v26 = vpop.f32.mrb[44].mxu0 }
 0x4c1   :  { %v3780_v27 = vpop.f32.mrb[45].mxu0  ;;  %v4931_v54 = vmul.f32 0.35355338, %v2045_v26 }
 0x4c3   :  { %v2058_v60 = vsel %vm548_vm10, %v4931_v54, -inf }
 0x4c4   :  { %v2289_v30 = vpop.f32.mrb[46].mxu0 }
 0x4c5   :  { %v3804_v31 = vpop.f32.mrb[47].mxu0  ;;  %v4937_v58 = vmul.f32 0.35355338, %v2289_v30 }
 0x4c7   :  { %v2306_v61 = vsel %vm541_vm9, %v4937_v58, -inf }
 0x4c9   :  { %1303 = vmax.xlane.f32.xlu0 %v1302_v35 }
 0x4cd   :  { %1306 = vmax.xlane.f32.xlu1 %v1305_v39  ;;  %1557 = vmax.xlane.f32.xlu0 %v1556_v40 }
 0x4d1   :  { %1560 = vmax.xlane.f32.xlu1 %v1559_v44  ;;  %1563 = vmax.xlane.f32.xlu0 %v1562_v46 }
 0x4d5   :  { %1799 = vmax.xlane.f32.xlu1 %v1798_v50  ;;  %1802 = vmax.xlane.f32.xlu0 %v1801_v51 }
 0x4d9   :  { %1805 = vmax.xlane.f32.xlu1 %v1804_v55  ;;  %2053 = vmax.xlane.f32.xlu0 %v2052_v56 }
 0x4dd   :  { %2056 = vmax.xlane.f32.xlu1 %v2055_v59  ;;  %2059 = vmax.xlane.f32.xlu0 %v2058_v60 }
 0x4e1   :  { %2307 = vmax.xlane.f32.xlu0 %v2306_v61 }
 0x501   :  { %v544_v4 = vpop.xlane.xlu0 %543 }
 0x502   :  { %v552_v5 = vsub.f32 %v4853_v21, %v544_v4 }
 0x504   :  { %v555_v6 = vmul.f32 1.442695, %v552_v5 }
 0x505   :  { %v547_v9 = vpop.xlane.xlu1 %546 }
 0x506   :  { %4152 = vpow2.f32 %v555_v6  ;;  %v553_v10 = vsub.f32 %v4857_v25, %v547_v9 }
 0x508   :  { %v557_v12 = vmul.f32 1.442695, %v553_v10 }
 0x509   :  { %v551_v14 = vpop.xlane.xlu0 %550 }
 0x50a   :  { %4154 = vpow2.f32 %v557_v12  ;;  %v554_v17 = vsub.f32 %v4861_v29, %v551_v14 }
 0x50c   :  { %v559_v19 = vmul.f32 1.442695, %v554_v17 }
 0x50d   :  { %v789_v22 = vpop.xlane.xlu0 %788 }
 0x50e   :  { %4156 = vpow2.f32 %v559_v19  ;;  %v796_v23 = vsub.f32 %v4865_v33, %v789_v22 }
 0x510   :  { %v4961_v24 = vpop.eup %4152  ;;  %v799_v26 = vmul.f32 1.442695, %v796_v23 }
 0x511   :  { %v792_v27 = vpop.xlane.xlu0 %791  ;;  %v561_v21 = vsel %vm541_vm9, %v4961_v24, 0.0 }
 0x512   :  { %4158 = vpow2.f32 %v799_v26  ;;  %v797_v25 = vsub.f32 %v4869_v37, %v792_v27  ;;  %562 = vadd.xlane.f32.xlu1 %v561_v21 }
 0x514   :  { %v4966_v30 = vpop.eup %4154  ;;  %v801_v31 = vmul.f32 1.442695, %v797_v25 }
 0x515   :  { %v795_v29 = vpop.xlane.xlu1 %794  ;;  %v564_v35 = vsel %vm541_vm9, %v4966_v30, 0.0 }
 0x516   :  { %4160 = vpow2.f32 %v801_v31  ;;  %v798_v33 = vsub.f32 %v4873_v41, %v795_v29  ;;  %565 = vadd.xlane.f32.xlu1 %v564_v35 }
 0x518   :  { %v4971_v39 = vpop.eup %4156  ;;  %v803_v40 = vmul.f32 1.442695, %v798_v33 }
 0x519   :  { %v1045_v44 = vpop.xlane.xlu0 %1044  ;;  %v567_v46 = vsel %vm548_vm10, %v4971_v39, 0.0 }
 0x51a   :  { %4162 = vpow2.f32 %v803_v40  ;;  %v1052_v37 = vsub.f32 %v4877_v45, %v1045_v44  ;;  %568 = vadd.xlane.f32.xlu0 %v567_v46 }
 0x51c   :  { %v4976_v50 = vpop.eup %4158  ;;  %v1055_v51 = vmul.f32 1.442695, %v1052_v37 }
 0x51d   :  { %v1048_v55 = vpop.xlane.xlu1 %1047  ;;  %v805_v56 = vsel %vm541_vm9, %v4976_v50, 0.0 }
 0x51e   :  { %4164 = vpow2.f32 %v1055_v51  ;;  %v1053_v41 = vsub.f32 %v4881_v49, %v1048_v55  ;;  %806 = vadd.xlane.f32.xlu1 %v805_v56 }
 0x520   :  { %v4981_v59 = vpop.eup %4160  ;;  %v1057_v60 = vmul.f32 1.442695, %v1053_v41 }
 0x521   :  { %v1051_v61 = vpop.xlane.xlu0 %1050  ;;  %v808_v4 = vsel %vm541_vm9, %v4981_v59, 0.0 }
 0x522   :  { %4166 = vpow2.f32 %v1057_v60  ;;  %v1054_v45 = vsub.f32 %v4885_v53, %v1051_v61  ;;  %809 = vadd.xlane.f32.xlu0 %v808_v4 }
 0x524   :  { %v4986_v5 = vpop.eup %4162  ;;  %v1059_v6 = vmul.f32 1.442695, %v1054_v45 }
 0x525   :  { %v1301_v9 = vpop.xlane.xlu1 %1300  ;;  %v811_v10 = vsel %vm548_vm10, %v4986_v5, 0.0  ;;  %v5011_v27 = vpop.permute.xlu0 %1593 }
 0x526   :  { %4168 = vpow2.f32 %v1059_v6  ;;  %v1308_v49 = vsub.f32 %v4889_v57, %v1301_v9  ;;  %812 = vadd.xlane.f32.xlu0 %v811_v10 }
 0x528   :  { %v4991_v12 = vpop.eup %4164  ;;  %v1311_v14 = vmul.f32 1.442695, %v1308_v49 }
 0x529   :  { %v1061_v17 = vsel %vm541_vm9, %v4991_v12, 0.0  ;;  %v5013_v21 = vpop.permute.xlu1 %4123 }
 0x52a   :  { %4170 = vpow2.f32 %v1311_v14  ;;  %1062 = vadd.xlane.f32.xlu0 %v1061_v17 }
 0x52c   :  { %v4995_v53 = vpop.eup %4166 }
 0x52d   :  { %v1064_v19 = vsel %vm541_vm9, %v4995_v53, 0.0 }
 0x52e   :  { %1065 = vadd.xlane.f32.xlu1 %v1064_v19 }
 0x530   :  { %v4999_v22 = vpop.eup %4168 }
 0x531   :  { %v1067_v57 = vsel %vm548_vm10, %v4999_v22, 0.0 }
 0x532   :  { %1068 = vadd.xlane.f32.xlu0 %v1067_v57 }
 0x534   :  { %v5003_v23 = vpop.eup %4170 }
 0x535   :  { %v1317_v26 = vsel %vm541_vm9, %v5003_v23, 0.0 }
 0x536   :  { %1318 = vadd.xlane.f32.xlu1 %v1317_v26 }
 0x547   :  { %4128 = vrot.lane.b32.xlu1 %v4671_v13, %s4348_s3 }
 0x548   :  { %1835 = vrot.lane.b32.xlu0 %v4652_v8, %s4348_s3 }
 0x556   :  { %v1304_v25 = vpop.xlane.xlu0 %1303 }
 0x557   :  { %v1309_v31 = vsub.f32 %v4897_v28, %v1304_v25 }
 0x559   :  { %v1313_v29 = vmul.f32 1.442695, %v1309_v31 }
 0x55a   :  { %v1307_v35 = vpop.xlane.xlu1 %1306  ;;  %v1558_v33 = vpop.xlane.xlu0 %1557 }
 0x55b   :  { %4172 = vpow2.f32 %v1313_v29  ;;  %v1310_v40 = vsub.f32 %v4899_v32, %v1307_v35  ;;  %v1565_v44 = vsub.f32 %v4901_v34, %v1558_v33 }
 0x55d   :  { %v1315_v46 = vmul.f32 1.442695, %v1310_v40  ;;  %v1568_v37 = vmul.f32 1.442695, %v1565_v44 }
 0x55e   :  { %v1561_v51 = vpop.xlane.xlu1 %1560  ;;  %v1564_v55 = vpop.xlane.xlu0 %1563 }
 0x55f   :  { %4174 = vpow2.f32 %v1315_v46  ;;  %v1566_v56 = vsub.f32 %v4905_v36, %v1561_v51  ;;  %v1567_v41 = vsub.f32 %v4907_v38, %v1564_v55 }
 0x560   :  { %4176 = vpow2.f32 %v1568_v37 }
 0x561   :  { %v1570_v60 = vmul.f32 1.442695, %v1566_v56  ;;  %v1572_v28 = vmul.f32 1.442695, %v1567_v41 }
 0x562   :  { %v1800_v61 = vpop.xlane.xlu1 %1799  ;;  %v1803_v4 = vpop.xlane.xlu0 %1802 }
 0x563   :  { %4178 = vpow2.f32 %v1570_v60  ;;  %v1807_v45 = vsub.f32 %v4913_v42, %v1800_v61  ;;  %v1808_v32 = vsub.f32 %v4915_v43, %v1803_v4 }
 0x564   :  { %4180 = vpow2.f32 %v1572_v28 }
 0x565   :  { %v5022_v34 = vpop.eup %4172  ;;  %v1810_v6 = vmul.f32 1.442695, %v1807_v45  ;;  %v1812_v9 = vmul.f32 1.442695, %v1808_v32 }
 0x566   :  { %v1806_v10 = vpop.xlane.xlu1 %1805  ;;  %v2054_v49 = vpop.xlane.xlu0 %2053  ;;  %v1320_v36 = vsel %vm541_vm9, %v5022_v34, 0.0 }
 0x567   :  { %4182 = vpow2.f32 %v1810_v6  ;;  %v1809_v38 = vsub.f32 %v4921_v47, %v1806_v10  ;;  %v2061_v14 = vsub.f32 %v4923_v48, %v2054_v49  ;;  %1321 = vadd.xlane.f32.xlu0 %v1320_v36 }
 0x568   :  { %4184 = vpow2.f32 %v1812_v9 }
 0x569   :  { %v5028_v17 = vpop.eup %4174  ;;  %v1814_v42 = vmul.f32 1.442695, %v1809_v38  ;;  %v2064_v19 = vmul.f32 1.442695, %v2061_v14  ;;  %v4111_v38 = vunpack.i.h.bf16 %v4945_v62  ;;  %v4110_v14 = vunpack.i.l.bf16 %v4945_v62 }
 0x56a   :  { %v5030_v43 = vpop.eup %4176  ;;  %v2057_v57 = vpop.xlane.xlu1 %2056  ;;  %v1323_v25 = vsel %vm548_vm10, %v5028_v17, 0.0 }
 0x56b   :  { %v2060_v26 = vpop.xlane.xlu0 %2059  ;;  %4186 = vpow2.f32 %v1814_v42  ;;  %v2062_v31 = vsub.f32 %v4929_v52, %v2057_v57  ;;  %1324 = vadd.xlane.f32.xlu1 %v1323_v25  ;;  %v1574_v48 = vsel %vm541_vm9, %v5030_v43, 0.0 }
 0x56c   :  { %v2063_v47 = vsub.f32 %v4931_v54, %v2060_v26  ;;  %1575 = vadd.xlane.f32.xlu0 %v1574_v48  ;;  %4188 = vpow2.f32 %v2064_v19 }
 0x56d   :  { %v5038_v29 = vpop.eup %4178  ;;  %v2066_v33 = vmul.f32 1.442695, %v2062_v31 }
 0x56e   :  { %v2068_v35 = vmul.f32 1.442695, %v2063_v47  ;;  %v1577_v40 = vsel %vm541_vm9, %v5038_v29, 0.0  ;;  %v5042_v44 = vpop.eup %4180  ;;  %v4116_v47 = vunpack.i.h.bf16 %v4949_v0 }
 0x56f   :  { %v1580_v46 = vsel %vm548_vm10, %v5042_v44, 0.0  ;;  %v2308_v32 = vpop.xlane.xlu0 %2307 }
 0x570   :  { %4190 = vpow2.f32 %v2068_v35  ;;  %1578 = vadd.xlane.f32.xlu0 %v1577_v40  ;;  %v2315_v6 = vsub.f32 %v4937_v58, %v2308_v32 }
 0x571   :  { %v5044_v52 = vpop.eup %4182  ;;  %4192 = vpow2.f32 %v2066_v33 }
 0x572   :  { %v1816_v54 = vsel %vm541_vm9, %v5044_v52, 0.0  ;;  %v5050_v37 = vpop.eup %4184  ;;  %v2318_v10 = vmul.f32 1.442695, %v2315_v6  ;;  %v4126_v6 = vunpack.i.h.bf16 %v5013_v21 }
 0x573   :  { %1817 = vadd.xlane.f32.xlu1 %v1816_v54  ;;  %v1819_v56 = vsel %vm541_vm9, %v5050_v37, 0.0 }
 0x574   :  { %1581 = vadd.xlane.f32.xlu0 %v1580_v46 }
 0x575   :  { %v5052_v51 = vpop.eup %4186 }
 0x576   :  { %v1822_v55 = vsel %vm548_vm10, %v5052_v51, 0.0  ;;  %v5058_v41 = vpop.eup %4188 }
 0x577   :  { %1823 = vadd.xlane.f32.xlu1 %v1822_v55  ;;  %v2070_v61 = vsel %vm541_vm9, %v5058_v41, 0.0 }
 0x578   :  { %1820 = vadd.xlane.f32.xlu0 %v1819_v56  ;;  %v4121_v56 = vunpack.i.h.bf16 %v4955_v3 }
 0x57a   :  { %v5060_v60 = vpop.eup %4190 }
 0x57b   :  { %v2076_v28 = vsel %vm548_vm10, %v5060_v60, 0.0  ;;  %v5066_v4 = vpop.eup %4192 }
 0x57c   :  { %2077 = vadd.xlane.f32.xlu1 %v2076_v28  ;;  %2071 = vadd.xlane.f32.xlu0 %v2070_v61  ;;  %v2073_v45 = vsel %vm541_vm9, %v5066_v4, 0.0  ;;  %v4120_v28 = vunpack.i.l.bf16 %v4955_v3 }
 0x580   :  { %2074 = vadd.xlane.f32.xlu0 %v2073_v45  ;;  %v3973_v45 = vpack.c.bf16 %v4121_v56, %v4120_v28 }
 0x58d   :  { %2089 = vrot.lane.b32.xlu1 %v4652_v8, %s4349_s26 }
 0x591   :  { %4138 = vrot.lane.b32.xlu1 %v4671_v13, %s4350_s29 }
 0x595   :  { %2203 = vrot.lane.b32.xlu1 %v4652_v8, %s4346_s30 }
 0x596   :  { %4133 = vrot.lane.b32.xlu0 %v4671_v13, %s4349_s26  ;;  %s5640_s26 = sld [smem:[#allocation18_spill]] }
 0x599   :  { %2343 = vrot.lane.b32.xlu1 %v4652_v8, %s4350_s29  ;;  %v3959_v8 = vpack.c.bf16 %v4111_v38, %v4110_v14 }
 0x59f   :  { %v563_v9 = vpop.xlane.xlu1 %562 }
 0x5a0   :  { %4194 = vrcp.f32 %v563_v9 }
 0x5a3   :  { %v566_v49 = vpop.xlane.xlu1 %565 }
 0x5a4   :  { %4196 = vrcp.f32 %v566_v49 }
 0x5a5   :  { %4198 = vpow2.f32 %v2318_v10 }
 0x5a7   :  { %v569_v36 = vpop.xlane.xlu0 %568 }
 0x5a8   :  { %4200 = vrcp.f32 %v569_v36 }
 0x5aa   :  { %v4195_v42 = vpop.eup %4194 }
 0x5ab   :  { %v571_v13 = vmul.f32 %v4195_v42, %v4961_v24  ;;  %v807_v19 = vpop.xlane.xlu1 %806 }
 0x5ac   :  { %4202 = vrcp.f32 %v807_v19 }
 0x5ad   :  { %3608 = vmatmul.mubr.msk.f32.vlgmr.msra.gmra.mrb[10].mxu1 %vm541_vm9, %v571_v13 }
 0x5ae   :  { %v4197_v58 = vpop.eup %4196  ;;  %3960 = vmatpush3.bf16.msra.mxu1 %v3959_v8  ;;  %3610 = vmatprep.mubr.msk.f32.mxu1 %vm4338_vm5, %v4339_v16 }
 0x5af   :  { %v810_v57 = vpop.xlane.xlu0 %809  ;;  %3635 = vmatprep.subr.mxu1 %v4339_v16  ;;  %v573_v26 = vmul.f32 %v4197_v58, %v4966_v30  ;;  %v5089_v62 = vpop.eup %4198  ;;  %v4115_v30 = vunpack.i.l.bf16 %v4949_v0 }
 0x5b0   :  { %4204 = vrcp.f32 %v810_v57  ;;  %v2324_v48 = vsel %vm541_vm9, %v5089_v62, 0.0 }
 0x5b1   :  { %3611 = vmatmul.mubr.msk.f32.gmra.mrb[12].mxu1 %vm541_vm9, %v573_v26  ;;  %v3966_v33 = vpack.c.bf16 %v4116_v47, %v4115_v30 }
 0x5b2   :  { %v4201_v24 = vpop.eup %4200  ;;  %3636 = vmatpush3.msk.msra.mxu1 %vm593_vm8, %v4947_v63  ;;  %3613 = vmatprep.mubr.msk.f32.mxu1 %vm4338_vm5, %v4339_v16 }
 0x5b3   :  { %v813_v25 = vpop.xlane.xlu0 %812  ;;  %v575_v31 = vmul.f32 %v4201_v24, %v4971_v39  ;;  %3965 = vmatprep.subr.bf16.mxu1 %v4337_v15 }
 0x5b4   :  { %4206 = vrcp.f32 %v813_v25 }
 0x5b5   :  { %2325 = vadd.xlane.f32.xlu0 %v2324_v48  ;;  %3614 = vmatmul.mubr.msk.f32.gmra.mrb[14].mxu1 %vm541_vm9, %v575_v31 }
 0x5b6   :  { %v4203_v63 = vpop.eup %4202  ;;  %3637 = vmatprep.mubr.msk.f32.mxu1 %vm4338_vm5, %v4339_v16 }
 0x5b7   :  { %v815_v35 = vmul.f32 %v4203_v63, %v4976_v50  ;;  %v1063_v39 = vpop.xlane.xlu0 %1062 }
 0x5b8   :  { %4208 = vrcp.f32 %v1063_v39 }
 0x5b9   :  { %3638 = vmatmul.mubr.msk.f32.vlgmr.msra.gmra.mrb[16].mxu1 %vm541_vm9, %v815_v35 }
 0x5ba   :  { %v4205_v40 = vpop.eup %4204  ;;  %3967 = vmatpush3.bf16.msra.mxu1 %v3966_v33  ;;  %3640 = vmatprep.mubr.msk.f32.mxu1 %vm4338_vm5, %v4339_v16 }
 0x5bb   :  { %v1066_v0 = vpop.xlane.xlu1 %1065  ;;  %3665 = vmatprep.subr.mxu1 %v4339_v16  ;;  %v817_v54 = vmul.f32 %v4205_v40, %v4981_v59 }
 0x5bc   :  { %4210 = vrcp.f32 %v1066_v0 }
 0x5bd   :  { %3641 = vmatmul.mubr.msk.f32.gmra.mrb[18].mxu1 %vm541_vm9, %v817_v54 }
 0x5be   :  { %v4207_v46 = vpop.eup %4206  ;;  %3666 = vmatpush3.msk.msra.mxu1 %vm593_vm8, %v4951_v1  ;;  %3643 = vmatprep.mubr.msk.f32.mxu1 %vm4338_vm5, %v4339_v16 }
 0x5bf   :  { %v1069_v50 = vpop.xlane.xlu0 %1068  ;;  %v819_v55 = vmul.f32 %v4207_v46, %v4986_v5  ;;  %3972 = vmatprep.subr.bf16.mxu1 %v4337_v15 }
 0x5c0   :  { %4212 = vrcp.f32 %v1069_v50 }
 0x5c1   :  { %3644 = vmatmul.mubr.msk.f32.gmra.mrb[20].mxu1 %vm541_vm9, %v819_v55 }
 0x5c2   :  { %v4209_v59 = vpop.eup %4208  ;;  %3667 = vmatprep.mubr.msk.f32.mxu1 %vm4338_vm5, %v4339_v16 }
 0x5c3   :  { %v1071_v1 = vmul.f32 %v4209_v59, %v4991_v12  ;;  %v1319_v61 = vpop.xlane.xlu1 %1318 }
 0x5c4   :  { %4214 = vrcp.f32 %v1319_v61 }
 0x5c5   :  { %3668 = vmatmul.mubr.msk.f32.vlgmr.msra.gmra.mrb[22].mxu1 %vm541_vm9, %v1071_v1 }
 0x5c6   :  { %v4211_v5 = vpop.eup %4210  ;;  %3974 = vmatpush3.bf16.msra.mxu1 %v3973_v45  ;;  %3670 = vmatprep.mubr.msk.f32.mxu1 %vm4338_vm5, %v4339_v16 }
 0x5c7   :  { %3695 = vmatprep.subr.mxu1 %v4339_v16  ;;  %v1073_v3 = vmul.f32 %v4211_v5, %v4995_v53  ;;  %v4125_v53 = vunpack.i.l.bf16 %v5013_v21 }
 0x5c9   :  { %3671 = vmatmul.mubr.msk.f32.gmra.mrb[24].mxu1 %vm541_vm9, %v1073_v3  ;;  %v3980_v10 = vpack.c.bf16 %v4126_v6, %v4125_v53 }
 0x5ca   :  { %v4213_v32 = vpop.eup %4212  ;;  %3696 = vmatpush3.msk.msra.mxu1 %vm593_vm8, %v4953_v2  ;;  %3673 = vmatprep.mubr.msk.f32.mxu1 %vm4338_vm5, %v4339_v16 }
 0x5cb   :  { %2201 = vrot.lane.b32.xlu0 %v4661_v11, %s4346_s30  ;;  %v1075_v12 = vmul.f32 %v4213_v32, %v4999_v22  ;;  %3979 = vmatprep.subr.bf16.mxu1 %v4337_v15  ;;  %v1836_v11 = vpop.permute.xlu0 %1835  ;;  %v4129_v22 = vpop.permute.xlu1 %4128  ;;  %s4353_s30 = smov 24  }
 0x5cc   :  { %v4131_v58 = vunpack.i.h.bf16 %v4129_v22  ;;  %v4130_v57 = vunpack.i.l.bf16 %v4129_v22 }
 0x5cd   :  { %3674 = vmatmul.mubr.msk.f32.gmra.mrb[26].mxu1 %vm541_vm9, %v1075_v12 }
 0x5ce   :  { %v4215_v9 = vpop.eup %4214  ;;  %3697 = vmatprep.mubr.msk.f32.mxu1 %vm4338_vm5, %v4339_v16  ;;  %v3987_v25 = vpack.c.bf16 %v4131_v58, %v4130_v57 }
 0x5cf   :  { %v1327_v2 = vmul.f32 %v4215_v9, %v5003_v23 }
 0x5d1   :  { %3698 = vmatmul.mubr.msk.f32.vlgmr.msra.gmra.mrb[28].mxu1 %vm541_vm9, %v1327_v2 }
 0x5d2   :  { %3981 = vmatpush3.bf16.msra.mxu1 %v3980_v10  ;;  %3700 = vmatprep.mubr.msk.f32.mxu1 %vm4338_vm5, %v4339_v16 }
 0x5d3   :  { %3725 = vmatprep.subr.mxu1 %v4339_v16 }
 0x5d6   :  { %3726 = vmatpush3.msk.msra.mxu1 %vm593_vm8, %v5011_v27 }
 0x5d7   :  { %3986 = vmatprep.subr.bf16.mxu1 %v4337_v15 }
 0x5f4   :  { %v1322_v21 = vpop.xlane.xlu0 %1321 }
 0x5f5   :  { %4216 = vrcp.f32 %v1322_v21 }
 0x5f8   :  { %v1325_v49 = vpop.xlane.xlu1 %1324 }
 0x5f9   :  { %4218 = vrcp.f32 %v1325_v49  ;;  %v1576_v23 = vpop.xlane.xlu0 %1575 }
 0x5fa   :  { %4220 = vrcp.f32 %v1576_v23  ;;  %v2458_v23 = vld [vmem:[%s5639_s27] sm:$0xff] }
 0x5fd   :  { %v1579_v36 = vpop.xlane.xlu0 %1578 }
 0x5fe   :  { %4222 = vrcp.f32 %v1579_v36  ;;  %v2459_v36 = vld [vmem:[%s5639_s27 + $0x8] sm:$0xff] }
 0x5ff   :  { %v4217_v38 = vpop.eup %4216 }
 0x600   :  { %v1329_v14 = vmul.f32 %v4217_v38, %v5022_v34  ;;  %v1818_v27 = vpop.xlane.xlu1 %1817 }
 0x601   :  { %v1582_v42 = vpop.xlane.xlu0 %1581 }
 0x602   :  { %3701 = vmatmul.mubr.msk.f32.gmra.mrb[30].mxu1 %vm541_vm9, %v1329_v14  ;;  %4224 = vrcp.f32 %v1582_v42  ;;  %v4004_v14 = vpack.c.bf16 %v2459_v36, %v2458_v23  ;;  %v2460_v42 = vld [vmem:[%s5639_s27 + $0x10] sm:$0xff] }
 0x603   :  { %v4219_v13 = vpop.eup %4218  ;;  %3703 = vmatprep.mubr.msk.f32.mxu1 %vm4338_vm5, %v4339_v16  ;;  %4226 = vrcp.f32 %v1818_v27 }
 0x604   :  { %v1331_v19 = vmul.f32 %v4219_v13, %v5028_v17  ;;  %v4221_v8 = vpop.eup %4220  ;;  %v1824_v17 = vpop.xlane.xlu1 %1823  ;;  %4005 = vmatpush3.bf16.msra.mxu0 %v4004_v14  ;;  %v2461_v13 = vld [vmem:[%s5639_s27 + $0x18] sm:$0xff]  ;;  %v5288_v14 = vld [vmem:[%s5640_s26] ss:$0 sm:$0xff] }
 0x605   :  { %v1821_v26 = vpop.xlane.xlu0 %1820  ;;  %v1584_v34 = vmul.f32 %v4221_v8, %v5030_v43  ;;  %4006 = vmatprep.subr.bf16.mxu0 %v4337_v15 }
 0x606   :  { %3704 = vmatmul.mubr.msk.f32.gmra.mrb[32].mxu1 %vm541_vm9, %v1331_v19  ;;  %4228 = vrcp.f32 %v1821_v26  ;;  %v4007_v19 = vpack.c.bf16 %v2461_v13, %v2460_v42 }
 0x607   :  { %3727 = vmatprep.mubr.msk.f32.mxu1 %vm4338_vm5, %v4339_v16  ;;  %4230 = vrcp.f32 %v1824_v17 }
 0x608   :  { %v4223_v24 = vpop.eup %4222  ;;  %4008 = vmatpush3.bf16.msra.mxu0 %v4007_v19  ;;  %v4284_v19 = vld [vmem:[#allocation2] sm:$0xff] }
 0x609   :  { %v2072_v31 = vpop.xlane.xlu0 %2071  ;;  %v1586_v47 = vmul.f32 %v4223_v24, %v5038_v29  ;;  %v2078_v40 = vpop.xlane.xlu1 %2077  ;;  %4015 = vmatprep.subr.bf16.mxu0 %v4337_v15 }
 0x60a   :  { %3728 = vmatmul.mubr.msk.f32.vlgmr.msra.gmra.mrb[34].mxu1 %vm541_vm9, %v1584_v34  ;;  %4232 = vrcp.f32 %v2072_v31 }
 0x60b   :  { %3988 = vmatpush3.bf16.msra.mxu1 %v3987_v25  ;;  %3730 = vmatprep.mubr.msk.f32.mxu1 %vm4338_vm5, %v4339_v16 }
 0x60c   :  { %3755 = vmatprep.subr.mxu1 %v4339_v16  ;;  %v4225_v30 = vpop.eup %4224 }
 0x60d   :  { %v2075_v48 = vpop.xlane.xlu0 %2074  ;;  %v1588_v43 = vmul.f32 %v4225_v30, %v5042_v44  ;;  %v4227_v63 = vpop.eup %4226 }
 0x60e   :  { %3731 = vmatmul.mubr.msk.f32.gmra.mrb[36].mxu1 %vm541_vm9, %v1586_v47  ;;  %v1826_v29 = vmul.f32 %v4227_v63, %v5044_v52  ;;  %4234 = vrcp.f32 %v2075_v48  ;;  %v2090_v50 = vpop.permute.xlu1 %2089 }
 0x60f   :  { %3756 = vmatpush3.msk.msra.mxu1 %vm593_vm8, %v1836_v11  ;;  %3733 = vmatprep.mubr.msk.f32.mxu1 %vm4338_vm5, %v4339_v16  ;;  %4236 = vrcp.f32 %v2078_v40 }
 0x610   :  { %3993 = vmatprep.subr.bf16.mxu1 %v4337_v15  ;;  %v4229_v54 = vpop.eup %4228 }
 0x611   :  { %v4134_v35 = vpop.permute.xlu0 %4133  ;;  %v1828_v44 = vmul.f32 %v4229_v54, %v5050_v37  ;;  %v4231_v46 = vpop.eup %4230 }
 0x612   :  { %v4136_v39 = vunpack.i.h.bf16 %v4134_v35  ;;  %v4135_v33 = vunpack.i.l.bf16 %v4134_v35  ;;  %3734 = vmatmul.mubr.msk.f32.gmra.mrb[38].mxu1 %vm541_vm9, %v1588_v43  ;;  %v1830_v52 = vmul.f32 %v4231_v46, %v5052_v51  ;;  %v4139_v59 = vpop.permute.xlu1 %4138 }
 0x613   :  { %3757 = vmatprep.mubr.msk.f32.mxu1 %vm4338_vm5, %v4339_v16  ;;  %v4141_v1 = vunpack.i.h.bf16 %v4139_v59  ;;  %v4140_v61 = vunpack.i.l.bf16 %v4139_v59 }
 0x614   :  { %v3994_v0 = vpack.c.bf16 %v4136_v39, %v4135_v33  ;;  %v4233_v55 = vpop.eup %4232 }
 0x615   :  { %v2080_v37 = vmul.f32 %v4233_v55, %v5058_v41 }
 0x616   :  { %3758 = vmatmul.mubr.msk.f32.vlgmr.msra.gmra.mrb[40].mxu1 %vm541_vm9, %v1826_v29  ;;  %v2204_v20 = vpop.permute.xlu1 %2203 }
 0x617   :  { %3995 = vmatpush3.bf16.msra.mxu1 %v3994_v0  ;;  %3760 = vmatprep.mubr.msk.f32.mxu1 %vm4338_vm5, %v4339_v16 }
 0x618   :  { %3785 = vmatprep.subr.mxu1 %v4339_v16  ;;  %v4235_v56 = vpop.eup %4234 }
 0x619   :  { %v2082_v51 = vmul.f32 %v4235_v56, %v5066_v4  ;;  %v4237_v28 = vpop.eup %4236 }
 0x61a   :  { %3761 = vmatmul.mubr.msk.f32.gmra.mrb[42].mxu1 %vm541_vm9, %v1828_v44  ;;  %v2084_v41 = vmul.f32 %v4237_v28, %v5060_v60  ;;  %v2344_v60 = vpop.permute.xlu1 %2343 }
 0x61b   :  { %3786 = vmatpush3.msk.msra.mxu1 %vm593_vm8, %v2090_v50  ;;  %3763 = vmatprep.mubr.msk.f32.mxu1 %vm4338_vm5, %v4339_v16 }
 0x61c   :  { %4039 = vmatprep.subr.bf16.mxu1 %v4337_v15 }
 0x61e   :  { %3764 = vmatmul.mubr.msk.f32.gmra.mrb[44].mxu1 %vm541_vm9, %v1830_v52 }
 0x61f   :  { %3787 = vmatprep.mubr.msk.f32.mxu1 %vm4338_vm5, %v4339_v16 }
 0x622   :  { %3788 = vmatmul.mubr.msk.f32.vlgmr.msra.gmra.mrb[46].mxu1 %vm541_vm9, %v2080_v37 }
 0x623   :  { %4041 = vmatpush3.bf16.xpose.msk.msra.mxu1 %vm4728_vm7, %v4832_v18  ;;  %3790 = vmatprep.mubr.msk.f32.mxu1 %vm4338_vm5, %v4339_v16  ;;  %v4001_v18 = vpack.c.bf16 %v4141_v1, %v4140_v61 }
 0x624   :  { %4040 = vmatprep.subr.mxu1 %v4339_v16 }
 0x626   :  { %3791 = vmatmul.mubr.msk.f32.gmra.mrb[48].mxu1 %vm541_vm9, %v2082_v51 }
 0x627   :  { %3793 = vmatprep.mubr.msk.f32.mxu1 %vm4338_vm5, %v4339_v16 }
 0x62a   :  { %3794 = vmatmul.mubr.msk.f32.gmra.mrb[50].mxu1 %vm541_vm9, %v2084_v41 }
 0x62b   :  { %4042 = vmatpush3.xpose.msk.msra.mxu1 %vm445_vm6, %v4807_v7  ;;  %3808 = vmatprep.mubr.msk.f32.mxu1 %vm4338_vm5, %v4339_v16 }
 0x62c   :  { %4000 = vmatprep.subr.bf16.mxu1 %v4337_v15 }
 0x62e   :  { %3809 = vmatmul.mubr.msk.f32.vlgmr.msra.gmra.mrb[52].mxu1 %vm445_vm6, %v2204_v20 }
 0x62f   :  { %4002 = vmatpush3.bf16.msra.mxu1 %v4001_v18  ;;  %3817 = vmatprep.mubr.msk.f32.mxu1 %vm4338_vm5, %v4339_v16 }
 0x630   :  { %3815 = vmatprep.subr.mxu1 %v4339_v16 }
 0x633   :  { %3816 = vmatpush3.msk.msra.mxu1 %vm593_vm8, %v2344_v60 }
 0x634   :  { %4009 = vmatprep.subr.bf16.mxu1 %v4337_v15 }
 0x642   :  { %v2326_v7 = vpop.xlane.xlu0 %2325 }
 0x643   :  { %4238 = vrcp.f32 %v2326_v7 }
 0x646   :  { %v2202_v4 = vpop.permute.xlu0 %2201 }
 0x647   :  { %3806 = vmatmul.mubr.msk.f32.gmra.mrb[48].mxu0 %vm445_vm6, %v2202_v4 }
 0x648   :  { %3834 = vmatprep.mubr.msk.f32.mxu0 %vm4338_vm5, %v4339_v16 }
 0x64d   :  { %v4239_v45 = vpop.eup %4238 }
 0x64e   :  { %v2334_v5 = vmul.f32 %v4239_v45, %v5089_v62 }
 0x650   :  { %3818 = vmatmul.mubr.msk.f32.vlgmr.msra.gmra.mrb[54].mxu1 %vm541_vm9, %v2334_v5 }
 0x651   :  { %3820 = vmatprep.mubr.msk.f32.mxu1 %vm4338_vm5, %v4339_v16 }
 0x680   :  { %v662_v3 = vpop.f32.mrb[10].mxu1 }
 0x681   :  { %676 = vst.msk [vmem:[#allocation3] sm:$0xff] %vm445_vm6, %v662_v3  ;;  %v3609_v32 = vpop.f32.mrb[11].mxu1 }
 0x684   :  { %v667_v12 = vpop.f32.mrb[12].mxu1 }
 0x685   :  { %677 = vst.msk [vmem:[#allocation3 + $0x8] sm:$0xff] %vm445_vm6, %v667_v12  ;;  %v3612_v6 = vpop.f32.mrb[13].mxu1 }
 0x688   :  { %v672_v53 = vpop.f32.mrb[14].mxu1 }
 0x689   :  { %679 = vst.msk [vmem:[#allocation3 + $0x10] sm:$0x1] %vm678_vm11, %v672_v53  ;;  %v3615_v9 = vpop.f32.mrb[15].mxu1 }
 0x68c   :  { %v905_v2 = vpop.f32.mrb[16].mxu1 }
 0x68d   :  { %922 = vrot.lane.b32.xlu1 %v905_v2, %s4351_s1  ;;  %v3639_v62 = vpop.f32.mrb[17].mxu1 }
 0x690   :  { %v910_v10 = vpop.f32.mrb[18].mxu1 }
 0x691   :  { %924 = vrot.lane.b32.xlu1 %v910_v10, %s4351_s1  ;;  %v3642_v11 = vpop.f32.mrb[19].mxu1 }
 0x694   :  { %v915_v22 = vpop.f32.mrb[20].mxu1 }
 0x695   :  { %926 = vrot.lane.b32.xlu0 %v915_v22, %s4351_s1  ;;  %v3645_v21 = vpop.f32.mrb[21].mxu1 }
 0x698   :  { %v1161_v49 = vpop.f32.mrb[22].mxu1 }
 0x699   :  { %1178 = vrot.lane.b32.xlu1 %v1161_v49, %s4352_s28  ;;  %v3669_v38 = vpop.f32.mrb[23].mxu1 }
 0x69c   :  { %v1166_v27 = vpop.f32.mrb[24].mxu1 }
 0x69d   :  { %1180 = vrot.lane.b32.xlu1 %v1166_v27, %s4352_s28  ;;  %v3672_v8 = vpop.f32.mrb[25].mxu1 }
 0x6a0   :  { %v1171_v58 = vpop.f32.mrb[26].mxu1 }
 0x6a1   :  { %1182 = vrot.lane.b32.xlu0 %v1171_v58, %s4352_s28  ;;  %v3675_v57 = vpop.f32.mrb[27].mxu1 }
 0x6a4   :  { %v1417_v26 = vpop.f32.mrb[28].mxu1 }
 0x6a5   :  { %1434 = vrot.lane.b32.xlu1 %v1417_v26, %s4353_s30  ;;  %v3699_v34 = vpop.f32.mrb[29].mxu1 }
 0x6d5   :  { %v1422_v24 = vpop.f32.mrb[30].mxu1 }
 0x6d6   :  { %1436 = vrot.lane.b32.xlu1 %v1422_v24, %s4353_s30  ;;  %v3702_v25 = vpop.f32.mrb[31].mxu1  ;;  %v4285_v24 = vld [vmem:[#allocation2 + $0x8] sm:$0xff] }
 0x6d9   :  { %v1427_v31 = vpop.f32.mrb[32].mxu1 }
 0x6da   :  { %1438 = vrot.lane.b32.xlu0 %v1427_v31, %s4353_s30  ;;  %v3705_v17 = vpop.f32.mrb[33].mxu1 }
 0x6dd   :  { %v1674_v47 = vpop.f32.mrb[34].mxu1 }
 0x6de   :  { %1688 = vst.msk [vmem:[#allocation3 + $0x11] sm:$0xff] %vm445_vm6, %v1674_v47  ;;  %v3729_v30 = vpop.f32.mrb[35].mxu1 }
 0x6e1   :  { %v1679_v48 = vpop.f32.mrb[36].mxu1 }
 0x6e2   :  { %1689 = vst.msk [vmem:[#allocation3 + $0x19] sm:$0xff] %vm445_vm6, %v1679_v48  ;;  %v3732_v43 = vpop.f32.mrb[37].mxu1 }
 0x6e5   :  { %v1684_v63 = vpop.f32.mrb[38].mxu1 }
 0x6e6   :  { %1690 = vst.msk [vmem:[#allocation3 + $0x21] sm:$0x1] %vm678_vm11, %v1684_v63  ;;  %v3735_v35 = vpop.f32.mrb[39].mxu1 }
 0x6e9   :  { %v1916_v39 = vpop.f32.mrb[40].mxu1 }
 0x6ea   :  { %1933 = vrot.lane.b32.xlu1 %v1916_v39, %s4351_s1  ;;  %v3759_v33 = vpop.f32.mrb[41].mxu1 }
 0x6ed   :  { %v5251_v29 = vpop.f32.mrb[42].mxu1 }
 0x6ee   :  { %v3762_v40 = vpop.f32.mrb[43].mxu1 }
 0x6ef   :  { %v4286_v40 = vld [vmem:[#allocation2 + $0x10] sm:$0xff] }
 0x6f1   :  { %v5253_v0 = vpop.f32.mrb[44].mxu1 }
 0x6f2   :  { %v3765_v54 = vpop.f32.mrb[45].mxu1 }
 0x6f5   :  { %v2170_v44 = vpop.f32.mrb[46].mxu1 }
 0x6f6   :  { %2187 = vrot.lane.b32.xlu1 %v2170_v44, %s4352_s28  ;;  %v3789_v46 = vpop.f32.mrb[47].mxu1 }
 0x6f9   :  { %v5256_v50 = vpop.f32.mrb[48].mxu1 }
 0x6fa   :  { %v3792_v52 = vpop.f32.mrb[49].mxu1 }
 0x6fd   :  { %v5258_v55 = vpop.f32.mrb[50].mxu1 }
 0x6fe   :  { %v3795_v37 = vpop.f32.mrb[51].mxu1 }
 0x6ff   :  { %v923_v56 = vpop.permute.xlu1 %922 }
 0x700   :  { %932 = vst.msk [vmem:[#allocation3] sm:$0xff] %vm931_vm12, %v923_v56 }
 0x701   :  { %v2299_v51 = vpop.f32.mrb[52].mxu1 }
 0x702   :  { %v3810_v28 = vpop.f32.mrb[53].mxu1  ;;  %v2305_v12 = vmul.f32 0.35355338, %v2299_v51 }
 0x703   :  { %v925_v59 = vpop.permute.xlu1 %924 }
 0x704   :  { %933 = vst.msk [vmem:[#allocation3 + $0x8] sm:$0xff] %vm931_vm12, %v925_v59  ;;  %v2312_v6 = vsel %vm548_vm10, %v2305_v12, -inf }
 0x707   :  { %v927_v41 = vpop.permute.xlu0 %926 }
 0x708   :  { %935 = vst.msk [vmem:[#allocation3 + $0x10] sm:$0x1] %vm934_vm13, %v927_v41  ;;  %v2668_v41 = vld [vmem:[%s5601_s13] sm:$0xff] }
 0x70b   :  { %v1179_v1 = vpop.permute.xlu1 %1178 }
 0x70c   :  { %1188 = vst.msk [vmem:[#allocation3] sm:$0xff] %vm1187_vm14, %v1179_v1  ;;  %v2669_v1 = vld [vmem:[%s5601_s13 + $0x8] sm:$0xff] }
 0x70f   :  { %v1181_v61 = vpop.permute.xlu1 %1180 }
 0x710   :  { %1189 = vst.msk [vmem:[#allocation3 + $0x8] sm:$0xff] %vm1187_vm14, %v1181_v61  ;;  %v4010_v61 = vpack.c.bf16 %v2669_v1, %v2668_v41  ;;  %v2835_v1 = vld [vmem:[%s5603_s15 + $0x30] sm:$0xff] }
 0x712   :  { %4011 = vmatpush3.bf16.msra.mxu1 %v4010_v61  ;;  %v2836_v61 = vld [vmem:[%s5603_s15 + $0x38] sm:$0xff] }
 0x713   :  { %v1183_v20 = vpop.permute.xlu0 %1182  ;;  %4012 = vmatprep.subr.bf16.mxu1 %v4337_v15 }
 0x714   :  { %1191 = vst.msk [vmem:[#allocation3 + $0x10] sm:$0x1] %vm1190_vm15, %v1183_v20  ;;  %v2670_v20 = vld [vmem:[%s5601_s13 + $0x10] sm:$0xff] }
 0x717   :  { %v1435_v18 = vpop.permute.xlu1 %1434 }
 0x718   :  { %1444 = vst.msk [vmem:[#allocation3] sm:$0xff] %vm1443_vm1, %v1435_v18  ;;  %v2671_v18 = vld [vmem:[%s5601_s13 + $0x18] sm:$0xff] }
 0x71a   :  { %v2294_v60 = vpop.f32.mrb[48].mxu0 }
 0x71b   :  { %v2304_v7 = vmul.f32 0.35355338, %v2294_v60  ;;  %v3807_v4 = vpop.f32.mrb[49].mxu0  ;;  %v4013_v60 = vpack.c.bf16 %v2671_v18, %v2670_v20  ;;  %v4025_v20 = vpack.c.bf16 %v2836_v61, %v2835_v1 }
 0x71d   :  { %v2309_v45 = vsel %vm541_vm9, %v2304_v7, -inf  ;;  %4014 = vmatpush3.bf16.msra.mxu1 %v4013_v60 }
 0x71e   :  { %2310 = vmax.xlane.f32.xlu0 %v2309_v45  ;;  %4027 = vmatprep.subr.bf16.mxu1 %v4337_v15 }
 0x71f   :  { %v2453_v5 = vld [vmem:[#allocation3] sm:$0xff] }
 0x720   :  { %3835 = vmatmul.mubr.msk.f32.vlgmr.msra.gmra.mrb[50].mxu0 %vm216_vm3, %v2453_v5 }
 0x721   :  { %3837 = vmatprep.mubr.msk.f32.mxu0 %vm4338_vm5, %v4339_v16 }
 0x723   :  { %v2424_v3 = vpop.f32.mrb[54].mxu1 }
 0x724   :  { %2441 = vrot.lane.b32.xlu1 %v2424_v3, %s4353_s30  ;;  %v3819_v32 = vpop.f32.mrb[55].mxu1 }
 0x748   :  { %2313 = vmax.xlane.f32.xlu1 %v2312_v6  ;;  %v1437_v53 = vpop.permute.xlu1 %1436 }
 0x749   :  { %1445 = vst.msk [vmem:[#allocation3 + $0x8] sm:$0xff] %vm1443_vm1, %v1437_v53 }
 0x74c   :  { %v1439_v9 = vpop.permute.xlu0 %1438 }
 0x74d   :  { %1447 = vst.msk [vmem:[#allocation3 + $0x10] sm:$0x1] %vm1446_vm2, %v1439_v9 }
 0x750   :  { %v2454_v2 = vld [vmem:[#allocation3 + $0x8] sm:$0xff] }
 0x751   :  { %3838 = vmatmul.mubr.msk.f32.gmra.mrb[52].mxu0 %vm216_vm3, %v2454_v2 }
 0x752   :  { %3840 = vmatprep.mubr.msk.f32.mxu0 %vm4338_vm5, %v4339_v16 }
 0x75c   :  { %v1934_v62 = vpop.permute.xlu1 %1933 }
 0x75d   :  { %1942 = vst.msk [vmem:[#allocation3 + $0x11] sm:$0xff] %vm931_vm12, %v1934_v62 }
 0x768   :  { %v2188_v10 = vpop.permute.xlu1 %2187 }
 0x769   :  { %2196 = vst.msk [vmem:[#allocation3 + $0x11] sm:$0xff] %vm1187_vm14, %v2188_v10 }
 0x796   :  { %v2442_v11 = vpop.permute.xlu1 %2441 }
 0x797   :  { %2450 = vst.msk [vmem:[#allocation3 + $0x11] sm:$0xff] %vm1443_vm1, %v2442_v11 }
 0x79e   :  { %v2455_v22 = vld [vmem:[#allocation3 + $0x10] sm:$0xff] }
 0x79f   :  { %3841 = vmatmul.mubr.msk.f32.gmra.mrb[54].mxu0 %vm216_vm3, %v2455_v22 }
 0x7a0   :  { %3843 = vmatprep.mubr.msk.f32.mxu0 %vm4338_vm5, %v4339_v16 }
 0x7ab   :  { %v2311_v21 = vpop.xlane.xlu0 %2310 }
 0x7ac   :  { %v2316_v49 = vsub.f32 %v2304_v7, %v2311_v21  ;;  %v5341_v21 = vld [vmem:[%s5599_s11] ss:$0 sm:$0xff]  ;;  %s4354_s11 = smov [#allocation4]  }
 0x7ae   :  { %v2320_v23 = vmul.f32 1.442695, %v2316_v49 }
 0x7b0   :  { %4240 = vpow2.f32 %v2320_v23 }
 0x7ba   :  { %v4241_v36 = vpop.eup %4240 }
 0x7bb   :  { %v2327_v38 = vsel %vm541_vm9, %v4241_v36, 0.0 }
 0x7bc   :  { %2328 = vadd.xlane.f32.xlu1 %v2327_v38  ;;  %v5347_v38 = vld [vmem:[%s5600_s12] ss:$0 sm:$0xff]  ;;  %s3240_s12 = sshll.u32 %s4354_s11, 4  ;;  %s3241_s12 = int_to_ptr.vmem [resolvable:$true] %s3240_s12 }
 0x7bd   :  { %p4294_p1 = scmp.lt.s32.totalorder %s3241_s12, %s3241_s12 }
 0x7d5   :  { %v2314_v17 = vpop.xlane.xlu1 %2313 }
 0x7d6   :  { %v2317_v43 = vsub.f32 %v2305_v12, %v2314_v17 }
 0x7d8   :  { %v2322_v63 = vmul.f32 1.442695, %v2317_v43 }
 0x7f3   :  { %v2550_v42 = vpop.f32.mrb[50].mxu0 }
 0x7f4   :  { %v2551_v13 = vadd.f32 %v5288_v14, %v2550_v42  ;;  %v3836_v27 = vpop.f32.mrb[51].mxu0 }
 0x7f6   :  { %v5291_v8 = vadd.f32 %v4284_v19, %v2551_v13 }
 0x7f8   :  { %v2581_v58 = vsel %vm216_vm3, %v5291_v8, 0.0 }
 0x7f9   :  { %2582 = vadd.xlane.f32.xlu0 %v2581_v58 }
 0x824   :  { %v2555_v57 = vpop.f32.mrb[52].mxu0 }
 0x825   :  { %v2556_v26 = vadd.f32 %v5288_v14, %v2555_v57  ;;  %v3839_v34 = vpop.f32.mrb[53].mxu0 }
 0x827   :  { %v5296_v25 = vadd.f32 %v4285_v24, %v2556_v26 }
 0x829   :  { %v2584_v31 = vsel %vm216_vm3, %v5296_v25, 0.0 }
 0x82a   :  { %2585 = vadd.xlane.f32.xlu0 %v2584_v31 }
 0x849   :  { %v2329_v47 = vpop.xlane.xlu1 %2328 }
 0x84a   :  { %4242 = vrcp.f32 %v2329_v47 }
 0x84b   :  { %4244 = vpow2.f32 %v2322_v63 }
 0x854   :  { %v4243_v30 = vpop.eup %4242 }
 0x855   :  { %v2336_v48 = vmul.f32 %v4243_v30, %v4241_v36  ;;  %v4245_v46 = vpop.eup %4244 }
 0x856   :  { %v2330_v52 = vsel %vm548_vm10, %v4245_v46, 0.0 }
 0x857   :  { %3821 = vmatmul.mubr.msk.f32.gmra.mrb[56].mxu1 %vm541_vm9, %v2336_v48 }
 0x858   :  { %3823 = vmatprep.mubr.msk.f32.mxu1 %vm4338_vm5, %v4339_v16 }
 0x872   :  { %v2560_v35 = vpop.f32.mrb[54].mxu0 }
 0x873   :  { %v2561_v39 = vadd.f32 %v5288_v14, %v2560_v35  ;;  %v3842_v33 = vpop.f32.mrb[55].mxu0 }
 0x875   :  { %v5304_v54 = vadd.f32 %v4286_v40, %v2561_v39 }
 0x877   :  { %v2587_v44 = vsel %vm216_vm3, %v5304_v54, 0.0 }
 0x878   :  { %2588 = vadd.xlane.f32.xlu0 %v2587_v44  ;;  %v2829_v44 = vld [vmem:[%s5603_s15] sm:$0xff] }
 0x87c   :  { %2331 = vadd.xlane.f32.xlu0 %v2330_v52 }
 0x886   :  { %v2583_v37 = vpop.xlane.xlu0 %2582 }
 0x887   :  { %v2596_v56 = vmul.f32 0.03125, %v2583_v37  ;;  %v2831_v37 = vld [vmem:[%s5603_s15 + $0x10] sm:$0xff] }
 0x889   :  { %v2601_v51 = vsub.f32 %v5291_v8, %v2596_v56  ;;  %v2832_v56 = vld [vmem:[%s5603_s15 + $0x18] sm:$0xff] }
 0x88b   :  { %v2606_v28 = vmul.f32 %v2601_v51, %v2601_v51 }
 0x88d   :  { %v2611_v59 = vsel %vm216_vm3, %v2606_v28, 0.0  ;;  %v2833_v28 = vld [vmem:[%s5603_s15 + $0x20] sm:$0xff] }
 0x88e   :  { %2612 = vadd.xlane.f32.xlu1 %v2611_v59  ;;  %v2834_v59 = vld [vmem:[%s5603_s15 + $0x28] sm:$0xff] }
 0x88f   :  { %v4022_v41 = vpack.c.bf16 %v2834_v59, %v2833_v28  ;;  %v5432_v28 = vld [vmem:[%s5604_s16] ss:$0 sm:$0xff] }
 0x890   :  { %v4288_v59 = vld [vmem:[#allocation2 + $0x20] sm:$0x3] }
 0x8b7   :  { %v2586_v7 = vpop.xlane.xlu0 %2585 }
 0x8b8   :  { %v2597_v4 = vmul.f32 0.03125, %v2586_v7 }
 0x8ba   :  { %v2602_v45 = vsub.f32 %v5296_v25, %v2597_v4 }
 0x8bc   :  { %v2607_v5 = vmul.f32 %v2602_v45, %v2602_v45 }
 0x8be   :  { %v2614_v3 = vsel %vm216_vm3, %v2607_v5, 0.0 }
 0x8bf   :  { %2615 = vadd.xlane.f32.xlu0 %v2614_v3  ;;  %v5405_v3 = vld [vmem:[%s5602_s14] ss:$0 sm:$0xff] }
 0x8d5   :  { %1935 = vrot.lane.b32.xlu0 %v5251_v29, %s4351_s1 }
 0x8d9   :  { %2191 = vrot.lane.b32.xlu0 %v5258_v55, %s4352_s28 }
 0x905   :  { %v2589_v32 = vpop.xlane.xlu0 %2588 }
 0x906   :  { %v2598_v12 = vmul.f32 0.03125, %v2589_v32 }
 0x908   :  { %v2603_v6 = vsub.f32 %v5304_v54, %v2598_v12 }
 0x909   :  { %v2332_v53 = vpop.xlane.xlu0 %2331 }
 0x90a   :  { %4246 = vrcp.f32 %v2332_v53  ;;  %v2608_v9 = vmul.f32 %v2603_v6, %v2603_v6 }
 0x90c   :  { %v2617_v2 = vsel %vm216_vm3, %v2608_v9, 0.0 }
 0x90d   :  { %2618 = vadd.xlane.f32.xlu1 %v2617_v2 }
 0x914   :  { %v4247_v62 = vpop.eup %4246 }
 0x915   :  { %v2338_v10 = vmul.f32 %v4247_v62, %v4245_v46  ;;  %v2830_v46 = vld [vmem:[%s5603_s15 + $0x8] sm:$0xff] }
 0x916   :  { %v4016_v52 = vpack.c.bf16 %v2830_v46, %v2829_v44 }
 0x917   :  { %3824 = vmatmul.mubr.msk.f32.gmra.mrb[58].mxu1 %vm541_vm9, %v2338_v10 }
 0x918   :  { %3857 = vmatprep.mubr.msk.f32.mxu1 %vm4338_vm5, %v4339_v16  ;;  %4017 = vmatpush3.bf16.msra.mxu0 %v4016_v52 }
 0x919   :  { %4018 = vmatprep.subr.bf16.mxu0 %v4337_v15 }
 0x91b   :  { %v2613_v29 = vpop.xlane.xlu1 %2612 }
 0x91c   :  { %v2626_v11 = vmul.f32 0.03125, %v2613_v29 }
 0x91e   :  { %v2631_v55 = vadd.f32 1e-12, %v2626_v11  ;;  %2189 = vrot.lane.b32.xlu1 %v5256_v50, %s4352_s28 }
 0x920   :  { %4248 = vrsqrt.f32 %v2631_v55 }
 0x92a   :  { %v4249_v22 = vpop.eup %4248  ;;  %v2429_v49 = vpop.f32.mrb[56].mxu1 }
 0x92b   :  { %v2641_v23 = vmul.f32 %v4249_v22, %v2601_v51  ;;  %v3822_v36 = vpop.f32.mrb[57].mxu1  ;;  %2443 = vrot.lane.b32.xlu1 %v2429_v49, %s4353_s30  ;;  %v4019_v51 = vpack.c.bf16 %v2832_v56, %v2831_v37 }
 0x92d   :  { %v2652_v42 = vmul.f32 %v5341_v21, %v2641_v23  ;;  %4020 = vmatpush3.bf16.msra.mxu0 %v4019_v51 }
 0x92e   :  { %4021 = vmatprep.subr.bf16.mxu0 %v4337_v15 }
 0x92f   :  { %v2663_v50 = vadd.f32 %v5347_v38, %v2652_v42  ;;  %1937 = vrot.lane.b32.xlu1 %v5253_v0, %s4351_s1  ;;  %s4289_s1 = scalar_lea.vmem %s3241_s12, 32 }
 0x930   :  { %p4290_p0 = scmp.ne.s32.totalorder %s3241_s12, %s4289_s1  ;;  %p4295_p2 = scmp.lt.s32.totalorder %s4289_s1, %s4289_s1 }
 0x931   :  { %3858 = vmatmul.mubr.msk.f32.vlgmr.msra.gmra.mrb[60].mxu1 %vm216_vm3, %v2663_v50  ;;  %4023 = vmatpush3.bf16.msra.mxu0 %v4022_v41 }
 0x932   :  { %3860 = vmatprep.mubr.msk.f32.mxu1 %vm4338_vm5, %v4339_v16  ;;  %4024 = vmatprep.subr.bf16.mxu0 %v4337_v15  ;;  %p4296_p3 = por %p4295_p2, %p4294_p1 }
 0x934   :  { %p4297_p4 = pnand %p4296_p3, %p4290_p0 }
 0x935   :  { %4026 = vmatpush3.bf16.msra.mxu0 %v4025_v20 }
 0x94c   :  { %v2616_v13 = vpop.xlane.xlu0 %2615 }
 0x94d   :  { %v2627_v27 = vmul.f32 0.03125, %v2616_v13 }
 0x94f   :  { %v2632_v19 = vadd.f32 1e-12, %v2627_v27 }
 0x950   :  { %v1936_v58 = vpop.permute.xlu0 %1935 }
 0x951   :  { %4250 = vrsqrt.f32 %v2632_v19  ;;  %1943 = vst.msk [vmem:[#allocation3 + $0x19] sm:$0xff] %vm931_vm12, %v1936_v58 }
 0x954   :  { %v2192_v43 = vpop.permute.xlu0 %2191 }
 0x95b   :  { %v4251_v57 = vpop.eup %4250 }
 0x95c   :  { %v2642_v26 = vmul.f32 %v4251_v57, %v2602_v45 }
 0x95e   :  { %v2653_v34 = vmul.f32 %v5341_v21, %v2642_v26 }
 0x960   :  { %v2664_v24 = vadd.f32 %v5347_v38, %v2653_v34 }
 0x962   :  { %3861 = vmatmul.mubr.msk.f32.gmra.mrb[62].mxu1 %vm216_vm3, %v2664_v24 }
 0x963   :  { %3863 = vmatprep.mubr.msk.f32.mxu1 %vm4338_vm5, %v4339_v16 }
 0x99a   :  { %v2619_v0 = vpop.xlane.xlu1 %2618 }
 0x99b   :  { %v2628_v31 = vmul.f32 0.03125, %v2619_v0  ;;  %v4287_v0 = vld [vmem:[#allocation2 + $0x18] sm:$0xff] }
 0x99d   :  { %v2633_v17 = vadd.f32 1e-12, %v2628_v31 }
 0x99e   :  { %v2190_v47 = vpop.permute.xlu1 %2189 }
 0x99f   :  { %4252 = vrsqrt.f32 %v2633_v17  ;;  %2197 = vst.msk [vmem:[#allocation3 + $0x19] sm:$0xff] %vm1187_vm14, %v2190_v47 }
 0x9a2   :  { %v2444_v30 = vpop.permute.xlu1 %2443 }
 0x9a3   :  { %2451 = vst.msk [vmem:[#allocation3 + $0x19] sm:$0xff] %vm1443_vm1, %v2444_v30 }
 0x9a6   :  { %v1938_v48 = vpop.permute.xlu1 %1937 }
 0x9a7   :  { %1944 = vst.msk [vmem:[#allocation3 + $0x21] sm:$0x1] %vm934_vm13, %v1938_v48 }
 0x9a8   :  { %2198 = vst.msk [vmem:[#allocation3 + $0x21] sm:$0x1] %vm1190_vm15, %v2192_v43 }
 0x9a9   :  { %v4253_v63 = vpop.eup %4252 }
 0x9aa   :  { %v2456_v35 = vld [vmem:[#allocation3 + $0x18] sm:$0xff]  ;;  %v2643_v39 = vmul.f32 %v4253_v63, %v2603_v6 }
 0x9ab   :  { %3844 = vmatmul.mubr.msk.f32.gmra.mrb[56].mxu0 %vm216_vm3, %v2456_v35 }
 0x9ac   :  { %v2654_v33 = vmul.f32 %v5341_v21, %v2643_v39  ;;  %3846 = vmatprep.mubr.msk.f32.mxu0 %vm4338_vm5, %v4339_v16 }
 0x9ae   :  { %v2665_v40 = vadd.f32 %v5347_v38, %v2654_v33 }
 0x9b0   :  { %3864 = vmatmul.mubr.msk.f32.gmra.mrb[64].mxu1 %vm216_vm3, %v2665_v40 }
 0x9b1   :  { %3866 = vmatprep.mubr.msk.f32.mxu1 %vm4338_vm5, %v4339_v16 }
 0x9ea   :  { %v2434_v18 = vpop.f32.mrb[58].mxu1 }
 0x9eb   :  { %2445 = vrot.lane.b32.xlu1 %v2434_v18, %s4353_s30  ;;  %v3825_v60 = vpop.f32.mrb[59].mxu1 }
 0xa04   :  { %v2760_v7 = vpop.f32.mrb[60].mxu1 }
 0xa05   :  { %v3859_v4 = vpop.f32.mrb[61].mxu1  ;;  %v2761_v32 = vadd.f32 %v5405_v3, %v2760_v7 }
 0xa07   :  { %v2789_v12 = vmul.f32 0.044715, %v2761_v32  ;;  %v2784_v13 = vmul.f32 0.5, %v2761_v32 }
 0xa09   :  { %v2794_v53 = vmul.f32 %v2789_v12, %v2761_v32 }
 0xa0b   :  { %v2799_v2 = vmul.f32 %v2794_v53, %v2761_v32 }
 0xa0d   :  { %v2804_v10 = vadd.f32 %v2799_v2, %v2761_v32 }
 0xa0f   :  { %v2809_v11 = vmul.f32 0.7978846, %v2804_v10 }
 0xa11   :  { %4254 = vtanh.f32 %v2809_v11 }
 0xa1b   :  { %v4255_v23 = vpop.eup %4254 }
 0xa1c   :  { %v2819_v36 = vadd.f32 1.0, %v4255_v23 }
 0xa1e   :  { %v2824_v27 = vmul.f32 %v2819_v36, %v2784_v13 }
 0xa35   :  { %v2765_v45 = vpop.f32.mrb[62].mxu1 }
 0xa36   :  { %v3862_v5 = vpop.f32.mrb[63].mxu1  ;;  %v2766_v6 = vadd.f32 %v5405_v3, %v2765_v45 }
 0xa38   :  { %v2790_v9 = vmul.f32 0.044715, %v2766_v6  ;;  %v2785_v58 = vmul.f32 0.5, %v2766_v6 }
 0xa3a   :  { %v2795_v62 = vmul.f32 %v2790_v9, %v2766_v6 }
 0xa3c   :  { %v2800_v29 = vmul.f32 %v2795_v62, %v2766_v6 }
 0xa3e   :  { %v2805_v55 = vadd.f32 %v2800_v29, %v2766_v6 }
 0xa40   :  { %v2810_v22 = vmul.f32 0.7978846, %v2805_v55 }
 0xa42   :  { %4256 = vtanh.f32 %v2810_v22 }
 0xa4c   :  { %v4257_v42 = vpop.eup %4256 }
 0xa4d   :  { %v2820_v19 = vadd.f32 1.0, %v4257_v42 }
 0xa4f   :  { %v2825_v57 = vmul.f32 %v2820_v19, %v2785_v58 }
 0xa5d   :  { %v2446_v49 = vpop.permute.xlu1 %2445 }
 0xa5e   :  { %2452 = vst.msk [vmem:[#allocation3 + $0x21] sm:$0x1] %vm1446_vm2, %v2446_v49 }
 0xa65   :  { %v2457_v50 = vld [vmem:[#allocation3 + $0x20] sm:$0x3] }
 0xa66   :  { %3847 = vmatmul.mubr.msk.f32.gmra.mrb[58].mxu0 %vm216_vm3, %v2457_v50 }
 0xa67   :  { %3888 = vmatprep.mubr.msk.f32.mxu0 %vm4338_vm5, %v4339_v16 }
 0xa6a   :  { %3889 = vmatmul.mubr.msk.f32.vlgmr.msra.gmra.mrb[60].mxu0 %vm98_vm0, %v2824_v27 }
 0xa6b   :  { %3891 = vmatprep.mubr.msk.f32.mxu0 %vm4338_vm5, %v4339_v16 }
 0xa6e   :  { %3892 = vmatmul.mubr.msk.f32.gmra.mrb[62].mxu0 %vm98_vm0, %v2825_v57 }
 0xa6f   :  { %3894 = vmatprep.mubr.msk.f32.mxu0 %vm4338_vm5, %v4339_v16 }
 0xa7e   :  { %v2565_v26 = vpop.f32.mrb[56].mxu0 }
 0xa7f   :  { %v2566_v34 = vadd.f32 %v5288_v14, %v2565_v26  ;;  %v3845_v24 = vpop.f32.mrb[57].mxu0 }
 0xa81   :  { %v5420_v31 = vadd.f32 %v4287_v0, %v2566_v34 }
 0xa83   :  { %v2770_v17 = vpop.f32.mrb[64].mxu1  ;;  %v2590_v47 = vsel %vm216_vm3, %v5420_v31, 0.0 }
 0xa84   :  { %v2771_v30 = vadd.f32 %v5405_v3, %v2770_v17  ;;  %v3865_v48 = vpop.f32.mrb[65].mxu1  ;;  %2591 = vadd.xlane.f32.xlu0 %v2590_v47 }
 0xa86   :  { %v2791_v43 = vmul.f32 0.044715, %v2771_v30  ;;  %v2786_v44 = vmul.f32 0.5, %v2771_v30 }
 0xa88   :  { %v2796_v63 = vmul.f32 %v2791_v43, %v2771_v30 }
 0xa8a   :  { %v2801_v35 = vmul.f32 %v2796_v63, %v2771_v30  ;;  %v3050_v63 = vld [vmem:[%s5607_s19 + $0x8] sm:$0xff] }
 0xa8c   :  { %v2806_v39 = vadd.f32 %v2801_v35, %v2771_v30 }
 0xa8e   :  { %v2811_v33 = vmul.f32 0.7978846, %v2806_v39  ;;  %v3051_v39 = vld [vmem:[%s5607_s19 + $0x10] sm:$0xff] }
 0xa90   :  { %4258 = vtanh.f32 %v2811_v33  ;;  %v3052_v33 = vld [vmem:[%s5607_s19 + $0x18] sm:$0xff] }
 0xa9a   :  { %v4259_v40 = vpop.eup %4258 }
 0xa9b   :  { %v2821_v46 = vadd.f32 1.0, %v4259_v40  ;;  %v4031_v40 = vpack.c.bf16 %v3052_v33, %v3051_v39 }
 0xa9d   :  { %v2826_v52 = vmul.f32 %v2821_v46, %v2786_v44 }
 0xa9f   :  { %3895 = vmatmul.mubr.msk.f32.gmra.mrb[64].mxu0 %vm98_vm0, %v2826_v52 }
 0xaa0   :  { %3897 = vmatprep.mubr.msk.f32.mxu0 %vm4338_vm5, %v4339_v16 }
 0xb11   :  { %v2592_v45 = vpop.xlane.xlu0 %2591 }
 0xb12   :  { %v2599_v5 = vmul.f32 0.03125, %v2592_v45 }
 0xb14   :  { %v2604_v12 = vsub.f32 %v5420_v31, %v2599_v5 }
 0xb16   :  { %v2609_v62 = vmul.f32 %v2604_v12, %v2604_v12 }
 0xb39   :  { %v2570_v37 = vpop.f32.mrb[58].mxu0 }
 0xb3a   :  { %v2571_v56 = vadd.f32 %v5288_v14, %v2570_v37  ;;  %v3848_v51 = vpop.f32.mrb[59].mxu0 }
 0xb3c   :  { %v5434_v41 = vadd.f32 %v4288_v59, %v2571_v56 }
 0xb3d   :  { %v2925_v1 = vpop.f32.mrb[60].mxu0 }
 0xb3e   :  { %v2926_v61 = vadd.f32 %v5432_v28, %v2925_v1  ;;  %v3890_v20 = vpop.f32.mrb[61].mxu0  ;;  %v2593_v18 = vsel %vm243_vm4, %v5434_v41, 0.0 }
 0xb3f   :  { %2594 = vadd.xlane.f32.xlu1 %v2593_v18  ;;  %v5479_v18 = vld [vmem:[%s5605_s17] ss:$0 sm:$0xff] }
 0xb40   :  { %v2949_v60 = vadd.f32 %v2926_v61, %v5291_v8  ;;  %v2620_v8 = vsel %vm216_vm3, %v2609_v62, 0.0 }
 0xb41   :  { %v2930_v14 = vpop.f32.mrb[62].mxu0 }
 0xb42   :  { %v3893_v7 = vpop.f32.mrb[63].mxu0  ;;  %v2956_v4 = vsel %vm216_vm3, %v2949_v60, 0.0  ;;  %v2931_v27 = vadd.f32 %v5432_v28, %v2930_v14 }
 0xb43   :  { %2957 = vadd.xlane.f32.xlu0 %v2956_v4  ;;  %v5485_v7 = vld [vmem:[%s5606_s18] ss:$0 sm:$0xff] }
 0xb44   :  { %v5451_v34 = vadd.f32 %v2931_v27, %v5296_v25  ;;  %v3049_v25 = vld [vmem:[%s5607_s19] sm:$0xff]  ;;  %v3137_v27 = vld [vmem:[%s5609_s21 + $0x10] sm:$0xff] }
 0xb45   :  { %v4028_v35 = vpack.c.bf16 %v3050_v63, %v3049_v25 }
 0xb46   :  { %v2959_v17 = vsel %vm216_vm3, %v5451_v34, 0.0 }
 0xb47   :  { %4029 = vmatpush3.bf16.msra.mxu1 %v4028_v35 }
 0xb48   :  { %4030 = vmatprep.subr.bf16.mxu1 %v4337_v15 }
 0xb4b   :  { %4032 = vmatpush3.bf16.msra.mxu1 %v4031_v40 }
 0xb4c   :  { %4033 = vmatprep.subr.bf16.mxu1 %v4337_v15 }
 0xb72   :  { %v2935_v32 = vpop.f32.mrb[64].mxu0 }
 0xb73   :  { %v2936_v6 = vadd.f32 %v5432_v28, %v2935_v32  ;;  %v3896_v53 = vpop.f32.mrb[65].mxu0 }
 0xb75   :  { %v2951_v9 = vadd.f32 %v2936_v6, %v5304_v54 }
 0xb77   :  { %v2962_v2 = vsel %vm216_vm3, %v2951_v9, 0.0 }
 0xb78   :  { %2963 = vadd.xlane.f32.xlu0 %v2962_v2 }
 0xb7c   :  { %2621 = vadd.xlane.f32.xlu0 %v2620_v8 }
 0xbcc   :  { %v2595_v10 = vpop.xlane.xlu1 %2594 }
 0xbcd   :  { %v2600_v29 = vmul.f32 0.03125, %v2595_v10 }
 0xbcf   :  { %v2605_v11 = vsub.f32 %v5434_v41, %v2600_v29 }
 0xbd0   :  { %v2958_v55 = vpop.xlane.xlu0 %2957 }
 0xbd1   :  { %v2971_v22 = vmul.f32 0.03125, %v2958_v55  ;;  %v2610_v49 = vmul.f32 %v2605_v11, %v2605_v11 }
 0xbd3   :  { %v2976_v23 = vsub.f32 %v2949_v60, %v2971_v22  ;;  %v2623_v36 = vsel %vm243_vm4, %v2610_v49, 0.0 }
 0xbd4   :  { %2624 = vadd.xlane.f32.xlu1 %v2623_v36  ;;  %v3136_v36 = vld [vmem:[%s5609_s21 + $0x8] sm:$0xff] }
 0xbd5   :  { %v2981_v42 = vmul.f32 %v2976_v23, %v2976_v23 }
 0xbd7   :  { %v2986_v54 = vsel %vm216_vm3, %v2981_v42, 0.0 }
 0xbd8   :  { %2987 = vadd.xlane.f32.xlu0 %v2986_v54 }
 0xc05   :  { %v2964_v50 = vpop.xlane.xlu0 %2963 }
 0xc06   :  { %v2973_v13 = vmul.f32 0.03125, %v2964_v50 }
 0xc08   :  { %v2978_v19 = vsub.f32 %v2951_v9, %v2973_v13 }
 0xc09   :  { %v2622_v58 = vpop.xlane.xlu0 %2621 }
 0xc0a   :  { %v2629_v57 = vmul.f32 0.03125, %v2622_v58  ;;  %v2983_v26 = vmul.f32 %v2978_v19, %v2978_v19 }
 0xc0c   :  { %v2634_v24 = vadd.f32 1e-12, %v2629_v57  ;;  %v2992_v0 = vsel %vm216_vm3, %v2983_v26, 0.0 }
 0xc0d   :  { %2993 = vadd.xlane.f32.xlu1 %v2992_v0 }
 0xc0e   :  { %4260 = vrsqrt.f32 %v2634_v24 }
 0xc11   :  { %2960 = vadd.xlane.f32.xlu1 %v2959_v17 }
 0xc18   :  { %v4261_v47 = vpop.eup %4260 }
 0xc19   :  { %v2644_v30 = vmul.f32 %v4261_v47, %v2604_v12 }
 0xc1b   :  { %v2655_v48 = vmul.f32 %v5341_v21, %v2644_v30 }
 0xc1d   :  { %v2666_v43 = vadd.f32 %v5347_v38, %v2655_v48 }
 0xc1f   :  { %3867 = vmatmul.mubr.msk.f32.gmra.mrb[66].mxu1 %vm216_vm3, %v2666_v43 }
 0xc20   :  { %3869 = vmatprep.mubr.msk.f32.mxu1 %vm4338_vm5, %v4339_v16 }
 0xc61   :  { %v2625_v44 = vpop.xlane.xlu1 %2624 }
 0xc62   :  { %v2630_v46 = vmul.f32 0.03125, %v2625_v44 }
 0xc64   :  { %v2635_v52 = vadd.f32 1e-12, %v2630_v46 }
 0xc65   :  { %v2988_v37 = vpop.xlane.xlu0 %2987 }
 0xc66   :  { %4262 = vrsqrt.f32 %v2635_v52  ;;  %v3001_v56 = vmul.f32 0.03125, %v2988_v37 }
 0xc68   :  { %v3006_v51 = vadd.f32 1e-12, %v3001_v56 }
 0xc6a   :  { %4264 = vrsqrt.f32 %v3006_v51 }
 0xc70   :  { %v4263_v59 = vpop.eup %4262 }
 0xc71   :  { %v2645_v1 = vmul.f32 %v4263_v59, %v2605_v11 }
 0xc73   :  { %v2656_v61 = vmul.f32 %v5341_v21, %v2645_v1  ;;  %v3381_v1 = vld [vmem:[%s5610_s22] ss:$0 sm:$0xff] }
 0xc74   :  { %v4265_v20 = vpop.eup %4264 }
 0xc75   :  { %v3016_v60 = vmul.f32 %v4265_v20, %v2976_v23  ;;  %v2667_v14 = vadd.f32 %v5347_v38, %v2656_v61  ;;  %v3135_v23 = vld [vmem:[%s5609_s21] sm:$0xff] }
 0xc76   :  { %v4034_v50 = vpack.c.bf16 %v3136_v36, %v3135_v23 }
 0xc77   :  { %v3027_v4 = vmul.f32 %v5479_v18, %v3016_v60  ;;  %3870 = vmatmul.mubr.msk.f32.gmra.mrb[68].mxu1 %vm216_vm3, %v2667_v14 }
 0xc78   :  { %3911 = vmatprep.mubr.msk.f32.mxu1 %vm4338_vm5, %v4339_v16 }
 0xc79   :  { %v3038_v21 = vadd.f32 %v5485_v7, %v3027_v4 }
 0xc7b   :  { %3043 = vst.msk [vmem:[%s5611_s23] sm:$0xff] %vm216_vm3, %v3038_v21 }
 0xc9a   :  { %v2994_v38 = vpop.xlane.xlu1 %2993 }
 0xc9b   :  { %v3003_v45 = vmul.f32 0.03125, %v2994_v38 }
 0xc9d   :  { %v3008_v5 = vadd.f32 1e-12, %v3003_v45 }
 0xc9e   :  { %v2961_v59 = vpop.xlane.xlu1 %2960 }
 0xc9f   :  { %4266 = vrsqrt.f32 %v3008_v5  ;;  %v2972_v61 = vmul.f32 0.03125, %v2961_v59 }
 0xca9   :  { %v4267_v32 = vpop.eup %4266 }
 0xcaa   :  { %v3018_v12 = vmul.f32 %v4267_v32, %v2978_v19  ;;  %v3138_v19 = vld [vmem:[%s5609_s21 + $0x18] sm:$0xff] }
 0xcab   :  { %v4037_v58 = vpack.c.bf16 %v3138_v19, %v3137_v27 }
 0xcac   :  { %v3029_v6 = vmul.f32 %v5479_v18, %v3018_v12 }
 0xcae   :  { %v3040_v53 = vadd.f32 %v5485_v7, %v3029_v6 }
 0xcb0   :  { %3045 = vst.msk [vmem:[%s5611_s23 + $0x10] sm:$0xff] %vm216_vm3, %v3040_v53  ;;  %v3048_v9 = vsel %vm593_vm8, %v3038_v21, %v3040_v53  ;;  %v2977_v21 = vsub.f32 %v5451_v34, %v2972_v61 }
 0xcb1   :  { %3912 = vmatmul.mubr.msk.f32.vlgmr.msra.gmra.mrb[70].mxu1 %vm216_vm3, %v3048_v9 }
 0xcb2   :  { %3922 = vmatprep.mubr.msk.f32.mxu1 %vm4338_vm5, %v4339_v16  ;;  %4035 = vmatpush3.bf16.msra.mxu1 %v4034_v50  ;;  %v2982_v5 = vmul.f32 %v2977_v21, %v2977_v21 }
 0xcb3   :  { %4036 = vmatprep.subr.bf16.mxu1 %v4337_v15 }
 0xcb4   :  { %v2989_v32 = vsel %vm216_vm3, %v2982_v5, 0.0 }
 0xcb6   :  { %4038 = vmatpush3.bf16.msra.mxu1 %v4037_v58 }
 0xcf2   :  { %v2775_v2 = vpop.f32.mrb[66].mxu1 }
 0xcf3   :  { %v2776_v62 = vadd.f32 %v5405_v3, %v2775_v2  ;;  %v3868_v8 = vpop.f32.mrb[67].mxu1 }
 0xcf5   :  { %v2792_v10 = vmul.f32 0.044715, %v2776_v62  ;;  %v2787_v42 = vmul.f32 0.5, %v2776_v62 }
 0xcf7   :  { %v2797_v29 = vmul.f32 %v2792_v10, %v2776_v62 }
 0xcf9   :  { %v2802_v11 = vmul.f32 %v2797_v29, %v2776_v62 }
 0xcfb   :  { %v2807_v55 = vadd.f32 %v2802_v11, %v2776_v62 }
 0xcfd   :  { %v2812_v22 = vmul.f32 0.7978846, %v2807_v55 }
 0xcff   :  { %4268 = vtanh.f32 %v2812_v22 }
 0xd09   :  { %v4269_v49 = vpop.eup %4268 }
 0xd0a   :  { %v2822_v54 = vadd.f32 1.0, %v4269_v49 }
 0xd0c   :  { %v2827_v13 = vmul.f32 %v2822_v54, %v2787_v42 }
 0xd0e   :  { %3898 = vmatmul.mubr.msk.f32.gmra.mrb[66].mxu0 %vm98_vm0, %v2827_v13 }
 0xd0f   :  { %3900 = vmatprep.mubr.msk.f32.mxu0 %vm4338_vm5, %v4339_v16  ;;  %v3379_v16 = vld [vmem:[%s5608_s20] ss:$0 sm:$0xff] }
 0xd4a   :  { %v2780_v57 = vpop.f32.mrb[68].mxu1 }
 0xd4b   :  { %v2781_v26 = vadd.f32 %v5405_v3, %v2780_v57  ;;  %v3871_v24 = vpop.f32.mrb[69].mxu1 }
 0xd4d   :  { %v2793_v15 = vmul.f32 0.044715, %v2781_v26  ;;  %v2788_v43 = vmul.f32 0.5, %v2781_v26 }
 0xd4f   :  { %v2798_v0 = vmul.f32 %v2793_v15, %v2781_v26 }
 0xd51   :  { %v2803_v17 = vmul.f32 %v2798_v0, %v2781_v26 }
 0xd53   :  { %v2808_v47 = vadd.f32 %v2803_v17, %v2781_v26 }
 0xd55   :  { %v2813_v30 = vmul.f32 0.7978846, %v2808_v47 }
 0xd57   :  { %4270 = vtanh.f32 %v2813_v30 }
 0xd61   :  { %v4271_v48 = vpop.eup %4270 }
 0xd62   :  { %v2823_v25 = vadd.f32 1.0, %v4271_v48 }
 0xd64   :  { %v2828_v63 = vmul.f32 %v2823_v25, %v2788_v43 }
 0xd66   :  { %3901 = vmatmul.mubr.msk.f32.gmra.mrb[68].mxu0 %vm98_vm0, %v2828_v63  ;;  %vm3219_vm0 = vcmask 74752  }
 0xd84   :  { %v3129_v35 = vpop.f32.mrb[70].mxu1 }
 0xd85   :  { %v3130_v39 = vadd.f32 %v3379_v16, %v3129_v35  ;;  %v3913_v3 = vpop.f32.mrb[71].mxu1 }
 0xd87   :  { %4272 = vtanh.f32 %v3130_v39 }
 0xd91   :  { %v4273_v33 = vpop.eup %4272 }
 0xd92   :  { %3134 = vst.msk [vmem:[#allocation4] sm:$0x3] %vm243_vm4, %v4273_v33  ;;  %3923 = vmatmul.mubr.msk.f32.vlgmr.msra.gmra.mrb[72].mxu1 %vm216_vm3, %v4273_v33 }
 0xde1   :  { %v2940_v40 = vpop.f32.mrb[66].mxu0 }
 0xde2   :  { %v3899_v44 = vpop.f32.mrb[67].mxu0  ;;  %v2941_v20 = vadd.f32 %v5432_v28, %v2940_v40 }
 0xde4   :  { %v2952_v38 = vadd.f32 %v2941_v20, %v5420_v31 }
 0xde6   :  { %v2965_v45 = vsel %vm216_vm3, %v2952_v38, 0.0 }
 0xe39   :  { %v2945_v46 = vpop.f32.mrb[68].mxu0 }
 0xe3a   :  { %v2946_v52 = vadd.f32 %v5432_v28, %v2945_v46  ;;  %v3902_v37 = vpop.f32.mrb[69].mxu0 }
 0xe3c   :  { %v2953_v56 = vadd.f32 %v2946_v52, %v5434_v41 }
 0xe3e   :  { %v2968_v51 = vsel %vm243_vm4, %v2953_v56, 0.0 }
 0xe3f   :  { %2969 = vadd.xlane.f32.xlu1 %v2968_v51 }
 0xe65   :  { %v3215_v60 = vpop.f32.mrb[72].mxu1 }
 0xe66   :  { %v3216_v14 = vadd.f32 %v3381_v1, %v3215_v60  ;;  %v3924_v4 = vpop.f32.mrb[73].mxu1 }
 0xe68   :  { %v3220_v41 = vsel %vm3219_vm0, %v3216_v14, -inf }
 0xe69   :  { %3221 = vmax.xlane.f32.xlu0 %v3220_v41 }
 0xe6d   :  { %2966 = vadd.xlane.f32.xlu0 %v2965_v45 }
 0xe71   :  { %2990 = vadd.xlane.f32.xlu0 %v2989_v32 }
 0xecc   :  { %v2970_v12 = vpop.xlane.xlu1 %2969 }
 0xecd   :  { %v2975_v28 = vmul.f32 0.03125, %v2970_v12 }
 0xecf   :  { %v2980_v6 = vsub.f32 %v2953_v56, %v2975_v28 }
 0xed1   :  { %v2985_v53 = vmul.f32 %v2980_v6, %v2980_v6 }
 0xed3   :  { %v2998_v9 = vsel %vm243_vm4, %v2985_v53, 0.0 }
 0xed4   :  { %2999 = vadd.xlane.f32.xlu0 %v2998_v9 }
 0xef6   :  { %v3222_v34 = vpop.xlane.xlu0 %3221 }
 0xef7   :  { %v3223_v2 = vsub.f32 %v3216_v14, %v3222_v34 }
 0xef9   :  { %v3224_v31 = vmul.f32 1.442695, %v3223_v2 }
 0xefa   :  { %v2967_v62 = vpop.xlane.xlu0 %2966 }
 0xefb   :  { %4274 = vpow2.f32 %v3224_v31  ;;  %v2974_v8 = vmul.f32 0.03125, %v2967_v62 }
 0xefd   :  { %v2979_v10 = vsub.f32 %v2952_v38, %v2974_v8 }
 0xefe   :  { %v2991_v29 = vpop.xlane.xlu0 %2990 }
 0xeff   :  { %v3002_v11 = vmul.f32 0.03125, %v2991_v29  ;;  %v2984_v55 = vmul.f32 %v2979_v10, %v2979_v10 }
 0xf01   :  { %v3007_v22 = vadd.f32 1e-12, %v3002_v11  ;;  %v2995_v49 = vsel %vm216_vm3, %v2984_v55, 0.0 }
 0xf02   :  { %2996 = vadd.xlane.f32.xlu1 %v2995_v49 }
 0xf03   :  { %4276 = vrsqrt.f32 %v3007_v22 }
 0xf05   :  { %v4275_v23 = vpop.eup %4274 }
 0xf06   :  { %v3226_v36 = vsel %vm3219_vm0, %v4275_v23, 0.0 }
 0xf07   :  { %3227 = vadd.xlane.f32.xlu1 %v3226_v36 }
 0xf0d   :  { %v4277_v42 = vpop.eup %4276 }
 0xf0e   :  { %v3017_v54 = vmul.f32 %v4277_v42, %v2977_v21 }
 0xf10   :  { %v3028_v50 = vmul.f32 %v5479_v18, %v3017_v54 }
 0xf12   :  { %v3039_v13 = vadd.f32 %v5485_v7, %v3028_v50 }
 0xf14   :  { %3044 = vst.msk [vmem:[%s5611_s23 + $0x8] sm:$0xff] %vm216_vm3, %v3039_v13 }
 0xf15   :  { %4300 = shalt.err (!%p4297_p4)
}
 0xf16   :  { %s4301_s26 = scalar_lea.hbm %s5612_s24, 32 }
 0xf17   :  { %p4302_p5 = scmp.ne.s32.totalorder %s5612_s24, %s4301_s26  ;;  %p4305_p6 = scmp.lt.u32.totalorder %s4301_s26, %s5612_s24 }
 0xf19   :  { %p4307_p7 = pnand %p4305_p6, %p4302_p5 }
 0xf1b   :  { %4310 = shalt.err (!%p4307_p7)
}
 0xf1c   :  { %3243 = dma.vmem_to_hbm [thread:$0]  %s3241_s12, 32, %s5612_s24, [#allocation5]  }
 0xf1d   :  { %s4355_s24 = smov [#allocation6]  }
 0xf1e   :  { %s3250_s6 = sshll.u32 %s4355_s24, 4  ;;  %s3251_s6 = int_to_ptr.vmem [resolvable:$true] %s3250_s6 }
 0xf1f   :  { %s4311_s9 = scalar_lea.vmem %s3251_s6, 32  ;;  %p4316_p9 = scmp.lt.s32.totalorder %s3251_s6, %s3251_s6 }
 0xf20   :  { %p4312_p8 = scmp.ne.s32.totalorder %s3251_s6, %s4311_s9  ;;  %p4317_p10 = scmp.lt.s32.totalorder %s4311_s9, %s4311_s9 }
 0xf22   :  { %p4318_p11 = por %p4317_p10, %p4316_p9 }
 0xf24   :  { %p4319_p12 = pnand %p4318_p11, %p4312_p8 }
 0xf61   :  { %v3000_v27 = vpop.xlane.xlu0 %2999 }
 0xf62   :  { %v3005_v19 = vmul.f32 0.03125, %v3000_v27 }
 0xf64   :  { %v3010_v58 = vadd.f32 1e-12, %v3005_v19 }
 0xf66   :  { %4278 = vrsqrt.f32 %v3010_v58 }
 0xf70   :  { %v4279_v57 = vpop.eup %4278 }
 0xf71   :  { %v3020_v26 = vmul.f32 %v4279_v57, %v2980_v6 }
 0xf73   :  { %v3031_v24 = vmul.f32 %v5479_v18, %v3020_v26 }
 0xf75   :  { %v3042_v15 = vadd.f32 %v5485_v7, %v3031_v24 }
 0xf77   :  { %3047 = vst.msk [vmem:[%s5611_s23 + $0x20] sm:$0x3] %vm243_vm4, %v3042_v15 }
 0xf8f   :  { %v2997_v0 = vpop.xlane.xlu1 %2996 }
 0xf90   :  { %v3004_v17 = vmul.f32 0.03125, %v2997_v0 }
 0xf92   :  { %v3009_v47 = vadd.f32 1e-12, %v3004_v17 }
 0xf94   :  { %4280 = vrsqrt.f32 %v3009_v47  ;;  %v3228_v30 = vpop.xlane.xlu1 %3227 }
 0xf95   :  { %4282 = vrcp.f32 %v3228_v30 }
 0xf9e   :  { %v4281_v48 = vpop.eup %4280 }
 0xf9f   :  { %v4283_v43 = vpop.eup %4282  ;;  %v3019_v25 = vmul.f32 %v4281_v48, %v2979_v10 }
 0xfa0   :  { %v3230_v63 = vmul.f32 %v4283_v43, %v4275_v23 }
 0xfa1   :  { %v3030_v16 = vmul.f32 %v5479_v18, %v3019_v25 }
 0xfa2   :  { %3231 = vst.msk [vmem:[#allocation6] sm:$0x3] %vm3219_vm0, %v3230_v63 }
 0xfa3   :  { %v3041_v35 = vadd.f32 %v5485_v7, %v3030_v16 }
 0xfa4   :  { %4322 = shalt.err (!%p4319_p12)
}
 0xfa5   :  { %s4323_s0 = scalar_lea.hbm %s5613_s25, 32 }
 0xfa6   :  { %p4324_p13 = scmp.ne.s32.totalorder %s5613_s25, %s4323_s0  ;;  %p4327_p0 = scmp.lt.u32.totalorder %s4323_s0, %s5613_s25 }
 0xfa8   :  { %p4329_p1 = pnand %p4327_p0, %p4324_p13 }
 0xfaa   :  { %4332 = shalt.err (!%p4329_p1)
}
 0xfab   :  { %3253 = dma.vmem_to_hbm [thread:$0]  %s3251_s6, 32, %s5613_s25, [#allocation7]   ;;  %3046 = vst.msk [vmem:[%s5611_s23 + $0x18] sm:$0xff] %vm216_vm3, %v3041_v35 }
 0xfac   :  { %4333 = dma.done.wait [#allocation5], 32  }
 0xfad   :  { %4334 = vsyncadd [#allocation5], 4294967264 }
 0xfae   :  { %4335 = dma.done.wait [#allocation7], 32  }
 0xfaf   :  { %4336 = vsyncadd [#allocation7], 4294967264 }
 0xfb0   :  { %3262 = vsyncpa [#allocation5], 1 }
 0xfb1   :  { %3263 = vsyncpa [#allocation7], 1 }

</bundles_post_ra>
